<compile_context>
chip_gen: v6e
topology: v6e:2x2x1
jax: 0.10.0
libtpu: 0.0.40
codegen_flags: <defaults>
</compile_context>

<pallas_src>
import jax
import jax.numpy as jnp
from jax.experimental import pallas as pl
from jax.experimental.pallas import tpu as pltpu

# bf16 MXU inputs are valid on v5e/v6e/v7x; accumulation is always f32.
_MXU_DTYPE = jnp.bfloat16


# ----------------------------------------------------------------------------
# Fused forward kernel
#   grid = (batch_tiles [parallel], fc1_column_tiles [arbitrary])
#   conv1..conv3 + flatten run once per batch tile (j == 0) into VMEM scratch;
#   every j-step consumes one 128-column block of fc1 and one 128-row block of
#   fc2 (fc2 accumulated across j).
# ----------------------------------------------------------------------------
def _cnn_policy_kernel(p1_ref, w1_ref, b1_ref, w2p_ref, b2_ref, w3p_ref, b3_ref,
                       extra_ref, w1c_ref, w1e_ref, b1f_ref, w2f_ref, b2f_ref,
                       out_ref, h1_ref, h2_ref, h3_ref, flat_ref, acc_ref):
    f32 = jnp.float32
    Bt = h1_ref.shape[0]
    j = pl.program_id(1)

    def mm(a, w):
        # Weights already arrive in _MXU_DTYPE from HBM -> astype is a no-op on
        # them; only f32 activations get cast here.
        return jnp.dot(a.astype(_MXU_DTYPE), w.astype(_MXU_DTYPE),
                       preferred_element_type=f32)

    # ---------------- conv stack: once per batch tile -------------------------
    @pl.when(j == 0)
    def _():
        # conv1 (k=8, s=4): one im2col matmul.  Patch rows are pre-ordered
        # (b, pp = 2*(h%2) + (w%2), h//2, w//2) with the conv1 output width 15
        # padded to 16.  NOTE: the padded column (cb == 7 in the cp == 1 parity
        # planes) holds relu(b1), NOT zero; conv2 below only ever reads cb <= 6,
        # keep it that way if the slicing is changed.
        h1 = jnp.maximum(mm(p1_ref[...], w1_ref[...]) + b1_ref[...], 0.0)
        h1_ref[...] = h1.reshape(Bt, 4, 7, 8, 32)          # (b, pp, rb, cb, c)

        # conv2 (k=4, s=2): 2 grouped matmuls, K=128, N=128 (the two jb column
        # groups packed along N); shift-accumulate via static result slices.
        acc2 = jnp.zeros((Bt, 6, 6, 64), f32)
        for ib in range(2):
            lhs = jnp.concatenate(
                [h1_ref[:, pp, ib:ib + 6, :, :] for pp in range(4)],
                axis=-1)                                    # (Bt, 6, 8, 128)
            lhs = lhs.reshape(Bt * 6 * 8, 128)
            y = mm(lhs, w2p_ref[ib]).reshape(Bt, 6, 8, 128)
            acc2 = acc2 + y[:, :, 0:6, 0:64] + y[:, :, 1:7, 64:128]
        h2 = jnp.maximum(acc2 + b2_ref[...], 0.0)           # (Bt, 6, 6, 64)
        h2_ref[:, :, 0:6, :] = h2
        # Defined pad, written once per batch tile (cols 6..7 are never read by
        # the conv3 shift-accumulate below).
        h2_ref[:, :, 6:8, :] = jnp.zeros((Bt, 6, 2, 64), f32)

        # conv3 (k=3, s=1): one matmul, K=192, N=192 packed (padded to 256).
        lhs3 = jnp.concatenate(
            [h2_ref[:, i:i + 4, :, :] for i in range(3)], axis=-1)  # (Bt,4,8,192)
        lhs3 = lhs3.reshape(Bt * 4 * 8, 192)
        y3 = mm(lhs3, w3p_ref[...]).reshape(Bt, 4, 8, 256)
        acc3 = (y3[:, :, 0:4, 0:64] + y3[:, :, 1:5, 64:128]
                + y3[:, :, 2:6, 128:192])
        h3_ref[...] = jnp.maximum(acc3 + b3_ref[...], 0.0)  # (Bt, 4, 4, 64)

        # Lane-dense flatten in (o, p, c) order (fc1 rows are pre-permuted to
        # match), stored once in the MXU dtype so the per-j fc1 matmuls need no
        # recast.
        flat_ref[...] = jnp.concatenate(
            [h3_ref[:, o, p, :] for o in range(4) for p in range(4)],
            axis=-1).astype(flat_ref.dtype)                 # (Bt, 1024)

        acc_ref[...] = jnp.zeros_like(acc_ref)

    # ---------------- fc1 column block j + fc2 row block j (every step) -------
    hid_j = jnp.maximum(
        mm(flat_ref[...], w1c_ref[...]) + mm(extra_ref[...], w1e_ref[...])
        + b1f_ref[...], 0.0)                                # (Bt, fc1_tile)
    acc_ref[...] += mm(hid_j, w2f_ref[...])                 # fc2 K-accumulation

    @pl.when(j == pl.num_programs(1) - 1)
    def _():
        out_ref[...] = acc_ref[...] + b2f_ref[...]


# ----------------------------------------------------------------------------
# Wrapper-side glue: conv1 im2col with the batch-major parity-decomposed layout
# ----------------------------------------------------------------------------
def _conv1_patches_parity(x_nchw):
    """x: (B, C, 60, 64) -> patches (B*4*7*8, 64*C) in _MXU_DTYPE.

    Row order: (b, pp = 2*(h%2) + (w%2), h//2, w//2) with the conv1 output
    width (15) padded to 16 (padded rows are zeros).  Column order: (ki, kj, c),
    matching the (2, 3, 1, 0) transpose of conv1's weight.
    """
    B, C, H, W = x_nchw.shape
    assert (H, W) == (60, 64), "CNNPolicy fixes the input spatial size to 60x64"
    # TODO(synk): the strided im2col window gather stays as XLA glue on the raw
    # input (no cheap in-kernel equivalent); it is emitted in bf16 so the kernel
    # re-reads half the bytes it used to.
    x = jnp.transpose(x_nchw, (0, 2, 3, 1)).astype(_MXU_DTYPE)       # NHWC
    OH = (H - 8) // 4 + 1                                            # 14
    OW = (W - 8) // 4 + 1                                            # 15
    cols = []
    for ki in range(8):
        for kj in range(8):
            cols.append(x[:, ki:ki + 4 * (OH - 1) + 1:4,
                             kj:kj + 4 * (OW - 1) + 1:4, :])
    p = jnp.stack(cols, axis=3)                                      # (B,14,15,64,C)
    p = p.reshape(B, OH, OW, 64 * C)                                 # (B,14,15,64C)
    p = jnp.pad(p, ((0, 0), (0, 0), (0, 1), (0, 0)))                 # (B,14,16,64C)
    p = p.reshape(B, 7, 2, 8, 2, 64 * C)                             # (b,rb,rp,cb,cp,k)
    p = jnp.transpose(p, (0, 2, 4, 1, 3, 5))                         # (b,rp,cp,rb,cb,k)
    return p.reshape(B * 4 * 7 * 8, 64 * C)


# ----------------------------------------------------------------------------
# Trace-time weight preprocessing (do once, outside the per-step forward)
# ----------------------------------------------------------------------------
def preprocess_params(params):
    f32 = jnp.float32
    wdt = _MXU_DTYPE

    c1 = params["conv1_w"].astype(f32)                               # (32,C,8,8)
    cin = c1.shape[1]
    w1 = (jnp.transpose(c1, (2, 3, 1, 0)).reshape(64 * cin, 32)
          * (1.0 / 255.0)).astype(wdt)                               # /255 folded in
    b1 = params["conv1_b"].astype(f32).reshape(1, 32)

    c2 = params["conv2_w"].astype(f32)                               # (64,32,4,4)
    w2t = jnp.transpose(c2, (2, 3, 1, 0))                            # (i,j,ci,co)
    w2g = jnp.transpose(w2t.reshape(2, 2, 2, 2, 32, 64),
                        (0, 2, 1, 3, 4, 5)).reshape(2, 2, 128, 64)   # (ib,jb,pp*32+ci,co)
    w2p = jnp.concatenate([w2g[:, 0], w2g[:, 1]], axis=-1).astype(wdt)  # (2,128,128)
    b2 = params["conv2_b"].astype(f32).reshape(1, 64)

    c3 = params["conv3_w"].astype(f32)                               # (64,64,3,3)
    w3t = jnp.transpose(c3, (2, 3, 1, 0))                            # (i,j,ci,co)
    w3g = jnp.transpose(w3t, (1, 0, 2, 3)).reshape(3, 192, 64)       # (j, i*64+ci, co)
    w3p = jnp.concatenate([w3g[0], w3g[1], w3g[2]], axis=-1)         # (192, 192)
    w3p = jnp.pad(w3p, ((0, 0), (0, 64))).astype(wdt)                # N padded to 256
    b3 = params["conv3_b"].astype(f32).reshape(1, 64)

    f1 = params["fc1_w"].astype(f32)                                 # (1024+E, 512)
    w1c = jnp.transpose(f1[:1024].reshape(64, 16, 512),
                        (1, 0, 2)).reshape(1024, 512).astype(wdt)    # (o,p,c) row order
    w1e = f1[1024:].astype(wdt)                                      # (E, 512)
    b1f = params["fc1_b"].astype(f32).reshape(1, 512)

    w2f = params["fc2_w"].astype(wdt)                                # (512, A)
    b2f = params["fc2_b"].astype(f32).reshape(1, -1)
    return dict(w1=w1, b1=b1, w2p=w2p, b2=b2, w3p=w3p, b3=b3,
                w1c=w1c, w1e=w1e, b1f=b1f, w2f=w2f, b2f=b2f)


# ----------------------------------------------------------------------------
# Forward pass (mirrors CNNPolicy.forward with `extra` provided)
# ----------------------------------------------------------------------------
def cnn_policy_forward(prep, x_nchw, extra, *, batch_tile=None, fc1_tile=128):
    B, C = x_nchw.shape[0], x_nchw.shape[1]
    A = prep["w2f"].shape[1]
    E = extra.shape[1]
    if batch_tile is None:
        batch_tile = B          # one batch block; pass a multiple of 8 to shard/scale
    assert B % batch_tile == 0 and (batch_tile == B or batch_tile % 8 == 0)
    assert 512 % fc1_tile == 0 and fc1_tile % 128 == 0
    Bt, BT, NT = batch_tile, B // batch_tile, 512 // fc1_tile

    p1 = _conv1_patches_parity(x_nchw)                     # (B*224, 64*C) bf16
    extra = extra.astype(jnp.float32)

    inputs = (p1, prep["w1"], prep["b1"], prep["w2p"], prep["b2"], prep["w3p"],
              prep["b3"], extra, prep["w1c"], prep["w1e"], prep["b1f"],
              prep["w2f"], prep["b2f"])

    def inv(a):   # grid-invariant full-array block (fetched once, stays in VMEM)
        zeros = (0,) * a.ndim
        return pl.BlockSpec(a.shape, lambda i, j: zeros)

    in_specs = [
        pl.BlockSpec((Bt * 224, 64 * C), lambda i, j: (i, 0)),   # p1   (batch tiled)
        inv(prep["w1"]), inv(prep["b1"]),
        inv(prep["w2p"]), inv(prep["b2"]),
        inv(prep["w3p"]), inv(prep["b3"]),
        pl.BlockSpec((Bt, E), lambda i, j: (i, 0)),              # extra (batch tiled)
        pl.BlockSpec((1024, fc1_tile), lambda i, j: (0, j)),     # w1c column block (pipelined)
        pl.BlockSpec((E, fc1_tile), lambda i, j: (0, j)),        # w1e column block
        pl.BlockSpec((1, fc1_tile), lambda i, j: (0, j)),        # b1f column block
        pl.BlockSpec((fc1_tile, A), lambda i, j: (j, 0)),        # w2f row block
        inv(prep["b2f"]),
    ]

    macs = B * (224 * 64 * C * 32 + 2 * 48 * 128 * 128 + 32 * 192 * 256
                + 1024 * 512 + E * 512 + 512 * A)
    bytes_accessed = int(sum(int(a.size) * a.dtype.itemsize for a in inputs)
                         + B * A * 4)

    return pl.pallas_call(
        _cnn_policy_kernel,
        out_shape=jax.ShapeDtypeStruct((B, A), jnp.float32),
        grid=(BT, NT),
        in_specs=in_specs,
        out_specs=pl.BlockSpec((Bt, A), lambda i, j: (i, 0)),
        scratch_shapes=[
            pltpu.VMEM((Bt, 4, 7, 8, 32), jnp.float32),   # h1 (parity layout)
            pltpu.VMEM((Bt, 6, 8, 64), jnp.float32),      # h2 (W padded 6 -> 8)
            pltpu.VMEM((Bt, 4, 4, 64), jnp.float32),      # h3
            pltpu.VMEM((Bt, 1024), _MXU_DTYPE),           # flattened conv features
            pltpu.VMEM((Bt, A), jnp.float32),             # fc2 accumulator
        ],
        compiler_params=pltpu.CompilerParams(
            dimension_semantics=("parallel", "arbitrary")),
        cost_estimate=pl.CostEstimate(flops=2 * macs, transcendentals=0,
                                      bytes_accessed=bytes_accessed),
    )(*inputs)


# ----------------------------------------------------------------------------
# Parameters (deterministic, PyTorch-default-style uniform init)
# ----------------------------------------------------------------------------
def init_params(key, num_actions, frame_stack=4):
    ks = jax.random.split(key, 10)

    def u(k, shape, fan_in):
        bound = 1.0 / (fan_in ** 0.5)
        return jax.random.uniform(k, shape, jnp.float32, -bound, bound)

    params = {}
    params["conv1_w"] = u(ks[0], (32, frame_stack, 8, 8), frame_stack * 64)
    params["conv1_b"] = u(ks[1], (32,), frame_stack * 64)
    params["conv2_w"] = u(ks[2], (64, 32, 4, 4), 32 * 16)
    params["conv2_b"] = u(ks[3], (64,), 32 * 16)
    params["conv3_w"] = u(ks[4], (64, 64, 3, 3), 64 * 9)
    params["conv3_b"] = u(ks[5], (64,), 64 * 9)
    flattened = 64 * 4 * 4
    extra_features = 2 + 2 + num_actions
    fc1_in = flattened + extra_features
    params["fc1_w"] = u(ks[6], (fc1_in, 512), fc1_in)       # stored (in, out)
    params["fc1_b"] = u(ks[7], (512,), fc1_in)
    params["fc2_w"] = u(ks[8], (512, num_actions), 512)
    params["fc2_b"] = u(ks[9], (num_actions,), 512)
    return params


# ----------------------------------------------------------------------------
# Plain-JAX reference (for correctness check)
# ----------------------------------------------------------------------------
def _reference_forward(params, x, extra):
    hp = jax.lax.Precision.HIGHEST
    x = x.astype(jnp.float32) / 255.0

    def conv(h, w, b, s):
        y = jax.lax.conv_general_dilated(
            h, w.astype(jnp.float32), (s, s), "VALID",
            dimension_numbers=("NCHW", "OIHW", "NCHW"), precision=hp)
        return jax.nn.relu(y + b.astype(jnp.float32)[None, :, None, None])

    h = conv(x, params["conv1_w"], params["conv1_b"], 4)
    h = conv(h, params["conv2_w"], params["conv2_b"], 2)
    h = conv(h, params["conv3_w"], params["conv3_b"], 1)
    flat = h.reshape(h.shape[0], -1)
    feat = jnp.concatenate([flat, extra.astype(jnp.float32)], axis=1)
    hid = jax.nn.relu(jnp.dot(feat, params["fc1_w"], precision=hp) + params["fc1_b"])
    return jnp.dot(hid, params["fc2_w"], precision=hp) + params["fc2_b"]


if __name__ == "__main__":
    num_actions = 6
    frame_stack = 4
    batch = 2
    key = jax.random.PRNGKey(0)
    k_x, k_e, k_p = jax.random.split(key, 3)

    # Spatial size 60x64 is fixed by the module's _get_conv_output_shape.
    x = jax.random.uniform(k_x, (batch, frame_stack, 60, 64), jnp.float32, 0.0, 255.0)
    extra = jax.random.uniform(k_e, (batch, 2 + 2 + num_actions), jnp.float32)
    params = init_params(k_p, num_actions, frame_stack)

    prep = preprocess_params(params)                        # one-time weight prep
    fwd = jax.jit(cnn_policy_forward)
    out = jax.block_until_ready(fwd(prep, x, extra))

    assert out.shape == (batch, num_actions), out.shape
    assert out.dtype == jnp.float32

    ref = _reference_forward(params, x, extra)
    max_err = float(jnp.max(jnp.abs(out - ref)))
    # bf16 MXU inputs with f32 accumulation: observed error ~1e-3, budget 2e-2.
    assert bool(jnp.allclose(out, ref, rtol=2e-2, atol=2e-2)), max_err

    print("KERNEL_OK")
</pallas_src>

<mosaic_0001>
module attributes {stable_mosaic.version = 11 : i64} {
  func.func @_cnn_policy_kernel(%arg0: i32, %arg1: i32, %arg2: memref<448x256xbf16, #tpu.memory_space<vmem>>, %arg3: memref<256x32xbf16, #tpu.memory_space<vmem>>, %arg4: memref<1x32xf32, #tpu.memory_space<vmem>>, %arg5: memref<2x128x128xbf16, #tpu.memory_space<vmem>>, %arg6: memref<1x64xf32, #tpu.memory_space<vmem>>, %arg7: memref<192x256xbf16, #tpu.memory_space<vmem>>, %arg8: memref<1x64xf32, #tpu.memory_space<vmem>>, %arg9: memref<2x10xf32, #tpu.memory_space<vmem>>, %arg10: memref<1024x128xbf16, #tpu.memory_space<vmem>>, %arg11: memref<10x128xbf16, #tpu.memory_space<vmem>>, %arg12: memref<1x128xf32, #tpu.memory_space<vmem>>, %arg13: memref<128x6xbf16, #tpu.memory_space<vmem>>, %arg14: memref<1x6xf32, #tpu.memory_space<vmem>>, %arg15: memref<2x6xf32, #tpu.memory_space<vmem>>, %arg16: memref<2x4x7x8x32xf32, #tpu.memory_space<vmem>>, %arg17: memref<2x6x8x64xf32, #tpu.memory_space<vmem>>, %arg18: memref<2x4x4x64xf32, #tpu.memory_space<vmem>>, %arg19: memref<2x1024xbf16, #tpu.memory_space<vmem>>, %arg20: memref<2x6xf32, #tpu.memory_space<vmem>>) attributes {dimension_semantics = [#tpu.dimension_semantics<parallel>, #tpu.dimension_semantics<arbitrary>], iteration_bounds = array<i64: 1, 4>, scalar_prefetch = 0 : i64, scratch_operands = 5 : i64, tpu.core_type = #tpu.core_type<tc>, window_params = [{transform_indices = @transform_0, window_bounds = array<i64: 448, 256>}, {pipeline_mode = #tpu.pipeline_mode<synchronous>, transform_indices = @transform_1, window_bounds = array<i64: 256, 32>}, {pipeline_mode = #tpu.pipeline_mode<synchronous>, transform_indices = @transform_2, window_bounds = array<i64: 1, 32>}, {pipeline_mode = #tpu.pipeline_mode<synchronous>, transform_indices = @transform_3, window_bounds = array<i64: 2, 128, 128>}, {pipeline_mode = #tpu.pipeline_mode<synchronous>, transform_indices = @transform_4, window_bounds = array<i64: 1, 64>}, {pipeline_mode = #tpu.pipeline_mode<synchronous>, transform_indices = @transform_5, window_bounds = array<i64: 192, 256>}, {pipeline_mode = #tpu.pipeline_mode<synchronous>, transform_indices = @transform_6, window_bounds = array<i64: 1, 64>}, {transform_indices = @transform_7, window_bounds = array<i64: 2, 10>}, {transform_indices = @transform_8, window_bounds = array<i64: 1024, 128>}, {transform_indices = @transform_9, window_bounds = array<i64: 10, 128>}, {transform_indices = @transform_10, window_bounds = array<i64: 1, 128>}, {transform_indices = @transform_11, window_bounds = array<i64: 128, 6>}, {pipeline_mode = #tpu.pipeline_mode<synchronous>, transform_indices = @transform_12, window_bounds = array<i64: 1, 6>}, {transform_indices = @transform_13, window_bounds = array<i64: 2, 6>}]} {
    %c0_i32 = arith.constant 0 : i32
    %0 = arith.cmpi eq, %arg1, %c0_i32 : i32
    %1 = arith.extui %0 : i1 to i32
    %c0_i32_0 = arith.constant 0 : i32
    %2 = arith.cmpi ne, %1, %c0_i32_0 : i32
    scf.if %2 {
      %c0_20 = arith.constant 0 : index
      %c0_21 = arith.constant 0 : index
      %25 = vector.load %arg2[%c0_20, %c0_21] : memref<448x256xbf16, #tpu.memory_space<vmem>>, vector<448x256xbf16>
      %c0_22 = arith.constant 0 : index
      %c0_23 = arith.constant 0 : index
      %26 = vector.load %arg3[%c0_22, %c0_23] : memref<256x32xbf16, #tpu.memory_space<vmem>>, vector<256x32xbf16>
      %cst_24 = arith.constant dense<0.000000e+00> : vector<448x32xf32>
      %27 = tpu.matmul %25, %26, %cst_24 {dimension_numbers = #tpu.dot_dimension_numbers<[1], [0], [0], [1], [0, 0, 1, 1], [], []>} : vector<448x256xbf16>, vector<256x32xbf16>, vector<448x32xf32> -> vector<448x32xf32>
      %c0_25 = arith.constant 0 : index
      %c0_26 = arith.constant 0 : index
      %28 = vector.load %arg4[%c0_25, %c0_26] : memref<1x32xf32, #tpu.memory_space<vmem>>, vector<1x32xf32>
      %29 = vector.broadcast %28 : vector<1x32xf32> to vector<448x32xf32>
      %30 = arith.addf %27, %29 : vector<448x32xf32>
      %cst_27 = arith.constant 0.000000e+00 : f32
      %31 = vector.broadcast %cst_27 : f32 to vector<448x32xf32>
      %32 = arith.maximumf %30, %31 : vector<448x32xf32>
      %33 = vector.shape_cast %32 : vector<448x32xf32> to vector<2x4x7x8x32xf32>
      %c0_28 = arith.constant 0 : index
      %c0_29 = arith.constant 0 : index
      %c0_30 = arith.constant 0 : index
      %c0_31 = arith.constant 0 : index
      %c0_32 = arith.constant 0 : index
      %34 = vector.load %arg16[%c0_28, %c0_29, %c0_30, %c0_31, %c0_32] : memref<2x4x7x8x32xf32, #tpu.memory_space<vmem>>, vector<2x4x7x8x32xf32>
      tpu.vector_store %arg16[%c0_28, %c0_29, %c0_30, %c0_31, %c0_32], %33 {strides = array<i32>} : memref<2x4x7x8x32xf32, #tpu.memory_space<vmem>>, vector<2x4x7x8x32xf32>,
      %cst_33 = arith.constant 0.000000e+00 : f32
      %35 = vector.broadcast %cst_33 : f32 to vector<2x6x6x64xf32>
      %c0_34 = arith.constant 0 : index
      %c0_35 = arith.constant 0 : index
      %c0_36 = arith.constant 0 : index
      %c0_37 = arith.constant 0 : index
      %c0_38 = arith.constant 0 : index
      %36 = vector.load %arg16[%c0_34, %c0_35, %c0_36, %c0_37, %c0_38] : memref<2x4x7x8x32xf32, #tpu.memory_space<vmem>>, vector<2x1x6x8x32xf32>
      %37 = vector.shape_cast %36 : vector<2x1x6x8x32xf32> to vector<2x6x8x32xf32>
      %c0_39 = arith.constant 0 : index
      %c1 = arith.constant 1 : index
      %c0_40 = arith.constant 0 : index
      %c0_41 = arith.constant 0 : index
      %c0_42 = arith.constant 0 : index
      %38 = vector.load %arg16[%c0_39, %c1, %c0_40, %c0_41, %c0_42] : memref<2x4x7x8x32xf32, #tpu.memory_space<vmem>>, vector<2x1x6x8x32xf32>
      %39 = vector.shape_cast %38 : vector<2x1x6x8x32xf32> to vector<2x6x8x32xf32>
      %c0_43 = arith.constant 0 : index
      %c2 = arith.constant 2 : index
      %c0_44 = arith.constant 0 : index
      %c0_45 = arith.constant 0 : index
      %c0_46 = arith.constant 0 : index
      %40 = vector.load %arg16[%c0_43, %c2, %c0_44, %c0_45, %c0_46] : memref<2x4x7x8x32xf32, #tpu.memory_space<vmem>>, vector<2x1x6x8x32xf32>
      %41 = vector.shape_cast %40 : vector<2x1x6x8x32xf32> to vector<2x6x8x32xf32>
      %c0_47 = arith.constant 0 : index
      %c3 = arith.constant 3 : index
      %c0_48 = arith.constant 0 : index
      %c0_49 = arith.constant 0 : index
      %c0_50 = arith.constant 0 : index
      %42 = vector.load %arg16[%c0_47, %c3, %c0_48, %c0_49, %c0_50] : memref<2x4x7x8x32xf32, #tpu.memory_space<vmem>>, vector<2x1x6x8x32xf32>
      %43 = vector.shape_cast %42 : vector<2x1x6x8x32xf32> to vector<2x6x8x32xf32>
      %44 = tpu.concatenate %37, %39, %41, %43 in 3 : vector<2x6x8x32xf32>, vector<2x6x8x32xf32>, vector<2x6x8x32xf32>, vector<2x6x8x32xf32> -> vector<2x6x8x128xf32>
      %45 = vector.shape_cast %44 : vector<2x6x8x128xf32> to vector<96x128xf32>
      %c0_51 = arith.constant 0 : index
      %c0_52 = arith.constant 0 : index
      %c0_53 = arith.constant 0 : index
      %46 = vector.load %arg5[%c0_51, %c0_52, %c0_53] : memref<2x128x128xbf16, #tpu.memory_space<vmem>>, vector<1x128x128xbf16>
      %47 = vector.shape_cast %46 : vector<1x128x128xbf16> to vector<128x128xbf16>
      %48 = arith.truncf %45 : vector<96x128xf32> to vector<96x128xbf16>
      %cst_54 = arith.constant dense<0.000000e+00> : vector<96x128xf32>
      %49 = tpu.matmul %48, %47, %cst_54 {dimension_numbers = #tpu.dot_dimension_numbers<[1], [0], [0], [1], [0, 0, 1, 1], [], []>} : vector<96x128xbf16>, vector<128x128xbf16>, vector<96x128xf32> -> vector<96x128xf32>
      %50 = vector.shape_cast %49 : vector<96x128xf32> to vector<2x6x8x128xf32>
      %51 = vector.extract_strided_slice %50 {offsets = [0, 0, 0, 0], sizes = [2, 6, 6, 64], strides = [1, 1, 1, 1]} : vector<2x6x8x128xf32> to vector<2x6x6x64xf32>
      %52 = arith.addf %35, %51 : vector<2x6x6x64xf32>
      %53 = vector.extract_strided_slice %50 {offsets = [0, 0, 1, 64], sizes = [2, 6, 6, 64], strides = [1, 1, 1, 1]} : vector<2x6x8x128xf32> to vector<2x6x6x64xf32>
      %54 = arith.addf %52, %53 : vector<2x6x6x64xf32>
      %c0_55 = arith.constant 0 : index
      %c0_56 = arith.constant 0 : index
      %c1_57 = arith.constant 1 : index
      %c0_58 = arith.constant 0 : index
      %c0_59 = arith.constant 0 : index
      %55 = vector.load %arg16[%c0_55, %c0_56, %c1_57, %c0_58, %c0_59] : memref<2x4x7x8x32xf32, #tpu.memory_space<vmem>>, vector<2x1x6x8x32xf32>
      %56 = vector.shape_cast %55 : vector<2x1x6x8x32xf32> to vector<2x6x8x32xf32>
      %c0_60 = arith.constant 0 : index
      %c1_61 = arith.constant 1 : index
      %c1_62 = arith.constant 1 : index
      %c0_63 = arith.constant 0 : index
      %c0_64 = arith.constant 0 : index
      %57 = vector.load %arg16[%c0_60, %c1_61, %c1_62, %c0_63, %c0_64] : memref<2x4x7x8x32xf32, #tpu.memory_space<vmem>>, vector<2x1x6x8x32xf32>
      %58 = vector.shape_cast %57 : vector<2x1x6x8x32xf32> to vector<2x6x8x32xf32>
      %c0_65 = arith.constant 0 : index
      %c2_66 = arith.constant 2 : index
      %c1_67 = arith.constant 1 : index
      %c0_68 = arith.constant 0 : index
      %c0_69 = arith.constant 0 : index
      %59 = vector.load %arg16[%c0_65, %c2_66, %c1_67, %c0_68, %c0_69] : memref<2x4x7x8x32xf32, #tpu.memory_space<vmem>>, vector<2x1x6x8x32xf32>
      %60 = vector.shape_cast %59 : vector<2x1x6x8x32xf32> to vector<2x6x8x32xf32>
      %c0_70 = arith.constant 0 : index
      %c3_71 = arith.constant 3 : index
      %c1_72 = arith.constant 1 : index
      %c0_73 = arith.constant 0 : index
      %c0_74 = arith.constant 0 : index
      %61 = vector.load %arg16[%c0_70, %c3_71, %c1_72, %c0_73, %c0_74] : memref<2x4x7x8x32xf32, #tpu.memory_space<vmem>>, vector<2x1x6x8x32xf32>
      %62 = vector.shape_cast %61 : vector<2x1x6x8x32xf32> to vector<2x6x8x32xf32>
      %63 = tpu.concatenate %56, %58, %60, %62 in 3 : vector<2x6x8x32xf32>, vector<2x6x8x32xf32>, vector<2x6x8x32xf32>, vector<2x6x8x32xf32> -> vector<2x6x8x128xf32>
      %64 = vector.shape_cast %63 : vector<2x6x8x128xf32> to vector<96x128xf32>
      %c1_75 = arith.constant 1 : index
      %c0_76 = arith.constant 0 : index
      %c0_77 = arith.constant 0 : index
      %65 = vector.load %arg5[%c1_75, %c0_76, %c0_77] : memref<2x128x128xbf16, #tpu.memory_space<vmem>>, vector<1x128x128xbf16>
      %66 = vector.shape_cast %65 : vector<1x128x128xbf16> to vector<128x128xbf16>
      %67 = arith.truncf %64 : vector<96x128xf32> to vector<96x128xbf16>
      %cst_78 = arith.constant dense<0.000000e+00> : vector<96x128xf32>
      %68 = tpu.matmul %67, %66, %cst_78 {dimension_numbers = #tpu.dot_dimension_numbers<[1], [0], [0], [1], [0, 0, 1, 1], [], []>} : vector<96x128xbf16>, vector<128x128xbf16>, vector<96x128xf32> -> vector<96x128xf32>
      %69 = vector.shape_cast %68 : vector<96x128xf32> to vector<2x6x8x128xf32>
      %70 = vector.extract_strided_slice %69 {offsets = [0, 0, 0, 0], sizes = [2, 6, 6, 64], strides = [1, 1, 1, 1]} : vector<2x6x8x128xf32> to vector<2x6x6x64xf32>
      %71 = arith.addf %54, %70 : vector<2x6x6x64xf32>
      %72 = vector.extract_strided_slice %69 {offsets = [0, 0, 1, 64], sizes = [2, 6, 6, 64], strides = [1, 1, 1, 1]} : vector<2x6x8x128xf32> to vector<2x6x6x64xf32>
      %73 = arith.addf %71, %72 : vector<2x6x6x64xf32>
      %c0_79 = arith.constant 0 : index
      %c0_80 = arith.constant 0 : index
      %74 = vector.load %arg6[%c0_79, %c0_80] : memref<1x64xf32, #tpu.memory_space<vmem>>, vector<1x64xf32>
      %75 = vector.shape_cast %74 : vector<1x64xf32> to vector<1x1x1x64xf32>
      %76 = vector.broadcast %75 : vector<1x1x1x64xf32> to vector<2x6x6x64xf32>
      %77 = arith.addf %73, %76 : vector<2x6x6x64xf32>
      %cst_81 = arith.constant 0.000000e+00 : f32
      %78 = vector.broadcast %cst_81 : f32 to vector<2x6x6x64xf32>
      %79 = arith.maximumf %77, %78 : vector<2x6x6x64xf32>
      %c0_82 = arith.constant 0 : index
      %c0_83 = arith.constant 0 : index
      %c0_84 = arith.constant 0 : index
      %c0_85 = arith.constant 0 : index
      %80 = vector.load %arg17[%c0_82, %c0_83, %c0_84, %c0_85] : memref<2x6x8x64xf32, #tpu.memory_space<vmem>>, vector<2x6x6x64xf32>
      tpu.vector_store %arg17[%c0_82, %c0_83, %c0_84, %c0_85], %79 {strides = array<i32>} : memref<2x6x8x64xf32, #tpu.memory_space<vmem>>, vector<2x6x6x64xf32>,
      %cst_86 = arith.constant 0.000000e+00 : f32
      %81 = vector.broadcast %cst_86 : f32 to vector<2x6x2x64xf32>
      %c0_87 = arith.constant 0 : index
      %c0_88 = arith.constant 0 : index
      %c6 = arith.constant 6 : index
      %c0_89 = arith.constant 0 : index
      %82 = vector.load %arg17[%c0_87, %c0_88, %c6, %c0_89] : memref<2x6x8x64xf32, #tpu.memory_space<vmem>>, vector<2x6x2x64xf32>
      tpu.vector_store %arg17[%c0_87, %c0_88, %c6, %c0_89], %81 {strides = array<i32>} : memref<2x6x8x64xf32, #tpu.memory_space<vmem>>, vector<2x6x2x64xf32>,
      %c0_90 = arith.constant 0 : index
      %c0_91 = arith.constant 0 : index
      %c0_92 = arith.constant 0 : index
      %c0_93 = arith.constant 0 : index
      %83 = vector.load %arg17[%c0_90, %c0_91, %c0_92, %c0_93] : memref<2x6x8x64xf32, #tpu.memory_space<vmem>>, vector<2x4x8x64xf32>
      %c0_94 = arith.constant 0 : index
      %c1_95 = arith.constant 1 : index
      %c0_96 = arith.constant 0 : index
      %c0_97 = arith.constant 0 : index
      %84 = vector.load %arg17[%c0_94, %c1_95, %c0_96, %c0_97] : memref<2x6x8x64xf32, #tpu.memory_space<vmem>>, vector<2x4x8x64xf32>
      %c0_98 = arith.constant 0 : index
      %c2_99 = arith.constant 2 : index
      %c0_100 = arith.constant 0 : index
      %c0_101 = arith.constant 0 : index
      %85 = vector.load %arg17[%c0_98, %c2_99, %c0_100, %c0_101] : memref<2x6x8x64xf32, #tpu.memory_space<vmem>>, vector<2x4x8x64xf32>
      %86 = tpu.concatenate %83, %84, %85 in 3 : vector<2x4x8x64xf32>, vector<2x4x8x64xf32>, vector<2x4x8x64xf32> -> vector<2x4x8x192xf32>
      %87 = vector.shape_cast %86 : vector<2x4x8x192xf32> to vector<64x192xf32>
      %c0_102 = arith.constant 0 : index
      %c0_103 = arith.constant 0 : index
      %88 = vector.load %arg7[%c0_102, %c0_103] : memref<192x256xbf16, #tpu.memory_space<vmem>>, vector<192x256xbf16>
      %89 = arith.truncf %87 : vector<64x192xf32> to vector<64x192xbf16>
      %cst_104 = arith.constant dense<0.000000e+00> : vector<64x256xf32>
      %90 = tpu.matmul %89, %88, %cst_104 {dimension_numbers = #tpu.dot_dimension_numbers<[1], [0], [0], [1], [0, 0, 1, 1], [], []>} : vector<64x192xbf16>, vector<192x256xbf16>, vector<64x256xf32> -> vector<64x256xf32>
      %91 = vector.shape_cast %90 : vector<64x256xf32> to vector<2x4x8x256xf32>
      %92 = vector.extract_strided_slice %91 {offsets = [0, 0, 0, 0], sizes = [2, 4, 4, 64], strides = [1, 1, 1, 1]} : vector<2x4x8x256xf32> to vector<2x4x4x64xf32>
      %93 = vector.extract_strided_slice %91 {offsets = [0, 0, 1, 64], sizes = [2, 4, 4, 64], strides = [1, 1, 1, 1]} : vector<2x4x8x256xf32> to vector<2x4x4x64xf32>
      %94 = arith.addf %92, %93 : vector<2x4x4x64xf32>
      %95 = vector.extract_strided_slice %91 {offsets = [0, 0, 2, 128], sizes = [2, 4, 4, 64], strides = [1, 1, 1, 1]} : vector<2x4x8x256xf32> to vector<2x4x4x64xf32>
      %96 = arith.addf %94, %95 : vector<2x4x4x64xf32>
      %c0_105 = arith.constant 0 : index
      %c0_106 = arith.constant 0 : index
      %97 = vector.load %arg8[%c0_105, %c0_106] : memref<1x64xf32, #tpu.memory_space<vmem>>, vector<1x64xf32>
      %98 = vector.shape_cast %97 : vector<1x64xf32> to vector<1x1x1x64xf32>
      %99 = vector.broadcast %98 : vector<1x1x1x64xf32> to vector<2x4x4x64xf32>
      %100 = arith.addf %96, %99 : vector<2x4x4x64xf32>
      %cst_107 = arith.constant 0.000000e+00 : f32
      %101 = vector.broadcast %cst_107 : f32 to vector<2x4x4x64xf32>
      %102 = arith.maximumf %100, %101 : vector<2x4x4x64xf32>
      %c0_108 = arith.constant 0 : index
      %c0_109 = arith.constant 0 : index
      %c0_110 = arith.constant 0 : index
      %c0_111 = arith.constant 0 : index
      %103 = vector.load %arg18[%c0_108, %c0_109, %c0_110, %c0_111] : memref<2x4x4x64xf32, #tpu.memory_space<vmem>>, vector<2x4x4x64xf32>
      tpu.vector_store %arg18[%c0_108, %c0_109, %c0_110, %c0_111], %102 {strides = array<i32>} : memref<2x4x4x64xf32, #tpu.memory_space<vmem>>, vector<2x4x4x64xf32>,
      %c0_112 = arith.constant 0 : index
      %c0_113 = arith.constant 0 : index
      %c0_114 = arith.constant 0 : index
      %c0_115 = arith.constant 0 : index
      %104 = vector.load %arg18[%c0_112, %c0_113, %c0_114, %c0_115] : memref<2x4x4x64xf32, #tpu.memory_space<vmem>>, vector<2x1x1x64xf32>
      %105 = vector.shape_cast %104 : vector<2x1x1x64xf32> to vector<2x64xf32>
      %c0_116 = arith.constant 0 : index
      %c0_117 = arith.constant 0 : index
      %c1_118 = arith.constant 1 : index
      %c0_119 = arith.constant 0 : index
      %106 = vector.load %arg18[%c0_116, %c0_117, %c1_118, %c0_119] : memref<2x4x4x64xf32, #tpu.memory_space<vmem>>, vector<2x1x1x64xf32>
      %107 = vector.shape_cast %106 : vector<2x1x1x64xf32> to vector<2x64xf32>
      %c0_120 = arith.constant 0 : index
      %c0_121 = arith.constant 0 : index
      %c2_122 = arith.constant 2 : index
      %c0_123 = arith.constant 0 : index
      %108 = vector.load %arg18[%c0_120, %c0_121, %c2_122, %c0_123] : memref<2x4x4x64xf32, #tpu.memory_space<vmem>>, vector<2x1x1x64xf32>
      %109 = vector.shape_cast %108 : vector<2x1x1x64xf32> to vector<2x64xf32>
      %c0_124 = arith.constant 0 : index
      %c0_125 = arith.constant 0 : index
      %c3_126 = arith.constant 3 : index
      %c0_127 = arith.constant 0 : index
      %110 = vector.load %arg18[%c0_124, %c0_125, %c3_126, %c0_127] : memref<2x4x4x64xf32, #tpu.memory_space<vmem>>, vector<2x1x1x64xf32>
      %111 = vector.shape_cast %110 : vector<2x1x1x64xf32> to vector<2x64xf32>
      %c0_128 = arith.constant 0 : index
      %c1_129 = arith.constant 1 : index
      %c0_130 = arith.constant 0 : index
      %c0_131 = arith.constant 0 : index
      %112 = vector.load %arg18[%c0_128, %c1_129, %c0_130, %c0_131] : memref<2x4x4x64xf32, #tpu.memory_space<vmem>>, vector<2x1x1x64xf32>
      %113 = vector.shape_cast %112 : vector<2x1x1x64xf32> to vector<2x64xf32>
      %c0_132 = arith.constant 0 : index
      %c1_133 = arith.constant 1 : index
      %c1_134 = arith.constant 1 : index
      %c0_135 = arith.constant 0 : index
      %114 = vector.load %arg18[%c0_132, %c1_133, %c1_134, %c0_135] : memref<2x4x4x64xf32, #tpu.memory_space<vmem>>, vector<2x1x1x64xf32>
      %115 = vector.shape_cast %114 : vector<2x1x1x64xf32> to vector<2x64xf32>
      %c0_136 = arith.constant 0 : index
      %c1_137 = arith.constant 1 : index
      %c2_138 = arith.constant 2 : index
      %c0_139 = arith.constant 0 : index
      %116 = vector.load %arg18[%c0_136, %c1_137, %c2_138, %c0_139] : memref<2x4x4x64xf32, #tpu.memory_space<vmem>>, vector<2x1x1x64xf32>
      %117 = vector.shape_cast %116 : vector<2x1x1x64xf32> to vector<2x64xf32>
      %c0_140 = arith.constant 0 : index
      %c1_141 = arith.constant 1 : index
      %c3_142 = arith.constant 3 : index
      %c0_143 = arith.constant 0 : index
      %118 = vector.load %arg18[%c0_140, %c1_141, %c3_142, %c0_143] : memref<2x4x4x64xf32, #tpu.memory_space<vmem>>, vector<2x1x1x64xf32>
      %119 = vector.shape_cast %118 : vector<2x1x1x64xf32> to vector<2x64xf32>
      %c0_144 = arith.constant 0 : index
      %c2_145 = arith.constant 2 : index
      %c0_146 = arith.constant 0 : index
      %c0_147 = arith.constant 0 : index
      %120 = vector.load %arg18[%c0_144, %c2_145, %c0_146, %c0_147] : memref<2x4x4x64xf32, #tpu.memory_space<vmem>>, vector<2x1x1x64xf32>
      %121 = vector.shape_cast %120 : vector<2x1x1x64xf32> to vector<2x64xf32>
      %c0_148 = arith.constant 0 : index
      %c2_149 = arith.constant 2 : index
      %c1_150 = arith.constant 1 : index
      %c0_151 = arith.constant 0 : index
      %122 = vector.load %arg18[%c0_148, %c2_149, %c1_150, %c0_151] : memref<2x4x4x64xf32, #tpu.memory_space<vmem>>, vector<2x1x1x64xf32>
      %123 = vector.shape_cast %122 : vector<2x1x1x64xf32> to vector<2x64xf32>
      %c0_152 = arith.constant 0 : index
      %c2_153 = arith.constant 2 : index
      %c2_154 = arith.constant 2 : index
      %c0_155 = arith.constant 0 : index
      %124 = vector.load %arg18[%c0_152, %c2_153, %c2_154, %c0_155] : memref<2x4x4x64xf32, #tpu.memory_space<vmem>>, vector<2x1x1x64xf32>
      %125 = vector.shape_cast %124 : vector<2x1x1x64xf32> to vector<2x64xf32>
      %c0_156 = arith.constant 0 : index
      %c2_157 = arith.constant 2 : index
      %c3_158 = arith.constant 3 : index
      %c0_159 = arith.constant 0 : index
      %126 = vector.load %arg18[%c0_156, %c2_157, %c3_158, %c0_159] : memref<2x4x4x64xf32, #tpu.memory_space<vmem>>, vector<2x1x1x64xf32>
      %127 = vector.shape_cast %126 : vector<2x1x1x64xf32> to vector<2x64xf32>
      %c0_160 = arith.constant 0 : index
      %c3_161 = arith.constant 3 : index
      %c0_162 = arith.constant 0 : index
      %c0_163 = arith.constant 0 : index
      %128 = vector.load %arg18[%c0_160, %c3_161, %c0_162, %c0_163] : memref<2x4x4x64xf32, #tpu.memory_space<vmem>>, vector<2x1x1x64xf32>
      %129 = vector.shape_cast %128 : vector<2x1x1x64xf32> to vector<2x64xf32>
      %c0_164 = arith.constant 0 : index
      %c3_165 = arith.constant 3 : index
      %c1_166 = arith.constant 1 : index
      %c0_167 = arith.constant 0 : index
      %130 = vector.load %arg18[%c0_164, %c3_165, %c1_166, %c0_167] : memref<2x4x4x64xf32, #tpu.memory_space<vmem>>, vector<2x1x1x64xf32>
      %131 = vector.shape_cast %130 : vector<2x1x1x64xf32> to vector<2x64xf32>
      %c0_168 = arith.constant 0 : index
      %c3_169 = arith.constant 3 : index
      %c2_170 = arith.constant 2 : index
      %c0_171 = arith.constant 0 : index
      %132 = vector.load %arg18[%c0_168, %c3_169, %c2_170, %c0_171] : memref<2x4x4x64xf32, #tpu.memory_space<vmem>>, vector<2x1x1x64xf32>
      %133 = vector.shape_cast %132 : vector<2x1x1x64xf32> to vector<2x64xf32>
      %c0_172 = arith.constant 0 : index
      %c3_173 = arith.constant 3 : index
      %c3_174 = arith.constant 3 : index
      %c0_175 = arith.constant 0 : index
      %134 = vector.load %arg18[%c0_172, %c3_173, %c3_174, %c0_175] : memref<2x4x4x64xf32, #tpu.memory_space<vmem>>, vector<2x1x1x64xf32>
      %135 = vector.shape_cast %134 : vector<2x1x1x64xf32> to vector<2x64xf32>
      %136 = tpu.concatenate %105, %107, %109, %111, %113, %115, %117, %119, %121, %123, %125, %127, %129, %131, %133, %135 in 1 : vector<2x64xf32>, vector<2x64xf32>, vector<2x64xf32>, vector<2x64xf32>, vector<2x64xf32>, vector<2x64xf32>, vector<2x64xf32>, vector<2x64xf32>, vector<2x64xf32>, vector<2x64xf32>, vector<2x64xf32>, vector<2x64xf32>, vector<2x64xf32>, vector<2x64xf32>, vector<2x64xf32>, vector<2x64xf32> -> vector<2x1024xf32>
      %137 = arith.truncf %136 : vector<2x1024xf32> to vector<2x1024xbf16>
      %c0_176 = arith.constant 0 : index
      %c0_177 = arith.constant 0 : index
      %138 = vector.load %arg19[%c0_176, %c0_177] : memref<2x1024xbf16, #tpu.memory_space<vmem>>, vector<2x1024xbf16>
      tpu.vector_store %arg19[%c0_176, %c0_177], %137 {strides = array<i32>} : memref<2x1024xbf16, #tpu.memory_space<vmem>>, vector<2x1024xbf16>,
      %cst_178 = arith.constant 0.000000e+00 : f32
      %139 = vector.broadcast %cst_178 : f32 to vector<2x6xf32>
      %c0_179 = arith.constant 0 : index
      %c0_180 = arith.constant 0 : index
      %140 = vector.load %arg20[%c0_179, %c0_180] : memref<2x6xf32, #tpu.memory_space<vmem>>, vector<2x6xf32>
      tpu.vector_store %arg20[%c0_179, %c0_180], %139 {strides = array<i32>} : memref<2x6xf32, #tpu.memory_space<vmem>>, vector<2x6xf32>,
    } else {
    }
    %c0 = arith.constant 0 : index
    %c0_1 = arith.constant 0 : index
    %3 = vector.load %arg19[%c0, %c0_1] : memref<2x1024xbf16, #tpu.memory_space<vmem>>, vector<2x1024xbf16>
    %c0_2 = arith.constant 0 : index
    %c0_3 = arith.constant 0 : index
    %4 = vector.load %arg10[%c0_2, %c0_3] : memref<1024x128xbf16, #tpu.memory_space<vmem>>, vector<1024x128xbf16>
    %cst = arith.constant dense<0.000000e+00> : vector<2x128xf32>
    %5 = tpu.matmul %3, %4, %cst {dimension_numbers = #tpu.dot_dimension_numbers<[1], [0], [0], [1], [0, 0, 1, 1], [], []>} : vector<2x1024xbf16>, vector<1024x128xbf16>, vector<2x128xf32> -> vector<2x128xf32>
    %c0_4 = arith.constant 0 : index
    %c0_5 = arith.constant 0 : index
    %6 = vector.load %arg9[%c0_4, %c0_5] : memref<2x10xf32, #tpu.memory_space<vmem>>, vector<2x10xf32>
    %c0_6 = arith.constant 0 : index
    %c0_7 = arith.constant 0 : index
    %7 = vector.load %arg11[%c0_6, %c0_7] : memref<10x128xbf16, #tpu.memory_space<vmem>>, vector<10x128xbf16>
    %8 = arith.truncf %6 : vector<2x10xf32> to vector<2x10xbf16>
    %cst_8 = arith.constant dense<0.000000e+00> : vector<2x128xf32>
    %9 = tpu.matmul %8, %7, %cst_8 {dimension_numbers = #tpu.dot_dimension_numbers<[1], [0], [0], [1], [0, 0, 1, 1], [], []>} : vector<2x10xbf16>, vector<10x128xbf16>, vector<2x128xf32> -> vector<2x128xf32>
    %10 = arith.addf %5, %9 : vector<2x128xf32>
    %c0_9 = arith.constant 0 : index
    %c0_10 = arith.constant 0 : index
    %11 = vector.load %arg12[%c0_9, %c0_10] : memref<1x128xf32, #tpu.memory_space<vmem>>, vector<1x128xf32>
    %12 = vector.broadcast %11 : vector<1x128xf32> to vector<2x128xf32>
    %13 = arith.addf %10, %12 : vector<2x128xf32>
    %cst_11 = arith.constant 0.000000e+00 : f32
    %14 = vector.broadcast %cst_11 : f32 to vector<2x128xf32>
    %15 = arith.maximumf %13, %14 : vector<2x128xf32>
    %c0_12 = arith.constant 0 : index
    %c0_13 = arith.constant 0 : index
    %16 = vector.load %arg20[%c0_12, %c0_13] : memref<2x6xf32, #tpu.memory_space<vmem>>, vector<2x6xf32>
    %c0_14 = arith.constant 0 : index
    %c0_15 = arith.constant 0 : index
    %17 = vector.load %arg13[%c0_14, %c0_15] : memref<128x6xbf16, #tpu.memory_space<vmem>>, vector<128x6xbf16>
    %18 = arith.truncf %15 : vector<2x128xf32> to vector<2x128xbf16>
    %cst_16 = arith.constant dense<0.000000e+00> : vector<2x6xf32>
    %19 = tpu.matmul %18, %17, %cst_16 {dimension_numbers = #tpu.dot_dimension_numbers<[1], [0], [0], [1], [0, 0, 1, 1], [], []>} : vector<2x128xbf16>, vector<128x6xbf16>, vector<2x6xf32> -> vector<2x6xf32>
    %20 = arith.addf %16, %19 : vector<2x6xf32>
    %c0_17 = arith.constant 0 : index
    %c0_18 = arith.constant 0 : index
    %21 = vector.load %arg20[%c0_17, %c0_18] : memref<2x6xf32, #tpu.memory_space<vmem>>, vector<2x6xf32>
    tpu.vector_store %arg20[%c0_17, %c0_18], %20 {strides = array<i32>} : memref<2x6xf32, #tpu.memory_space<vmem>>, vector<2x6xf32>,
    %c3_i32 = arith.constant 3 : i32
    %22 = arith.cmpi eq, %arg1, %c3_i32 : i32
    %23 = arith.extui %22 : i1 to i32
    %c0_i32_19 = arith.constant 0 : i32
    %24 = arith.cmpi ne, %23, %c0_i32_19 : i32
    scf.if %24 {
      %c0_20 = arith.constant 0 : index
      %c0_21 = arith.constant 0 : index
      %25 = vector.load %arg20[%c0_20, %c0_21] : memref<2x6xf32, #tpu.memory_space<vmem>>, vector<2x6xf32>
      %c0_22 = arith.constant 0 : index
      %c0_23 = arith.constant 0 : index
      %26 = vector.load %arg14[%c0_22, %c0_23] : memref<1x6xf32, #tpu.memory_space<vmem>>, vector<1x6xf32>
      %27 = vector.broadcast %26 : vector<1x6xf32> to vector<2x6xf32>
      %28 = arith.addf %25, %27 : vector<2x6xf32>
      %c0_24 = arith.constant 0 : index
      %c0_25 = arith.constant 0 : index
      %29 = vector.load %arg15[%c0_24, %c0_25] : memref<2x6xf32, #tpu.memory_space<vmem>>, vector<2x6xf32>
      tpu.vector_store %arg15[%c0_24, %c0_25], %28 {strides = array<i32>} : memref<2x6xf32, #tpu.memory_space<vmem>>, vector<2x6xf32>,
    } else {
    }
    return
  }
  func.func @transform_0(%arg0: i32, %arg1: i32) -> (i32, i32) {
    %c0_i32 = arith.constant 0 : i32
    %c0_i32_0 = arith.constant 0 : i32
    return %arg0, %c0_i32 : i32, i32
  }
  func.func @transform_1(%arg0: i32, %arg1: i32) -> (i32, i32) {
    %c0_i32 = arith.constant 0 : i32
    %c0_i32_0 = arith.constant 0 : i32
    %c0_i32_1 = arith.constant 0 : i32
    return %c0_i32, %c0_i32_0 : i32, i32
  }
  func.func @transform_2(%arg0: i32, %arg1: i32) -> (i32, i32) {
    %c0_i32 = arith.constant 0 : i32
    %c0_i32_0 = arith.constant 0 : i32
    %c0_i32_1 = arith.constant 0 : i32
    return %c0_i32, %c0_i32_0 : i32, i32
  }
  func.func @transform_3(%arg0: i32, %arg1: i32) -> (i32, i32, i32) {
    %c0_i32 = arith.constant 0 : i32
    %c0_i32_0 = arith.constant 0 : i32
    %c0_i32_1 = arith.constant 0 : i32
    %c0_i32_2 = arith.constant 0 : i32
    return %c0_i32, %c0_i32_0, %c0_i32_1 : i32, i32, i32
  }
  func.func @transform_4(%arg0: i32, %arg1: i32) -> (i32, i32) {
    %c0_i32 = arith.constant 0 : i32
    %c0_i32_0 = arith.constant 0 : i32
    %c0_i32_1 = arith.constant 0 : i32
    return %c0_i32, %c0_i32_0 : i32, i32
  }
  func.func @transform_5(%arg0: i32, %arg1: i32) -> (i32, i32) {
    %c0_i32 = arith.constant 0 : i32
    %c0_i32_0 = arith.constant 0 : i32
    %c0_i32_1 = arith.constant 0 : i32
    return %c0_i32, %c0_i32_0 : i32, i32
  }
  func.func @transform_6(%arg0: i32, %arg1: i32) -> (i32, i32) {
    %c0_i32 = arith.constant 0 : i32
    %c0_i32_0 = arith.constant 0 : i32
    %c0_i32_1 = arith.constant 0 : i32
    return %c0_i32, %c0_i32_0 : i32, i32
  }
  func.func @transform_7(%arg0: i32, %arg1: i32) -> (i32, i32) {
    %c0_i32 = arith.constant 0 : i32
    %c0_i32_0 = arith.constant 0 : i32
    return %arg0, %c0_i32 : i32, i32
  }
  func.func @transform_8(%arg0: i32, %arg1: i32) -> (i32, i32) {
    %c0_i32 = arith.constant 0 : i32
    %c0_i32_0 = arith.constant 0 : i32
    return %c0_i32, %arg1 : i32, i32
  }
  func.func @transform_9(%arg0: i32, %arg1: i32) -> (i32, i32) {
    %c0_i32 = arith.constant 0 : i32
    %c0_i32_0 = arith.constant 0 : i32
    return %c0_i32, %arg1 : i32, i32
  }
  func.func @transform_10(%arg0: i32, %arg1: i32) -> (i32, i32) {
    %c0_i32 = arith.constant 0 : i32
    %c0_i32_0 = arith.constant 0 : i32
    return %c0_i32, %arg1 : i32, i32
  }
  func.func @transform_11(%arg0: i32, %arg1: i32) -> (i32, i32) {
    %c0_i32 = arith.constant 0 : i32
    %c0_i32_0 = arith.constant 0 : i32
    return %arg1, %c0_i32 : i32, i32
  }
  func.func @transform_12(%arg0: i32, %arg1: i32) -> (i32, i32) {
    %c0_i32 = arith.constant 0 : i32
    %c0_i32_0 = arith.constant 0 : i32
    %c0_i32_1 = arith.constant 0 : i32
    return %c0_i32, %c0_i32_0 : i32, i32
  }
  func.func @transform_13(%arg0: i32, %arg1: i32) -> (i32, i32) {
    %c0_i32 = arith.constant 0 : i32
    %c0_i32_0 = arith.constant 0 : i32
    return %arg0, %c0_i32 : i32, i32
  }
}

</mosaic_0001>

<bundles_post_ra>
// kernel: cnn_policy_forward.1
= control target key start
LH: loop header
LB: loop body
LE: loop exit
PB: predicated region body
PF: predicated region fallthrough
CT: control target
= control target key end

     0   :  { %s7322_s0 = inlined_call_operand.vmem [shape: bf16[448,256], index: 0, kind: input, shape index: {}]   ;;  %s7323_s1 = inlined_call_operand.vmem [shape: bf16[256,32], index: 1, kind: input, shape index: {}]   ;;  %s7324_s2 = inlined_call_operand.vmem [shape: f32[1,32], index: 2, kind: input, shape index: {}]   ;;  %s7325_s3 = inlined_call_operand.vmem [shape: bf16[2,128,128], index: 3, kind: input, shape index: {}]   ;;  %s7326_s4 = inlined_call_operand.vmem [shape: f32[1,64], index: 4, kind: input, shape index: {}]   ;;  %s7327_s5 = inlined_call_operand.vmem [shape: bf16[192,256], index: 5, kind: input, shape index: {}]   ;;  %s7328_s6 = inlined_call_operand.vmem [shape: f32[1,64], index: 6, kind: input, shape index: {}]   ;;  %s7329_s7 = inlined_call_operand.vmem [shape: f32[2,10], index: 7, kind: input, shape index: {}]   ;;  %s7330_s8 = inlined_call_operand.vmem [shape: bf16[1024,512], index: 8, kind: input, shape index: {}]   ;;  %s7331_s9 = inlined_call_operand.vmem [shape: bf16[10,512], index: 9, kind: input, shape index: {}]   ;;  %s7332_s10 = inlined_call_operand.vmem [shape: f32[1,512], index: 10, kind: input, shape index: {}]   ;;  %s7333_s11 = inlined_call_operand.vmem [shape: bf16[512,6], index: 11, kind: input, shape index: {}]   ;;  %s7334_s12 = inlined_call_operand.vmem [shape: f32[1,6], index: 12, kind: input, shape index: {}]   ;;  %s7335_s13 = inlined_call_operand.hbm [shape: f32[2,6], index: 13, kind: output, shape index: {}]  }
   0x1   :  { %7338 = sst [smem:[#allocation14_spill]] %s7330_s8 }
   0x2   :  { %7339 = sst [smem:[#allocation15_spill]] %s7331_s9 }
   0x3   :  { %18 = vsyncpa [#allocation10], 0  ;;  %s5783_s25 = smov 0   ;;  %s5785_s26 = smov 0  }
   0x4   :  { %s5787_s27 = smov 0   ;;  %s5789_s28 = smov 0  }
   0x5   :  { %s5791_s29 = smov 0  }
   0x6 LB: > { %7340 = sst [smem:[#allocation12_spill]] %s5697_s28  ;;  %s33_s14 = sadd.s32 1, %s5697_s28  ;;  %s5701_s29 = sphi %s5791_s29, %s24_s29   ;;  %s5697_s28 = sphi %s5789_s28, %s7350_s28   ;;  %s5693_s27 = sphi %s5787_s27, %s7349_s27   ;;  %s5689_s26 = sphi %s5785_s26, %s7352_s26   ;;  %s5685_s25 = sphi %s5783_s25, %s7351_s25  }
   0x7   : > { %p34_p0 = scmp.ge.s32.totalorder %s33_s14, 4  ;;  %p228_p1 = scmp.ne.s32.totalorder %s5689_s26, %s5685_s25 }
   0x8   : > { %p229_p2 = scmp.eq.s32.totalorder %s5701_s29, 0  ;;  %s221_s17 = sadd.s32 1, %s5689_s26 }
   0x9   : > { %s7354_s14 = smov (%p34_p0, %s33_s14), 0  ;;  %p4661_p5 = scmp.ge.s32.totalorder %s5701_s29, 4 }
   0xa   : > { %7341 = sst [smem:[#allocation13_spill]] %s7354_s14  ;;  %p5815_p3 = por %p229_p2, %p228_p1 }
   0xb   : > { %s218_s16 = ssub.s32 %s5697_s28, %s7354_s14  ;;  %417 = sbr.rel (%p4661_p5) target bundleno = 122 (0x7a), region = 52 }
   0xc   : > { %p219_p4 = scmp.eq.s32.totalorder %s218_s16, 0 }
   0xe   : > { %s5823_s18 = scalar_select %p219_p4, %s5689_s26, %s221_s17  }
  0x10   : > { %420 = sbr.rel (!%p5815_p3) target bundleno = 111 (0x6f), region = 56  ;;  %s422_s19 = sand.u32 (%p5815_p3), 1, %s5689_s26  }
  0x11   : > { %s4663_s20 = sshll.u32 (%p5815_p3), %s5697_s28, 2  ;;  %s4662_s21 = sshll.u32 (%p5815_p3), %s422_s19, 9 }
  0x12   : > { %s7343_s8 = sld [smem:[#allocation14_spill]] (%p5815_p3)  ;;  %s5837_s16 = scalar_lea.vmem (%p5815_p3), [#allocation7], %s4662_s21 }
  0x18   : > { %s5833_s24 = scalar_lea.vmem %s7343_s8, %s4663_s20 }
  0x19   : > { %v443_v0 = vld [vmem:[%s5833_s24] sm:$0xf]  ;;  %v445_v1 = vld [vmem:[%s5833_s24 + $0x10] sm:$0xf] }
  0x1a   : > { %444 = vst [vmem:[%s5837_s16] sm:$0xf] %v443_v0  ;;  %446 = vst [vmem:[%s5837_s16 + $0x4] sm:$0xf] %v445_v1  ;;  %v447_v2 = vld [vmem:[%s5833_s24 + $0x20] sm:$0xf] }
  0x1b   : > { %v449_v3 = vld [vmem:[%s5833_s24 + $0x30] sm:$0xf]  ;;  %v451_v4 = vld [vmem:[%s5833_s24 + $0x40] sm:$0xf]  ;;  %448 = vst [vmem:[%s5837_s16 + $0x8] sm:$0xf] %v447_v2 }
  0x1c   : > { %450 = vst [vmem:[%s5837_s16 + $0xc] sm:$0xf] %v449_v3  ;;  %452 = vst [vmem:[%s5837_s16 + $0x10] sm:$0xf] %v451_v4  ;;  %v453_v5 = vld [vmem:[%s5833_s24 + $0x50] sm:$0xf] }
  0x1d   : > { %v455_v6 = vld [vmem:[%s5833_s24 + $0x60] sm:$0xf]  ;;  %v457_v7 = vld [vmem:[%s5833_s24 + $0x70] sm:$0xf]  ;;  %454 = vst [vmem:[%s5837_s16 + $0x14] sm:$0xf] %v453_v5 }
  0x1e   : > { %456 = vst [vmem:[%s5837_s16 + $0x18] sm:$0xf] %v455_v6  ;;  %458 = vst [vmem:[%s5837_s16 + $0x1c] sm:$0xf] %v457_v7  ;;  %v459_v8 = vld [vmem:[%s5833_s24 + $0x80] sm:$0xf] }
  0x1f   : > { %v461_v9 = vld [vmem:[%s5833_s24 + $0x90] sm:$0xf]  ;;  %v463_v10 = vld [vmem:[%s5833_s24 + $0xa0] sm:$0xf]  ;;  %460 = vst [vmem:[%s5837_s16 + $0x20] sm:$0xf] %v459_v8 }
  0x20   : > { %462 = vst [vmem:[%s5837_s16 + $0x24] sm:$0xf] %v461_v9  ;;  %464 = vst [vmem:[%s5837_s16 + $0x28] sm:$0xf] %v463_v10  ;;  %v465_v11 = vld [vmem:[%s5833_s24 + $0xb0] sm:$0xf] }
  0x21   : > { %v467_v12 = vld [vmem:[%s5833_s24 + $0xc0] sm:$0xf]  ;;  %v469_v13 = vld [vmem:[%s5833_s24 + $0xd0] sm:$0xf]  ;;  %466 = vst [vmem:[%s5837_s16 + $0x2c] sm:$0xf] %v465_v11 }
  0x22   : > { %468 = vst [vmem:[%s5837_s16 + $0x30] sm:$0xf] %v467_v12  ;;  %470 = vst [vmem:[%s5837_s16 + $0x34] sm:$0xf] %v469_v13  ;;  %v471_v14 = vld [vmem:[%s5833_s24 + $0xe0] sm:$0xf] }
  0x23   : > { %v473_v15 = vld [vmem:[%s5833_s24 + $0xf0] sm:$0xf]  ;;  %v475_v16 = vld [vmem:[%s5833_s24 + $0x100] sm:$0xf]  ;;  %472 = vst [vmem:[%s5837_s16 + $0x38] sm:$0xf] %v471_v14 }
  0x24   : > { %474 = vst [vmem:[%s5837_s16 + $0x3c] sm:$0xf] %v473_v15  ;;  %476 = vst [vmem:[%s5837_s16 + $0x40] sm:$0xf] %v475_v16  ;;  %v477_v17 = vld [vmem:[%s5833_s24 + $0x110] sm:$0xf] }
  0x25   : > { %v479_v18 = vld [vmem:[%s5833_s24 + $0x120] sm:$0xf]  ;;  %v481_v19 = vld [vmem:[%s5833_s24 + $0x130] sm:$0xf]  ;;  %478 = vst [vmem:[%s5837_s16 + $0x44] sm:$0xf] %v477_v17 }
  0x26   : > { %480 = vst [vmem:[%s5837_s16 + $0x48] sm:$0xf] %v479_v18  ;;  %482 = vst [vmem:[%s5837_s16 + $0x4c] sm:$0xf] %v481_v19  ;;  %v483_v20 = vld [vmem:[%s5833_s24 + $0x140] sm:$0xf] }
  0x27   : > { %v485_v21 = vld [vmem:[%s5833_s24 + $0x150] sm:$0xf]  ;;  %v487_v22 = vld [vmem:[%s5833_s24 + $0x160] sm:$0xf]  ;;  %484 = vst [vmem:[%s5837_s16 + $0x50] sm:$0xf] %v483_v20 }
  0x28   : > { %486 = vst [vmem:[%s5837_s16 + $0x54] sm:$0xf] %v485_v21  ;;  %488 = vst [vmem:[%s5837_s16 + $0x58] sm:$0xf] %v487_v22  ;;  %v489_v23 = vld [vmem:[%s5833_s24 + $0x170] sm:$0xf] }
  0x29   : > { %v491_v24 = vld [vmem:[%s5833_s24 + $0x180] sm:$0xf]  ;;  %v493_v25 = vld [vmem:[%s5833_s24 + $0x190] sm:$0xf]  ;;  %490 = vst [vmem:[%s5837_s16 + $0x5c] sm:$0xf] %v489_v23 }
  0x2a   : > { %492 = vst [vmem:[%s5837_s16 + $0x60] sm:$0xf] %v491_v24  ;;  %494 = vst [vmem:[%s5837_s16 + $0x64] sm:$0xf] %v493_v25  ;;  %v495_v26 = vld [vmem:[%s5833_s24 + $0x1a0] sm:$0xf] }
  0x2b   : > { %v497_v27 = vld [vmem:[%s5833_s24 + $0x1b0] sm:$0xf]  ;;  %v499_v28 = vld [vmem:[%s5833_s24 + $0x1c0] sm:$0xf]  ;;  %496 = vst [vmem:[%s5837_s16 + $0x68] sm:$0xf] %v495_v26 }
  0x2c   : > { %498 = vst [vmem:[%s5837_s16 + $0x6c] sm:$0xf] %v497_v27  ;;  %500 = vst [vmem:[%s5837_s16 + $0x70] sm:$0xf] %v499_v28  ;;  %v501_v29 = vld [vmem:[%s5833_s24 + $0x1d0] sm:$0xf] }
  0x2d   : > { %v503_v30 = vld [vmem:[%s5833_s24 + $0x1e0] sm:$0xf]  ;;  %v505_v31 = vld [vmem:[%s5833_s24 + $0x1f0] sm:$0xf]  ;;  %502 = vst [vmem:[%s5837_s16 + $0x74] sm:$0xf] %v501_v29 }
  0x2e   : > { %504 = vst [vmem:[%s5837_s16 + $0x78] sm:$0xf] %v503_v30  ;;  %506 = vst [vmem:[%s5837_s16 + $0x7c] sm:$0xf] %v505_v31  ;;  %v507_v32 = vld [vmem:[%s5833_s24 + $0x200] sm:$0xf] }
  0x2f   : > { %v509_v33 = vld [vmem:[%s5833_s24 + $0x210] sm:$0xf]  ;;  %v511_v34 = vld [vmem:[%s5833_s24 + $0x220] sm:$0xf]  ;;  %508 = vst [vmem:[%s5837_s16 + $0x80] sm:$0xf] %v507_v32 }
  0x30   : > { %510 = vst [vmem:[%s5837_s16 + $0x84] sm:$0xf] %v509_v33  ;;  %512 = vst [vmem:[%s5837_s16 + $0x88] sm:$0xf] %v511_v34  ;;  %v513_v35 = vld [vmem:[%s5833_s24 + $0x230] sm:$0xf] }
  0x31   : > { %v515_v36 = vld [vmem:[%s5833_s24 + $0x240] sm:$0xf]  ;;  %v517_v37 = vld [vmem:[%s5833_s24 + $0x250] sm:$0xf]  ;;  %514 = vst [vmem:[%s5837_s16 + $0x8c] sm:$0xf] %v513_v35 }
  0x32   : > { %516 = vst [vmem:[%s5837_s16 + $0x90] sm:$0xf] %v515_v36  ;;  %518 = vst [vmem:[%s5837_s16 + $0x94] sm:$0xf] %v517_v37  ;;  %v519_v38 = vld [vmem:[%s5833_s24 + $0x260] sm:$0xf] }
  0x33   : > { %v521_v39 = vld [vmem:[%s5833_s24 + $0x270] sm:$0xf]  ;;  %v523_v40 = vld [vmem:[%s5833_s24 + $0x280] sm:$0xf]  ;;  %520 = vst [vmem:[%s5837_s16 + $0x98] sm:$0xf] %v519_v38 }
  0x34   : > { %522 = vst [vmem:[%s5837_s16 + $0x9c] sm:$0xf] %v521_v39  ;;  %524 = vst [vmem:[%s5837_s16 + $0xa0] sm:$0xf] %v523_v40  ;;  %v525_v41 = vld [vmem:[%s5833_s24 + $0x290] sm:$0xf] }
  0x35   : > { %v527_v42 = vld [vmem:[%s5833_s24 + $0x2a0] sm:$0xf]  ;;  %v529_v43 = vld [vmem:[%s5833_s24 + $0x2b0] sm:$0xf]  ;;  %526 = vst [vmem:[%s5837_s16 + $0xa4] sm:$0xf] %v525_v41 }
  0x36   : > { %528 = vst [vmem:[%s5837_s16 + $0xa8] sm:$0xf] %v527_v42  ;;  %530 = vst [vmem:[%s5837_s16 + $0xac] sm:$0xf] %v529_v43  ;;  %v531_v44 = vld [vmem:[%s5833_s24 + $0x2c0] sm:$0xf] }
  0x37   : > { %v533_v45 = vld [vmem:[%s5833_s24 + $0x2d0] sm:$0xf]  ;;  %v535_v46 = vld [vmem:[%s5833_s24 + $0x2e0] sm:$0xf]  ;;  %532 = vst [vmem:[%s5837_s16 + $0xb0] sm:$0xf] %v531_v44 }
  0x38   : > { %534 = vst [vmem:[%s5837_s16 + $0xb4] sm:$0xf] %v533_v45  ;;  %536 = vst [vmem:[%s5837_s16 + $0xb8] sm:$0xf] %v535_v46  ;;  %v537_v47 = vld [vmem:[%s5833_s24 + $0x2f0] sm:$0xf] }
  0x39   : > { %v539_v48 = vld [vmem:[%s5833_s24 + $0x300] sm:$0xf]  ;;  %v541_v49 = vld [vmem:[%s5833_s24 + $0x310] sm:$0xf]  ;;  %538 = vst [vmem:[%s5837_s16 + $0xbc] sm:$0xf] %v537_v47 }
  0x3a   : > { %540 = vst [vmem:[%s5837_s16 + $0xc0] sm:$0xf] %v539_v48  ;;  %542 = vst [vmem:[%s5837_s16 + $0xc4] sm:$0xf] %v541_v49  ;;  %v543_v50 = vld [vmem:[%s5833_s24 + $0x320] sm:$0xf] }
  0x3b   : > { %v545_v51 = vld [vmem:[%s5833_s24 + $0x330] sm:$0xf]  ;;  %v547_v52 = vld [vmem:[%s5833_s24 + $0x340] sm:$0xf]  ;;  %544 = vst [vmem:[%s5837_s16 + $0xc8] sm:$0xf] %v543_v50 }
  0x3c   : > { %546 = vst [vmem:[%s5837_s16 + $0xcc] sm:$0xf] %v545_v51  ;;  %548 = vst [vmem:[%s5837_s16 + $0xd0] sm:$0xf] %v547_v52  ;;  %v549_v53 = vld [vmem:[%s5833_s24 + $0x350] sm:$0xf] }
  0x3d   : > { %v551_v54 = vld [vmem:[%s5833_s24 + $0x360] sm:$0xf]  ;;  %v553_v55 = vld [vmem:[%s5833_s24 + $0x370] sm:$0xf]  ;;  %550 = vst [vmem:[%s5837_s16 + $0xd4] sm:$0xf] %v549_v53 }
  0x3e   : > { %552 = vst [vmem:[%s5837_s16 + $0xd8] sm:$0xf] %v551_v54  ;;  %554 = vst [vmem:[%s5837_s16 + $0xdc] sm:$0xf] %v553_v55  ;;  %v555_v56 = vld [vmem:[%s5833_s24 + $0x380] sm:$0xf] }
  0x3f   : > { %v557_v57 = vld [vmem:[%s5833_s24 + $0x390] sm:$0xf]  ;;  %v559_v58 = vld [vmem:[%s5833_s24 + $0x3a0] sm:$0xf]  ;;  %556 = vst [vmem:[%s5837_s16 + $0xe0] sm:$0xf] %v555_v56 }
  0x40   : > { %558 = vst [vmem:[%s5837_s16 + $0xe4] sm:$0xf] %v557_v57  ;;  %560 = vst [vmem:[%s5837_s16 + $0xe8] sm:$0xf] %v559_v58  ;;  %v561_v59 = vld [vmem:[%s5833_s24 + $0x3b0] sm:$0xf] }
  0x41   : > { %v563_v60 = vld [vmem:[%s5833_s24 + $0x3c0] sm:$0xf]  ;;  %v565_v61 = vld [vmem:[%s5833_s24 + $0x3d0] sm:$0xf]  ;;  %562 = vst [vmem:[%s5837_s16 + $0xec] sm:$0xf] %v561_v59 }
  0x42   : > { %564 = vst [vmem:[%s5837_s16 + $0xf0] sm:$0xf] %v563_v60  ;;  %566 = vst [vmem:[%s5837_s16 + $0xf4] sm:$0xf] %v565_v61  ;;  %v567_v62 = vld [vmem:[%s5833_s24 + $0x3e0] sm:$0xf] }
  0x43   : > { %v569_v63 = vld [vmem:[%s5833_s24 + $0x3f0] sm:$0xf]  ;;  %v571_v0 = vld [vmem:[%s5833_s24 + $0x400] sm:$0xf]  ;;  %568 = vst [vmem:[%s5837_s16 + $0xf8] sm:$0xf] %v567_v62 }
  0x44   : > { %570 = vst [vmem:[%s5837_s16 + $0xfc] sm:$0xf] %v569_v63  ;;  %572 = vst [vmem:[%s5837_s16 + $0x100] sm:$0xf] %v571_v0  ;;  %v573_v1 = vld [vmem:[%s5833_s24 + $0x410] sm:$0xf] }
  0x45   : > { %v575_v2 = vld [vmem:[%s5833_s24 + $0x420] sm:$0xf]  ;;  %v577_v3 = vld [vmem:[%s5833_s24 + $0x430] sm:$0xf]  ;;  %574 = vst [vmem:[%s5837_s16 + $0x104] sm:$0xf] %v573_v1 }
  0x46   : > { %576 = vst [vmem:[%s5837_s16 + $0x108] sm:$0xf] %v575_v2  ;;  %578 = vst [vmem:[%s5837_s16 + $0x10c] sm:$0xf] %v577_v3  ;;  %v579_v4 = vld [vmem:[%s5833_s24 + $0x440] sm:$0xf] }
  0x47   : > { %v581_v5 = vld [vmem:[%s5833_s24 + $0x450] sm:$0xf]  ;;  %v583_v6 = vld [vmem:[%s5833_s24 + $0x460] sm:$0xf]  ;;  %580 = vst [vmem:[%s5837_s16 + $0x110] sm:$0xf] %v579_v4 }
  0x48   : > { %582 = vst [vmem:[%s5837_s16 + $0x114] sm:$0xf] %v581_v5  ;;  %584 = vst [vmem:[%s5837_s16 + $0x118] sm:$0xf] %v583_v6  ;;  %v585_v7 = vld [vmem:[%s5833_s24 + $0x470] sm:$0xf] }
  0x49   : > { %v587_v8 = vld [vmem:[%s5833_s24 + $0x480] sm:$0xf]  ;;  %v589_v9 = vld [vmem:[%s5833_s24 + $0x490] sm:$0xf]  ;;  %586 = vst [vmem:[%s5837_s16 + $0x11c] sm:$0xf] %v585_v7 }
  0x4a   : > { %588 = vst [vmem:[%s5837_s16 + $0x120] sm:$0xf] %v587_v8  ;;  %590 = vst [vmem:[%s5837_s16 + $0x124] sm:$0xf] %v589_v9  ;;  %v591_v10 = vld [vmem:[%s5833_s24 + $0x4a0] sm:$0xf] }
  0x4b   : > { %v593_v11 = vld [vmem:[%s5833_s24 + $0x4b0] sm:$0xf]  ;;  %v595_v12 = vld [vmem:[%s5833_s24 + $0x4c0] sm:$0xf]  ;;  %592 = vst [vmem:[%s5837_s16 + $0x128] sm:$0xf] %v591_v10 }
  0x4c   : > { %594 = vst [vmem:[%s5837_s16 + $0x12c] sm:$0xf] %v593_v11  ;;  %596 = vst [vmem:[%s5837_s16 + $0x130] sm:$0xf] %v595_v12  ;;  %v597_v13 = vld [vmem:[%s5833_s24 + $0x4d0] sm:$0xf] }
  0x4d   : > { %v599_v14 = vld [vmem:[%s5833_s24 + $0x4e0] sm:$0xf]  ;;  %v601_v15 = vld [vmem:[%s5833_s24 + $0x4f0] sm:$0xf]  ;;  %598 = vst [vmem:[%s5837_s16 + $0x134] sm:$0xf] %v597_v13 }
  0x4e   : > { %600 = vst [vmem:[%s5837_s16 + $0x138] sm:$0xf] %v599_v14  ;;  %602 = vst [vmem:[%s5837_s16 + $0x13c] sm:$0xf] %v601_v15  ;;  %v603_v16 = vld [vmem:[%s5833_s24 + $0x500] sm:$0xf] }
  0x4f   : > { %v605_v17 = vld [vmem:[%s5833_s24 + $0x510] sm:$0xf]  ;;  %v607_v18 = vld [vmem:[%s5833_s24 + $0x520] sm:$0xf]  ;;  %604 = vst [vmem:[%s5837_s16 + $0x140] sm:$0xf] %v603_v16 }
  0x50   : > { %606 = vst [vmem:[%s5837_s16 + $0x144] sm:$0xf] %v605_v17  ;;  %608 = vst [vmem:[%s5837_s16 + $0x148] sm:$0xf] %v607_v18  ;;  %v609_v19 = vld [vmem:[%s5833_s24 + $0x530] sm:$0xf] }
  0x51   : > { %v611_v20 = vld [vmem:[%s5833_s24 + $0x540] sm:$0xf]  ;;  %v613_v21 = vld [vmem:[%s5833_s24 + $0x550] sm:$0xf]  ;;  %610 = vst [vmem:[%s5837_s16 + $0x14c] sm:$0xf] %v609_v19 }
  0x52   : > { %612 = vst [vmem:[%s5837_s16 + $0x150] sm:$0xf] %v611_v20  ;;  %614 = vst [vmem:[%s5837_s16 + $0x154] sm:$0xf] %v613_v21  ;;  %v615_v22 = vld [vmem:[%s5833_s24 + $0x560] sm:$0xf] }
  0x53   : > { %v617_v23 = vld [vmem:[%s5833_s24 + $0x570] sm:$0xf]  ;;  %v619_v24 = vld [vmem:[%s5833_s24 + $0x580] sm:$0xf]  ;;  %616 = vst [vmem:[%s5837_s16 + $0x158] sm:$0xf] %v615_v22 }
  0x54   : > { %618 = vst [vmem:[%s5837_s16 + $0x15c] sm:$0xf] %v617_v23  ;;  %620 = vst [vmem:[%s5837_s16 + $0x160] sm:$0xf] %v619_v24  ;;  %v621_v25 = vld [vmem:[%s5833_s24 + $0x590] sm:$0xf] }
  0x55   : > { %v623_v26 = vld [vmem:[%s5833_s24 + $0x5a0] sm:$0xf]  ;;  %v625_v27 = vld [vmem:[%s5833_s24 + $0x5b0] sm:$0xf]  ;;  %622 = vst [vmem:[%s5837_s16 + $0x164] sm:$0xf] %v621_v25 }
  0x56   : > { %624 = vst [vmem:[%s5837_s16 + $0x168] sm:$0xf] %v623_v26  ;;  %626 = vst [vmem:[%s5837_s16 + $0x16c] sm:$0xf] %v625_v27  ;;  %v627_v28 = vld [vmem:[%s5833_s24 + $0x5c0] sm:$0xf] }
  0x57   : > { %v629_v29 = vld [vmem:[%s5833_s24 + $0x5d0] sm:$0xf]  ;;  %v631_v30 = vld [vmem:[%s5833_s24 + $0x5e0] sm:$0xf]  ;;  %628 = vst [vmem:[%s5837_s16 + $0x170] sm:$0xf] %v627_v28 }
  0x58   : > { %630 = vst [vmem:[%s5837_s16 + $0x174] sm:$0xf] %v629_v29  ;;  %632 = vst [vmem:[%s5837_s16 + $0x178] sm:$0xf] %v631_v30  ;;  %v633_v31 = vld [vmem:[%s5833_s24 + $0x5f0] sm:$0xf] }
  0x59   : > { %v635_v32 = vld [vmem:[%s5833_s24 + $0x600] sm:$0xf]  ;;  %v637_v33 = vld [vmem:[%s5833_s24 + $0x610] sm:$0xf]  ;;  %634 = vst [vmem:[%s5837_s16 + $0x17c] sm:$0xf] %v633_v31 }
  0x5a   : > { %636 = vst [vmem:[%s5837_s16 + $0x180] sm:$0xf] %v635_v32  ;;  %638 = vst [vmem:[%s5837_s16 + $0x184] sm:$0xf] %v637_v33  ;;  %v639_v34 = vld [vmem:[%s5833_s24 + $0x620] sm:$0xf] }
  0x5b   : > { %v641_v35 = vld [vmem:[%s5833_s24 + $0x630] sm:$0xf]  ;;  %v643_v36 = vld [vmem:[%s5833_s24 + $0x640] sm:$0xf]  ;;  %640 = vst [vmem:[%s5837_s16 + $0x188] sm:$0xf] %v639_v34 }
  0x5c   : > { %642 = vst [vmem:[%s5837_s16 + $0x18c] sm:$0xf] %v641_v35  ;;  %644 = vst [vmem:[%s5837_s16 + $0x190] sm:$0xf] %v643_v36  ;;  %v645_v37 = vld [vmem:[%s5833_s24 + $0x650] sm:$0xf] }
  0x5d   : > { %v647_v38 = vld [vmem:[%s5833_s24 + $0x660] sm:$0xf]  ;;  %v649_v39 = vld [vmem:[%s5833_s24 + $0x670] sm:$0xf]  ;;  %646 = vst [vmem:[%s5837_s16 + $0x194] sm:$0xf] %v645_v37 }
  0x5e   : > { %648 = vst [vmem:[%s5837_s16 + $0x198] sm:$0xf] %v647_v38  ;;  %650 = vst [vmem:[%s5837_s16 + $0x19c] sm:$0xf] %v649_v39  ;;  %v651_v40 = vld [vmem:[%s5833_s24 + $0x680] sm:$0xf] }
  0x5f   : > { %v653_v41 = vld [vmem:[%s5833_s24 + $0x690] sm:$0xf]  ;;  %v655_v42 = vld [vmem:[%s5833_s24 + $0x6a0] sm:$0xf]  ;;  %652 = vst [vmem:[%s5837_s16 + $0x1a0] sm:$0xf] %v651_v40 }
  0x60   : > { %654 = vst [vmem:[%s5837_s16 + $0x1a4] sm:$0xf] %v653_v41  ;;  %656 = vst [vmem:[%s5837_s16 + $0x1a8] sm:$0xf] %v655_v42  ;;  %v657_v43 = vld [vmem:[%s5833_s24 + $0x6b0] sm:$0xf] }
  0x61   : > { %v659_v44 = vld [vmem:[%s5833_s24 + $0x6c0] sm:$0xf]  ;;  %v661_v45 = vld [vmem:[%s5833_s24 + $0x6d0] sm:$0xf]  ;;  %658 = vst [vmem:[%s5837_s16 + $0x1ac] sm:$0xf] %v657_v43 }
  0x62   : > { %660 = vst [vmem:[%s5837_s16 + $0x1b0] sm:$0xf] %v659_v44  ;;  %662 = vst [vmem:[%s5837_s16 + $0x1b4] sm:$0xf] %v661_v45  ;;  %v663_v46 = vld [vmem:[%s5833_s24 + $0x6e0] sm:$0xf] }
  0x63   : > { %v665_v47 = vld [vmem:[%s5833_s24 + $0x6f0] sm:$0xf]  ;;  %v667_v48 = vld [vmem:[%s5833_s24 + $0x700] sm:$0xf]  ;;  %664 = vst [vmem:[%s5837_s16 + $0x1b8] sm:$0xf] %v663_v46 }
  0x64   : > { %666 = vst [vmem:[%s5837_s16 + $0x1bc] sm:$0xf] %v665_v47  ;;  %668 = vst [vmem:[%s5837_s16 + $0x1c0] sm:$0xf] %v667_v48  ;;  %v669_v49 = vld [vmem:[%s5833_s24 + $0x710] sm:$0xf] }
  0x65   : > { %v671_v50 = vld [vmem:[%s5833_s24 + $0x720] sm:$0xf]  ;;  %v673_v51 = vld [vmem:[%s5833_s24 + $0x730] sm:$0xf]  ;;  %670 = vst [vmem:[%s5837_s16 + $0x1c4] sm:$0xf] %v669_v49 }
  0x66   : > { %672 = vst [vmem:[%s5837_s16 + $0x1c8] sm:$0xf] %v671_v50  ;;  %674 = vst [vmem:[%s5837_s16 + $0x1cc] sm:$0xf] %v673_v51  ;;  %v675_v52 = vld [vmem:[%s5833_s24 + $0x740] sm:$0xf] }
  0x67   : > { %v677_v53 = vld [vmem:[%s5833_s24 + $0x750] sm:$0xf]  ;;  %v679_v54 = vld [vmem:[%s5833_s24 + $0x760] sm:$0xf]  ;;  %676 = vst [vmem:[%s5837_s16 + $0x1d0] sm:$0xf] %v675_v52 }
  0x68   : > { %678 = vst [vmem:[%s5837_s16 + $0x1d4] sm:$0xf] %v677_v53  ;;  %680 = vst [vmem:[%s5837_s16 + $0x1d8] sm:$0xf] %v679_v54  ;;  %v681_v55 = vld [vmem:[%s5833_s24 + $0x770] sm:$0xf] }
  0x69   : > { %v683_v56 = vld [vmem:[%s5833_s24 + $0x780] sm:$0xf]  ;;  %v685_v57 = vld [vmem:[%s5833_s24 + $0x790] sm:$0xf]  ;;  %682 = vst [vmem:[%s5837_s16 + $0x1dc] sm:$0xf] %v681_v55 }
  0x6a   : > { %684 = vst [vmem:[%s5837_s16 + $0x1e0] sm:$0xf] %v683_v56  ;;  %686 = vst [vmem:[%s5837_s16 + $0x1e4] sm:$0xf] %v685_v57  ;;  %v687_v58 = vld [vmem:[%s5833_s24 + $0x7a0] sm:$0xf] }
  0x6b   : > { %v689_v59 = vld [vmem:[%s5833_s24 + $0x7b0] sm:$0xf]  ;;  %v691_v60 = vld [vmem:[%s5833_s24 + $0x7c0] sm:$0xf]  ;;  %688 = vst [vmem:[%s5837_s16 + $0x1e8] sm:$0xf] %v687_v58 }
  0x6c   : > { %690 = vst [vmem:[%s5837_s16 + $0x1ec] sm:$0xf] %v689_v59  ;;  %692 = vst [vmem:[%s5837_s16 + $0x1f0] sm:$0xf] %v691_v60  ;;  %v693_v61 = vld [vmem:[%s5833_s24 + $0x7d0] sm:$0xf] }
  0x6d   : > { %v695_v62 = vld [vmem:[%s5833_s24 + $0x7e0] sm:$0xf]  ;;  %v697_v63 = vld [vmem:[%s5833_s24 + $0x7f0] sm:$0xf]  ;;  %694 = vst [vmem:[%s5837_s16 + $0x1f4] sm:$0xf] %v693_v61 }
  0x6e   : > { %696 = vst [vmem:[%s5837_s16 + $0x1f8] sm:$0xf] %v695_v62  ;;  %698 = vst [vmem:[%s5837_s16 + $0x1fc] sm:$0xf] %v697_v63 }
  0x6f PF: > { %978 = sbr.rel (!%p5815_p3) target bundleno = 122 (0x7a), region = 97  ;;  %s980_s17 = sand.u32 (%p5815_p3), 1, %s5689_s26  }
  0x70   : > { %s4665_s19 = sshll.u32 (%p5815_p3), %s5697_s28, 2  ;;  %s4664_s20 = sshll.u32 (%p5815_p3), %s980_s17, 3 }
  0x71   : > { %s7344_s9 = sld [smem:[#allocation15_spill]] (%p5815_p3)  ;;  %s982_s30 = scalar_lea.vmem (%p5815_p3), [#allocation8], %s4664_s20 }
  0x77   : > { %s984_s23 = scalar_lea.vmem %s7344_s9, %s4665_s19 }
  0x78   : > { %v1001_v0 = vld [vmem:[%s984_s23] sm:$0xf]  ;;  %v1003_v1 = vld [vmem:[%s984_s23 + $0x10] sm:$0xf] }
  0x79   : > { %1002 = vst [vmem:[%s982_s30] sm:$0xf] %v1001_v0  ;;  %1004 = vst [vmem:[%s982_s30 + $0x4] sm:$0xf] %v1003_v1 }
  0x7a PF: > { %p4666_p6 = scmp.ge.s32.totalorder %s5701_s29, 1  ;;  %p1046_p7 = scmp.lt.s32.totalorder %s5701_s29, 5 }
  0x7c   : > { %p1047_p8 = pnand %p4666_p6, %p1046_p7 }
  0x7d   : > { %s1053_s15 = sand.u32 (!%p1047_p8), 1, %s5685_s25   ;;  %p1131_p9 = scmp.lt.s32.totalorder (!%p1047_p8), %s5693_s27, 3 }
  0x7e   : > { %1050 = sbr.rel (%p1047_p8) target bundleno = 2139 (0x85b), region = 146  ;;  %s4667_s24 = sshll.u32 (!%p1047_p8), %s1053_s15, 9 }
  0x7f   : > { %s6104_s16 = sshll.u32 (!%p1047_p8), %s1053_s15, 3  ;;  %s4669_s30 = sshll.u32 (!%p1047_p8), %s5693_s27, 4 }
  0x80   : > { %p1135_p10 = scmp.lt.s32.totalorder (!%p1047_p8), %s4669_s30, 63  ;;  %s6119_s9 = scalar_lea.vmem (!%p1047_p8), [#allocation7], %s4667_s24 }
  0x81   : > { %p4671_p11 = scmp.ne.s32.totalorder (!%p1047_p8), %s5693_s27, 0 }
  0x83   : > { %s6107_s17 = scalar_select %p1131_p9, %s5693_s27, 3 }
  0x84   : > { %s7356_s30 = smov (!%p1135_p10, %s4669_s30), 63  ;;  %1144 = sbr.rel (%p4671_p11) target bundleno = 1643 (0x66b), region = 158 }
  0x85   : > { %s4670_s22 = sshll.u32 %s7356_s30, 2  ;;  %s5704_s23 = smov (!%p4671_p11), 64  }
  0x86   : > { %s6117_s25 = scalar_lea.vmem %s7333_s11, %s4670_s22  ;;  %s5705_s30 = smov (!%p4671_p11), 32  }
  0x87   : > { %s5706_s8 = smov (!%p4671_p11), 96  }
  0x89   : > { %v5409_v2 = vld [vmem:[%s7323_s1 + $0x38] sm:$0xff]   ;;  %v5703_v3 = vmov 0   ;;  %v5410_v4 = vld [vmem:[%s7323_s1 + $0x30] sm:$0xff]   ;;  %v5411_v5 = vld [vmem:[%s7323_s1 + $0x28] sm:$0xff]   ;;  %vm1929_vm0 = vcmask 261120   ;;  %vm2193_vm1 = vcmask 523264  }
  0x8a   : > { %1616 = vmatprep.subr.bf16.mxu0 %v5703_v3  ;;  %5101 = vmatprep.subr.bf16.mxu1 %v5703_v3  ;;  %v5412_v6 = vld [vmem:[%s7323_s1 + $0x20] sm:$0xff]   ;;  %v5413_v7 = vld [vmem:[%s7323_s1 + $0x18] sm:$0xff]   ;;  %v5414_v9 = vld [vmem:[%s7323_s1 + $0x10] sm:$0xff]   ;;  %vm2206_vm2 = vcmask 785408   ;;  %vm2966_vm3 = vcmask 517120   ;;  %vm3601_vm4 = vcmask 41984  }
  0x8b   : > { %1617 = vmatpush1.bf16.msra.mxu0 %v5409_v2  ;;  %5117 = vmatpush1.bf16.msra.mxu1 %v5409_v2  ;;  %v5427_v8 = vld [vmem:[%s7322_s0 + $0x4] ss:$8 sps:$4 sm:$0xff]   ;;  %v5438_v11 = vld [vmem:[%s7322_s0 + $0x154] ss:$8 sps:$4 sm:$0xff]   ;;  %v5425_v21 = vld [vmem:[%s7322_s0] ss:$8 sps:$4 sm:$0xff]  }
  0x8c   : > { %1618 = vmatprep.subr.bf16.mxu0 %v5703_v3  ;;  %5102 = vmatprep.subr.bf16.mxu1 %v5703_v3  ;;  %v5415_v10 = vld [vmem:[%s7323_s1 + $0x8] sm:$0xff]   ;;  %v5416_v12 = vld [vmem:[%s7323_s1] sm:$0xff]   ;;  %v5417_v13 = vld [vmem:[%s7323_s1 + $0x78] sm:$0xff]   ;;  %vm2953_vm5 = vcmask 521216   ;;  %vm3385_vm6 = vcmask 519168   ;;  %vm3432_vm7 = vcmask 1041409  }
  0x8d   : > { %1648 = vmatprep.mubr.bf16.mxu0 %v5427_v8  ;;  %1816 = vmatprep.mubr.bf16.mxu1 %v5438_v11  ;;  %v5418_v14 = vld [vmem:[%s7323_s1 + $0x70] sm:$0xff]   ;;  %v5419_v15 = vld [vmem:[%s7323_s1 + $0x68] sm:$0xff]   ;;  %v5420_v16 = vld [vmem:[%s7323_s1 + $0x60] sm:$0xff]  }
  0x8e   : > { %v5421_v17 = vld [vmem:[%s7323_s1 + $0x58] sm:$0xff]   ;;  %v5422_v18 = vld [vmem:[%s7323_s1 + $0x50] sm:$0xff]   ;;  %v5423_v19 = vld [vmem:[%s7323_s1 + $0x48] sm:$0xff]  }
  0x8f   : > { %1619 = vmatpush1.bf16.msra.mxu0 %v5410_v4  ;;  %5118 = vmatpush1.bf16.msra.mxu1 %v5410_v4  ;;  %v5424_v20 = vld [vmem:[%s7323_s1 + $0x40] sm:$0xff]   ;;  %v5436_v22 = vld [vmem:[%s7322_s0 + $0x150] ss:$8 sps:$4 sm:$0xff]   ;;  %v5428_v23 = vld [vmem:[%s7322_s0 + $0x14] ss:$8 sps:$4 sm:$0xff]  }
  0x90   : > { %1620 = vmatprep.subr.bf16.mxu0 %v5703_v3  ;;  %5103 = vmatprep.subr.bf16.mxu1 %v5703_v3  ;;  %v5442_v24 = vld [vmem:[%s7322_s0 + $0x164] ss:$8 sps:$4 sm:$0xff]   ;;  %v5430_v25 = vld [vmem:[%s7322_s0 + $0x10] ss:$8 sps:$4 sm:$0xff]   ;;  %v5445_v26 = vld [vmem:[%s7322_s0 + $0x160] ss:$8 sps:$4 sm:$0xff]  }
  0x91   : > { %v5431_v27 = vld [vmem:[%s7322_s0 + $0x24] ss:$8 sps:$4 sm:$0xff]   ;;  %v5448_v28 = vld [vmem:[%s7322_s0 + $0x174] ss:$8 sps:$4 sm:$0xff]   ;;  %v5433_v29 = vld [vmem:[%s7322_s0 + $0x20] ss:$8 sps:$4 sm:$0xff]  }
  0x92   : > { %v5451_v30 = vld [vmem:[%s7322_s0 + $0x170] ss:$8 sps:$4 sm:$0xff]   ;;  %v5434_v31 = vld [vmem:[%s7322_s0 + $0x34] ss:$8 sps:$4 sm:$0xff]   ;;  %v5454_v32 = vld [vmem:[%s7322_s0 + $0x184] ss:$8 sps:$4 sm:$0xff]  }
  0x93   : > { %1621 = vmatpush1.bf16.msra.mxu0 %v5411_v5  ;;  %5119 = vmatpush1.bf16.msra.mxu1 %v5411_v5  ;;  %v5439_v33 = vld [vmem:[%s7322_s0 + $0x30] ss:$8 sps:$4 sm:$0xff]   ;;  %v5457_v34 = vld [vmem:[%s7322_s0 + $0x180] ss:$8 sps:$4 sm:$0xff]   ;;  %v5440_v35 = vld [vmem:[%s7322_s0 + $0x44] ss:$8 sps:$4 sm:$0xff]  }
  0x94   : > { %1622 = vmatprep.subr.bf16.mxu0 %v5703_v3  ;;  %5104 = vmatprep.subr.bf16.mxu1 %v5703_v3  ;;  %v5460_v36 = vld [vmem:[%s7322_s0 + $0x194] ss:$8 sps:$4 sm:$0xff]   ;;  %v5444_v37 = vld [vmem:[%s7322_s0 + $0x40] ss:$8 sps:$4 sm:$0xff]   ;;  %v5463_v38 = vld [vmem:[%s7322_s0 + $0x190] ss:$8 sps:$4 sm:$0xff]  }
  0x95   : > { %v5446_v39 = vld [vmem:[%s7322_s0 + $0x54] ss:$8 sps:$4 sm:$0xff]   ;;  %v5478_v40 = vld [vmem:[%s7322_s0 + $0x1a4] ss:$8 sps:$4 sm:$0xff]   ;;  %v5450_v41 = vld [vmem:[%s7322_s0 + $0x50] ss:$8 sps:$4 sm:$0xff]  }
  0x96   : > { %v5481_v42 = vld [vmem:[%s7322_s0 + $0x1a0] ss:$8 sps:$4 sm:$0xff]   ;;  %v5452_v43 = vld [vmem:[%s7322_s0 + $0x64] ss:$8 sps:$4 sm:$0xff]   ;;  %v5497_v44 = vld [vmem:[%s7322_s0 + $0x1b4] ss:$8 sps:$4 sm:$0xff]  }
  0x97   : > { %1623 = vmatpush1.bf16.msra.mxu0 %v5412_v6  ;;  %5120 = vmatpush1.bf16.msra.mxu1 %v5412_v6  ;;  %v5456_v45 = vld [vmem:[%s7322_s0 + $0x60] ss:$8 sps:$4 sm:$0xff]   ;;  %v5499_v46 = vld [vmem:[%s7322_s0 + $0x1b0] ss:$8 sps:$4 sm:$0xff]   ;;  %v5458_v47 = vld [vmem:[%s7322_s0 + $0x74] ss:$8 sps:$4 sm:$0xff]  }
  0x98   : > { %1624 = vmatprep.subr.bf16.mxu0 %v5703_v3  ;;  %5105 = vmatprep.subr.bf16.mxu1 %v5703_v3  ;;  %v5462_v48 = vld [vmem:[%s7322_s0 + $0x70] ss:$8 sps:$4 sm:$0xff]   ;;  %v5464_v49 = vld [vmem:[%s7322_s0 + $0x84] ss:$8 sps:$4 sm:$0xff]   ;;  %v5466_v50 = vld [vmem:[%s7322_s0 + $0x80] ss:$8 sps:$4 sm:$0xff]  }
  0x99   : > { %v5467_v51 = vld [vmem:[%s7322_s0 + $0x94] ss:$8 sps:$4 sm:$0xff]   ;;  %v5469_v52 = vld [vmem:[%s7322_s0 + $0x90] ss:$8 sps:$4 sm:$0xff]   ;;  %v5470_v53 = vld [vmem:[%s7322_s0 + $0xa4] ss:$8 sps:$4 sm:$0xff]  }
  0x9a   : > { %v5472_v54 = vld [vmem:[%s7322_s0 + $0xa0] ss:$8 sps:$4 sm:$0xff]   ;;  %v5473_v55 = vld [vmem:[%s7322_s0 + $0xb4] ss:$8 sps:$4 sm:$0xff]   ;;  %v5475_v56 = vld [vmem:[%s7322_s0 + $0xb0] ss:$8 sps:$4 sm:$0xff]  }
  0x9b   : > { %1625 = vmatpush1.bf16.msra.mxu0 %v5413_v7  ;;  %5121 = vmatpush1.bf16.msra.mxu1 %v5413_v7  ;;  %v5476_v57 = vld [vmem:[%s7322_s0 + $0xc4] ss:$8 sps:$4 sm:$0xff]   ;;  %v5480_v58 = vld [vmem:[%s7322_s0 + $0xc0] ss:$8 sps:$4 sm:$0xff]   ;;  %v5482_v59 = vld [vmem:[%s7322_s0 + $0xd4] ss:$8 sps:$4 sm:$0xff]  }
  0x9c   : > { %1626 = vmatprep.subr.bf16.mxu0 %v5703_v3  ;;  %5106 = vmatprep.subr.bf16.mxu1 %v5703_v3  ;;  %v5484_v60 = vld [vmem:[%s7322_s0 + $0xd0] ss:$8 sps:$4 sm:$0xff]   ;;  %v5485_v61 = vld [vmem:[%s7322_s0 + $0xe4] ss:$8 sps:$4 sm:$0xff]   ;;  %v5487_v62 = vld [vmem:[%s7322_s0 + $0xe0] ss:$8 sps:$4 sm:$0xff]  }
  0x9d   : > { %v5488_v63 = vld [vmem:[%s7322_s0 + $0xf4] ss:$8 sps:$4 sm:$0xff]   ;;  %v5490_v0 = vld [vmem:[%s7322_s0 + $0xf0] ss:$8 sps:$4 sm:$0xff]   ;;  %v5491_v1 = vld [vmem:[%s7322_s0 + $0x104] ss:$8 sps:$4 sm:$0xff]  }
  0x9e   : > { %v5493_v2 = vld [vmem:[%s7322_s0 + $0x100] ss:$8 sps:$4 sm:$0xff]   ;;  %v5496_v4 = vld [vmem:[%s7322_s0 + $0x110] ss:$8 sps:$4 sm:$0xff]   ;;  %v5500_v5 = vld [vmem:[%s7322_s0 + $0x124] ss:$8 sps:$4 sm:$0xff]  }
  0x9f   : > { %1627 = vmatpush1.bf16.msra.mxu0 %v5414_v9  ;;  %5122 = vmatpush1.bf16.msra.mxu1 %v5414_v9  ;;  %v5502_v6 = vld [vmem:[%s7322_s0 + $0x120] ss:$8 sps:$4 sm:$0xff]   ;;  %v5503_v7 = vld [vmem:[%s7322_s0 + $0x134] ss:$8 sps:$4 sm:$0xff]   ;;  %v5505_v8 = vld [vmem:[%s7322_s0 + $0x130] ss:$8 sps:$4 sm:$0xff]  }
  0xa0   : > { %1628 = vmatprep.subr.bf16.mxu0 %v5703_v3  ;;  %5107 = vmatprep.subr.bf16.mxu1 %v5703_v3  ;;  %v5506_v9 = vld [vmem:[%s7322_s0 + $0x144] ss:$8 sps:$4 sm:$0xff]   ;;  %v6374_v11 = vld [vmem:[%s7324_s2] ss:$0 sm:$0xff] }
  0xa3   : > { %1629 = vmatpush1.bf16.msra.mxu0 %v5415_v10  ;;  %5123 = vmatpush1.bf16.msra.mxu1 %v5415_v10  ;;  %v5508_v10 = vld [vmem:[%s7322_s0 + $0x140] ss:$8 sps:$4 sm:$0xff]  }
  0xa4   : > { %1630 = vmatprep.subr.bf16.mxu0 %v5703_v3  ;;  %5108 = vmatprep.subr.bf16.mxu1 %v5703_v3 }
  0xa7   : > { %1631 = vmatpush1.bf16.msra.mxu0 %v5416_v12  ;;  %5124 = vmatpush1.bf16.msra.mxu1 %v5416_v12 }
  0xa8   : > { %1632 = vmatprep.subr.bf16.mxu0 %v5703_v3  ;;  %5109 = vmatprep.subr.bf16.mxu1 %v5703_v3 }
  0xab   : > { %1633 = vmatpush2.bf16.msra.mxu0 %v5417_v13  ;;  %5125 = vmatpush2.bf16.msra.mxu1 %v5417_v13 }
  0xac   : > { %1634 = vmatprep.subr.bf16.mxu0 %v5703_v3  ;;  %5110 = vmatprep.subr.bf16.mxu1 %v5703_v3 }
  0xaf   : > { %1635 = vmatpush2.bf16.msra.mxu0 %v5418_v14  ;;  %5126 = vmatpush2.bf16.msra.mxu1 %v5418_v14 }
  0xb0   : > { %1636 = vmatprep.subr.bf16.mxu0 %v5703_v3  ;;  %5111 = vmatprep.subr.bf16.mxu1 %v5703_v3 }
  0xb3   : > { %1637 = vmatpush2.bf16.msra.mxu0 %v5419_v15  ;;  %5127 = vmatpush2.bf16.msra.mxu1 %v5419_v15 }
  0xb4   : > { %1638 = vmatprep.subr.bf16.mxu0 %v5703_v3  ;;  %5112 = vmatprep.subr.bf16.mxu1 %v5703_v3 }
  0xb7   : > { %1639 = vmatpush2.bf16.msra.mxu0 %v5420_v16  ;;  %5128 = vmatpush2.bf16.msra.mxu1 %v5420_v16 }
  0xb8   : > { %1640 = vmatprep.subr.bf16.mxu0 %v5703_v3  ;;  %5113 = vmatprep.subr.bf16.mxu1 %v5703_v3 }
  0xbb   : > { %1641 = vmatpush2.bf16.msra.mxu0 %v5421_v17  ;;  %5129 = vmatpush2.bf16.msra.mxu1 %v5421_v17 }
  0xbc   : > { %1642 = vmatprep.subr.bf16.mxu0 %v5703_v3  ;;  %5114 = vmatprep.subr.bf16.mxu1 %v5703_v3 }
  0xbf   : > { %1643 = vmatpush2.bf16.msra.mxu0 %v5422_v18  ;;  %5130 = vmatpush2.bf16.msra.mxu1 %v5422_v18 }
  0xc0   : > { %1644 = vmatprep.subr.bf16.mxu0 %v5703_v3  ;;  %5115 = vmatprep.subr.bf16.mxu1 %v5703_v3 }
  0xc3   : > { %1645 = vmatpush2.bf16.msra.mxu0 %v5423_v19  ;;  %5131 = vmatpush2.bf16.msra.mxu1 %v5423_v19 }
  0xc4   : > { %1646 = vmatprep.subr.bf16.mxu0 %v5703_v3  ;;  %5116 = vmatprep.subr.bf16.mxu1 %v5703_v3  ;;  %v5494_v3 = vld [vmem:[%s7322_s0 + $0x114] ss:$8 sps:$4 sm:$0xff]  }
  0xc7   : > { %1647 = vmatpush2.bf16.msra.mxu0 %v5424_v20  ;;  %5132 = vmatpush2.bf16.msra.mxu1 %v5424_v20 }
  0xca   : > { %1649 = vmatmul.mubr.bf16.vlgmr.msra.gmra.mxu0 %v5425_v21  ;;  %1817 = vmatmul.mubr.bf16.vlgmr.msra.gmra.mxu1 %v5436_v22 }
  0xcb   : > { %1656 = vmatprep.mubr.bf16.mxu0 %v5428_v23  ;;  %1824 = vmatprep.mubr.bf16.mxu1 %v5442_v24 }
  0xd2   : > { %1657 = vmatmul.mubr.bf16.gmra.mxu0 %v5430_v25  ;;  %1825 = vmatmul.mubr.bf16.gmra.mxu1 %v5445_v26 }
  0xd3   : > { %1664 = vmatprep.mubr.bf16.mxu0 %v5431_v27  ;;  %1832 = vmatprep.mubr.bf16.mxu1 %v5448_v28 }
  0xda   : > { %1665 = vmatmul.mubr.bf16.gmra.mxu0 %v5433_v29  ;;  %1833 = vmatmul.mubr.bf16.gmra.mxu1 %v5451_v30 }
  0xdb   : > { %1672 = vmatprep.mubr.bf16.mxu0 %v5434_v31  ;;  %1840 = vmatprep.mubr.bf16.mxu1 %v5454_v32 }
  0xe2   : > { %1673 = vmatmul.mubr.bf16.gmra.mxu0 %v5439_v33  ;;  %1841 = vmatmul.mubr.bf16.gmra.mxu1 %v5457_v34 }
  0xe3   : > { %1680 = vmatprep.mubr.bf16.mxu0 %v5440_v35  ;;  %1848 = vmatprep.mubr.bf16.mxu1 %v5460_v36 }
  0xea   : > { %1681 = vmatmul.mubr.bf16.gmra.mxu0 %v5444_v37  ;;  %1849 = vmatmul.mubr.bf16.gmra.mxu1 %v5463_v38 }
  0xeb   : > { %1688 = vmatprep.mubr.bf16.mxu0 %v5446_v39  ;;  %1856 = vmatprep.mubr.bf16.mxu1 %v5478_v40 }
  0xf2   : > { %1689 = vmatmul.mubr.bf16.gmra.mxu0 %v5450_v41  ;;  %1857 = vmatmul.mubr.bf16.gmra.mxu1 %v5481_v42 }
  0xf3   : > { %1696 = vmatprep.mubr.bf16.mxu0 %v5452_v43  ;;  %1864 = vmatprep.mubr.bf16.mxu1 %v5497_v44 }
  0xfa   : > { %1697 = vmatmul.mubr.bf16.gmra.mxu0 %v5456_v45  ;;  %1865 = vmatmul.mubr.bf16.gmra.mxu1 %v5499_v46 }
  0xfb   : > { %1704 = vmatprep.mubr.bf16.mxu0 %v5458_v47 }
 0x102   : > { %1705 = vmatmul.mubr.bf16.gmra.mxu0 %v5462_v48 }
 0x103   : > { %1712 = vmatprep.mubr.bf16.mxu0 %v5464_v49 }
 0x10a   : > { %1713 = vmatmul.mubr.bf16.gmra.mxu0 %v5466_v50 }
 0x10b   : > { %1720 = vmatprep.mubr.bf16.mxu0 %v5467_v51 }
 0x112   : > { %1721 = vmatmul.mubr.bf16.gmra.mxu0 %v5469_v52 }
 0x113   : > { %1728 = vmatprep.mubr.bf16.mxu0 %v5470_v53 }
 0x11a   : > { %1729 = vmatmul.mubr.bf16.gmra.mxu0 %v5472_v54 }
 0x11b   : > { %1736 = vmatprep.mubr.bf16.mxu0 %v5473_v55 }
 0x122   : > { %1737 = vmatmul.mubr.bf16.gmra.mxu0 %v5475_v56 }
 0x123   : > { %1744 = vmatprep.mubr.bf16.mxu0 %v5476_v57 }
 0x12a   : > { %1745 = vmatmul.mubr.bf16.gmra.mxu0 %v5480_v58 }
 0x12b   : > { %1752 = vmatprep.mubr.bf16.mxu0 %v5482_v59 }
 0x132   : > { %1753 = vmatmul.mubr.bf16.gmra.mxu0 %v5484_v60 }
 0x133   : > { %1760 = vmatprep.mubr.bf16.mxu0 %v5485_v61 }
 0x13a   : > { %1761 = vmatmul.mubr.bf16.gmra.mxu0 %v5487_v62 }
 0x13b   : > { %1768 = vmatprep.mubr.bf16.mxu0 %v5488_v63 }
 0x142   : > { %1769 = vmatmul.mubr.bf16.gmra.mxu0 %v5490_v0 }
 0x143   : > { %1776 = vmatprep.mubr.bf16.mxu0 %v5491_v1 }
 0x14a   : > { %1777 = vmatmul.mubr.bf16.gmra.mxu0 %v5493_v2 }
 0x14b   : > { %1784 = vmatprep.mubr.bf16.mxu0 %v5494_v3 }
 0x152   : > { %1785 = vmatmul.mubr.bf16.gmra.mxu0 %v5496_v4 }
 0x153   : > { %1792 = vmatprep.mubr.bf16.mxu0 %v5500_v5 }
 0x15a   : > { %1793 = vmatmul.mubr.bf16.gmra.mxu0 %v5502_v6 }
 0x15b   : > { %1800 = vmatprep.mubr.bf16.mxu0 %v5503_v7 }
 0x162   : > { %1801 = vmatmul.mubr.bf16.gmra.mxu0 %v5505_v8 }
 0x163   : > { %1808 = vmatprep.mubr.bf16.mxu0 %v5506_v9 }
 0x16a   : > { %1809 = vmatmul.mubr.bf16.gmra.mxu0 %v5508_v10 }
 0x18a   : > { %v1650_v12 = vpop.f32.mrf.mxu0  ;;  %v1818_v13 = vpop.f32.mrf.mxu1 }
 0x18b   : > { %v1651_v14 = vadd.f32 %v6374_v11, %v1650_v12  ;;  %v1819_v15 = vadd.f32 %v6374_v11, %v1818_v13 }
 0x18c   : > { %v1652_v16 = vpop.f32.mrf.mxu0  ;;  %v1820_v17 = vpop.f32.mrf.mxu1 }
 0x18d   : > { %v1873_v18 = vmax.f32 %v1651_v14, 0.0  ;;  %v1915_v19 = vmax.f32 %v1819_v15, 0.0 }
 0x18e   : > { %v1653_v20 = vpop.f32.mrf.mxu0  ;;  %v1821_v21 = vpop.f32.mrf.mxu1 }
 0x18f   : > { %1930 = vst.msk [vmem:[#allocation2] sm:$0xff] %vm1929_vm0, %v1873_v18  ;;  %v1654_v22 = vadd.f32 %v6374_v11, %v1653_v20  ;;  %1972 = vst.msk [vmem:[#allocation2 + $0x150] sm:$0xff] %vm1929_vm0, %v1915_v19  ;;  %v1822_v23 = vadd.f32 %v6374_v11, %v1821_v21 }
 0x190   : > { %v1655_v24 = vpop.f32.mrf.mxu0  ;;  %v1823_v25 = vpop.f32.mrf.mxu1 }
 0x191   : > { %v1874_v26 = vmax.f32 %v1654_v22, 0.0  ;;  %v1916_v27 = vmax.f32 %v1822_v23, 0.0 }
 0x192   : > { %v1658_v28 = vpop.f32.mrf.mxu0  ;;  %v1826_v29 = vpop.f32.mrf.mxu1 }
 0x193   : > { %1931 = vst.msk [vmem:[#allocation2 + $0x8] sm:$0xff] %vm1929_vm0, %v1874_v26  ;;  %v1659_v30 = vadd.f32 %v6374_v11, %v1658_v28  ;;  %1973 = vst.msk [vmem:[#allocation2 + $0x158] sm:$0xff] %vm1929_vm0, %v1916_v27  ;;  %v1827_v31 = vadd.f32 %v6374_v11, %v1826_v29 }
 0x194   : > { %v1660_v32 = vpop.f32.mrf.mxu0  ;;  %v1828_v33 = vpop.f32.mrf.mxu1 }
 0x195   : > { %v1875_v34 = vmax.f32 %v1659_v30, 0.0  ;;  %v1917_v35 = vmax.f32 %v1827_v31, 0.0 }
 0x196   : > { %v1661_v36 = vpop.f32.mrf.mxu0  ;;  %v1829_v37 = vpop.f32.mrf.mxu1  ;;  %v2018_v42 = vld [vmem:[#allocation2 + $0x150] sm:$0xff] }
 0x197   : > { %1932 = vst.msk [vmem:[#allocation2 + $0x10] sm:$0xff] %vm1929_vm0, %v1875_v34  ;;  %v1662_v38 = vadd.f32 %v6374_v11, %v1661_v36  ;;  %1974 = vst.msk [vmem:[#allocation2 + $0x160] sm:$0xff] %vm1929_vm0, %v1917_v35  ;;  %v1830_v39 = vadd.f32 %v6374_v11, %v1829_v37 }
 0x198   : > { %v1663_v40 = vpop.f32.mrf.mxu0  ;;  %v1831_v41 = vpop.f32.mrf.mxu1 }
 0x199   : > { %v1876_v43 = vmax.f32 %v1662_v38, 0.0  ;;  %v1918_v44 = vmax.f32 %v1830_v39, 0.0 }
 0x19a   : > { %v1666_v45 = vpop.f32.mrf.mxu0  ;;  %v1834_v46 = vpop.f32.mrf.mxu1  ;;  %v6390_v47 = vld [vmem:[#allocation2 + $0x158] sm:$0xff] }
 0x19b   : > { %1933 = vst.msk [vmem:[#allocation2 + $0x18] sm:$0xff] %vm1929_vm0, %v1876_v43  ;;  %v1667_v48 = vadd.f32 %v6374_v11, %v1666_v45  ;;  %1975 = vst.msk [vmem:[#allocation2 + $0x168] sm:$0xff] %vm1929_vm0, %v1918_v44  ;;  %v1835_v49 = vadd.f32 %v6374_v11, %v1834_v46  ;;  %v5189_v50 = vpack.i.bf16 %v6390_v47, %v2018_v42 }
 0x19c   : > { %v1668_v51 = vpop.f32.mrf.mxu0  ;;  %v1836_v52 = vpop.f32.mrf.mxu1 }
 0x19d   : > { %v1877_v53 = vmax.f32 %v1667_v48, 0.0  ;;  %v1919_v54 = vmax.f32 %v1835_v49, 0.0  ;;  %5190 = vrot.lane.b32.xlu1 %v5189_v50, %s5704_s23 }
 0x19e   : > { %v1669_v55 = vpop.f32.mrf.mxu0  ;;  %v1837_v56 = vpop.f32.mrf.mxu1  ;;  %v6398_v57 = vld [vmem:[#allocation2 + $0x160] sm:$0xff] }
 0x19f   : > { %1934 = vst.msk [vmem:[#allocation2 + $0x20] sm:$0xff] %vm1929_vm0, %v1877_v53  ;;  %v1670_v58 = vadd.f32 %v6374_v11, %v1669_v55  ;;  %1976 = vst.msk [vmem:[#allocation2 + $0x170] sm:$0xff] %vm1929_vm0, %v1919_v54  ;;  %v1838_v59 = vadd.f32 %v6374_v11, %v1837_v56  ;;  %v5324_v60 = vpack.i.bf16 %v6398_v57, %v6390_v47 }
 0x1a0   : > { %v1671_v61 = vpop.f32.mrf.mxu0  ;;  %v1839_v62 = vpop.f32.mrf.mxu1 }
 0x1a1   : > { %v1878_v63 = vmax.f32 %v1670_v58, 0.0  ;;  %v1920_v0 = vmax.f32 %v1838_v59, 0.0 }
 0x1a2   : > { %v1674_v1 = vpop.f32.mrf.mxu0  ;;  %v1842_v2 = vpop.f32.mrf.mxu1  ;;  %v6410_v12 = vld [vmem:[#allocation2 + $0x168] sm:$0xff] }
 0x1a3   : > { %1935 = vst.msk [vmem:[#allocation2 + $0x28] sm:$0xff] %vm1929_vm0, %v1878_v63  ;;  %v1675_v3 = vadd.f32 %v6374_v11, %v1674_v1  ;;  %1977 = vst.msk [vmem:[#allocation2 + $0x178] sm:$0xff] %vm1929_vm0, %v1920_v0  ;;  %v1843_v4 = vadd.f32 %v6374_v11, %v1842_v2 }
 0x1a4   : > { %v1676_v5 = vpop.f32.mrf.mxu0  ;;  %v1844_v6 = vpop.f32.mrf.mxu1 }
 0x1a5   : > { %v1879_v7 = vmax.f32 %v1675_v3, 0.0  ;;  %v1921_v8 = vmax.f32 %v1843_v4, 0.0 }
 0x1a6   : > { %v1677_v9 = vpop.f32.mrf.mxu0  ;;  %v1845_v10 = vpop.f32.mrf.mxu1  ;;  %v6412_v13 = vld [vmem:[#allocation2 + $0x170] sm:$0xff] }
 0x1a7   : > { %1936 = vst.msk [vmem:[#allocation2 + $0x30] sm:$0xff] %vm1929_vm0, %v1879_v7  ;;  %v1678_v14 = vadd.f32 %v6374_v11, %v1677_v9  ;;  %1978 = vst.msk [vmem:[#allocation2 + $0x180] sm:$0xff] %vm1929_vm0, %v1921_v8  ;;  %v1846_v15 = vadd.f32 %v6374_v11, %v1845_v10  ;;  %v5344_v16 = vpack.i.bf16 %v6412_v13, %v6410_v12 }
 0x1a8   : > { %v1679_v17 = vpop.f32.mrf.mxu0  ;;  %v1847_v18 = vpop.f32.mrf.mxu1 }
 0x1a9   : > { %v1880_v19 = vmax.f32 %v1678_v14, 0.0  ;;  %v1922_v20 = vmax.f32 %v1846_v15, 0.0 }
 0x1aa   : > { %v1682_v21 = vpop.f32.mrf.mxu0  ;;  %v1850_v22 = vpop.f32.mrf.mxu1 }
 0x1ab   : > { %1937 = vst.msk [vmem:[#allocation2 + $0x38] sm:$0xff] %vm1929_vm0, %v1880_v19  ;;  %v1683_v23 = vadd.f32 %v6374_v11, %v1682_v21  ;;  %1979 = vst.msk [vmem:[#allocation2 + $0x188] sm:$0xff] %vm1929_vm0, %v1922_v20  ;;  %v1851_v24 = vadd.f32 %v6374_v11, %v1850_v22 }
 0x1ac   : > { %v1684_v25 = vpop.f32.mrf.mxu0  ;;  %v1852_v26 = vpop.f32.mrf.mxu1 }
 0x1ad   : > { %v1881_v27 = vmax.f32 %v1683_v23, 0.0  ;;  %v1923_v28 = vmax.f32 %v1851_v24, 0.0 }
 0x1ae   : > { %v1685_v29 = vpop.f32.mrf.mxu0  ;;  %v1853_v30 = vpop.f32.mrf.mxu1 }
 0x1af   : > { %1938 = vst.msk [vmem:[#allocation2 + $0x40] sm:$0xff] %vm1929_vm0, %v1881_v27  ;;  %v1686_v31 = vadd.f32 %v6374_v11, %v1685_v29  ;;  %1980 = vst.msk [vmem:[#allocation2 + $0x190] sm:$0xff] %vm1929_vm0, %v1923_v28  ;;  %v1854_v32 = vadd.f32 %v6374_v11, %v1853_v30 }
 0x1b0   : > { %v1687_v33 = vpop.f32.mrf.mxu0  ;;  %v1855_v34 = vpop.f32.mrf.mxu1 }
 0x1b1   : > { %v1882_v35 = vmax.f32 %v1686_v31, 0.0  ;;  %v1924_v36 = vmax.f32 %v1854_v32, 0.0 }
 0x1b2   : > { %v1690_v37 = vpop.f32.mrf.mxu0  ;;  %v1858_v38 = vpop.f32.mrf.mxu1  ;;  %v2031_v42 = vld [vmem:[#allocation2 + $0x188] sm:$0xff]  ;;  %v1999_v48 = vld [vmem:[#allocation2 + $0x38] sm:$0xff] }
 0x1b3   : > { %1939 = vst.msk [vmem:[#allocation2 + $0x48] sm:$0xff] %vm1929_vm0, %v1882_v35  ;;  %v1691_v39 = vadd.f32 %v6374_v11, %v1690_v37  ;;  %1981 = vst.msk [vmem:[#allocation2 + $0x198] sm:$0xff] %vm1929_vm0, %v1924_v36  ;;  %v1859_v40 = vadd.f32 %v6374_v11, %v1858_v38 }
 0x1b4   : > { %v1692_v41 = vpop.f32.mrf.mxu0  ;;  %v1860_v43 = vpop.f32.mrf.mxu1 }
 0x1b5   : > { %v1883_v44 = vmax.f32 %v1691_v39, 0.0  ;;  %v1925_v45 = vmax.f32 %v1859_v40, 0.0 }
 0x1b6   : > { %v1693_v46 = vpop.f32.mrf.mxu0  ;;  %v6432_v49 = vld [vmem:[#allocation2 + $0x40] sm:$0xff]  ;;  %v6434_v50 = vld [vmem:[#allocation2 + $0x190] sm:$0xff]  ;;  %v1861_v51 = vpop.f32.mrf.mxu1 }
 0x1b7   : > { %1940 = vst.msk [vmem:[#allocation2 + $0x50] sm:$0xff] %vm1929_vm0, %v1883_v44  ;;  %v1694_v52 = vadd.f32 %v6374_v11, %v1693_v46  ;;  %v5194_v53 = vpack.i.bf16 %v6432_v49, %v1999_v48  ;;  %v5199_v54 = vpack.i.bf16 %v6434_v50, %v2031_v42  ;;  %1982 = vst.msk [vmem:[#allocation2 + $0x1a0] sm:$0xff] %vm1929_vm0, %v1925_v45  ;;  %v5509_v44 = vld [vmem:[%s7325_s3 + $0x38] sm:$0xff]  }
 0x1b8   : > { %v1862_v55 = vadd.f32 %v6374_v11, %v1861_v51  ;;  %v1695_v56 = vpop.f32.mrf.mxu0  ;;  %v1863_v58 = vpop.f32.mrf.mxu1  ;;  %5019 = vmatprep.subr.bf16.mxu1 %v5509_v44 }
 0x1b9   : > { %v1884_v59 = vmax.f32 %v1694_v52, 0.0  ;;  %5195 = vrot.lane.b32.xlu0 %v5194_v53, %s5705_s30  ;;  %5200 = vrot.lane.b32.xlu1 %v5199_v54, %s5706_s8  ;;  %v5510_v53 = vld [vmem:[%s7325_s3 + $0x30] sm:$0xff]  }
 0x1ba   : > { %v1926_v61 = vmax.f32 %v1862_v55, 0.0  ;;  %v1698_v62 = vpop.f32.mrf.mxu0  ;;  %v6444_v63 = vld [vmem:[#allocation2 + $0x198] sm:$0xff]  ;;  %v1866_v0 = vpop.f32.mrf.mxu1  ;;  %v6452_v9 = vld [vmem:[#allocation2 + $0x48] sm:$0xff]  ;;  %5020 = vmatpush3.bf16.msra.mxu1 %v5509_v44 }
 0x1bb   : > { %1941 = vst.msk [vmem:[#allocation2 + $0x58] sm:$0xff] %vm1929_vm0, %v1884_v59  ;;  %v1699_v1 = vadd.f32 %v6374_v11, %v1698_v62  ;;  %v1867_v2 = vadd.f32 %v6374_v11, %v1866_v0  ;;  %v5334_v3 = vpack.i.bf16 %v6444_v63, %v6434_v50  ;;  %5021 = vmatprep.subr.bf16.mxu1 %v5510_v53 }
 0x1bc   : > { %1983 = vst.msk [vmem:[#allocation2 + $0x1a8] sm:$0xff] %vm1929_vm0, %v1926_v61  ;;  %v1700_v4 = vpop.f32.mrf.mxu0  ;;  %v1868_v5 = vpop.f32.mrf.mxu1 }
 0x1bd   : > { %v1885_v6 = vmax.f32 %v1699_v1, 0.0  ;;  %v1927_v7 = vmax.f32 %v1867_v2, 0.0  ;;  %v5511_v1 = vld [vmem:[%s7325_s3 + $0x28] sm:$0xff]  }
 0x1be   : > { %v1701_v8 = vpop.f32.mrf.mxu0  ;;  %v6454_v10 = vld [vmem:[#allocation2 + $0x50] sm:$0xff]  ;;  %v1869_v14 = vpop.f32.mrf.mxu1  ;;  %v6465_v25 = vld [vmem:[#allocation2 + $0x1a0] sm:$0xff]  ;;  %5022 = vmatpush3.bf16.msra.mxu1 %v5510_v53 }
 0x1bf   : > { %1942 = vst.msk [vmem:[#allocation2 + $0x60] sm:$0xff] %vm1929_vm0, %v1885_v6  ;;  %v1702_v15 = vadd.f32 %v6374_v11, %v1701_v8  ;;  %v5204_v17 = vpack.i.bf16 %v6454_v10, %v6452_v9  ;;  %1984 = vst.msk [vmem:[#allocation2 + $0x1b0] sm:$0xff] %vm1929_vm0, %v1927_v7  ;;  %v1870_v18 = vadd.f32 %v6374_v11, %v1869_v14  ;;  %5023 = vmatprep.subr.bf16.mxu1 %v5511_v1  ;;  %v5512_v7 = vld [vmem:[%s7325_s3 + $0x20] sm:$0xff]  }
 0x1c0   : > { %v1703_v19 = vpop.f32.mrf.mxu0  ;;  %v1871_v20 = vpop.f32.mrf.mxu1 }
 0x1c1   : > { %v1886_v21 = vmax.f32 %v1702_v15, 0.0  ;;  %5205 = vrot.lane.b32.xlu0 %v5204_v17, %s5705_s30  ;;  %v1928_v22 = vmax.f32 %v1870_v18, 0.0  ;;  %v5513_v15 = vld [vmem:[%s7325_s3 + $0x18] sm:$0xff]  }
 0x1c2   : > { %v1706_v23 = vpop.f32.mrf.mxu0  ;;  %v6463_v24 = vld [vmem:[#allocation2 + $0x58] sm:$0xff]  ;;  %5024 = vmatpush3.bf16.msra.mxu1 %v5511_v1 }
 0x1c3   : > { %v6467_v26 = vld [vmem:[#allocation2 + $0x1a8] sm:$0xff]  ;;  %1943 = vst.msk [vmem:[#allocation2 + $0x68] sm:$0xff] %vm1929_vm0, %v1886_v21  ;;  %v1707_v27 = vadd.f32 %v6374_v11, %v1706_v23  ;;  %1985 = vst.msk [vmem:[#allocation2 + $0x1b8] sm:$0xff] %vm1929_vm0, %v1928_v22  ;;  %v5274_v28 = vpack.i.bf16 %v6463_v24, %v6454_v10  ;;  %5025 = vmatprep.subr.bf16.mxu1 %v5512_v7 }
 0x1c4   : > { %v5354_v29 = vpack.i.bf16 %v6467_v26, %v6465_v25  ;;  %v1708_v30 = vpop.f32.mrf.mxu0 }
 0x1c5   : > { %v1887_v31 = vmax.f32 %v1707_v27, 0.0 }
 0x1c6   : > { %v1709_v32 = vpop.f32.mrf.mxu0  ;;  %v6476_v33 = vld [vmem:[#allocation2 + $0x60] sm:$0xff]  ;;  %5026 = vmatpush3.bf16.msra.mxu1 %v5512_v7 }
 0x1c7   : > { %1944 = vst.msk [vmem:[#allocation2 + $0x70] sm:$0xff] %vm1929_vm0, %v1887_v31  ;;  %v1710_v34 = vadd.f32 %v6374_v11, %v1709_v32  ;;  %v5209_v35 = vpack.i.bf16 %v6476_v33, %v6463_v24  ;;  %5027 = vmatprep.subr.bf16.mxu1 %v5513_v15 }
 0x1c8   : > { %v1711_v36 = vpop.f32.mrf.mxu0 }
 0x1c9   : > { %v1888_v37 = vmax.f32 %v1710_v34, 0.0  ;;  %5210 = vrot.lane.b32.xlu0 %v5209_v35, %s5705_s30  ;;  %v5514_v35 = vld [vmem:[%s7325_s3 + $0x10] sm:$0xff]  }
 0x1ca   : > { %v1714_v38 = vpop.f32.mrf.mxu0  ;;  %5028 = vmatpush3.bf16.msra.mxu1 %v5513_v15  ;;  %v2505_v50 = vld [vmem:[#allocation2 + $0x1b8] sm:$0xff] }
 0x1cb   : > { %1945 = vst.msk [vmem:[#allocation2 + $0x78] sm:$0xff] %vm1929_vm0, %v1888_v37  ;;  %v1715_v39 = vadd.f32 %v6374_v11, %v1714_v38  ;;  %5029 = vmatprep.subr.bf16.mxu1 %v5514_v35 }
 0x1cc   : > { %v1716_v40 = vpop.f32.mrf.mxu0 }
 0x1cd   : > { %v1889_v41 = vmax.f32 %v1715_v39, 0.0  ;;  %v5515_v40 = vld [vmem:[%s7325_s3 + $0x8] sm:$0xff]  }
 0x1ce   : > { %v1717_v42 = vpop.f32.mrf.mxu0  ;;  %v2012_v51 = vld [vmem:[#allocation2 + $0x70] sm:$0xff]  ;;  %5030 = vmatpush3.bf16.msra.mxu1 %v5514_v35 }
 0x1cf   : > { %1946 = vst.msk [vmem:[#allocation2 + $0x80] sm:$0xff] %vm1929_vm0, %v1889_v41  ;;  %v1718_v43 = vadd.f32 %v6374_v11, %v1717_v42  ;;  %5031 = vmatprep.subr.bf16.mxu1 %v5515_v40 }
 0x1d0   : > { %v1719_v45 = vpop.f32.mrf.mxu0 }
 0x1d1   : > { %v1890_v46 = vmax.f32 %v1718_v43, 0.0  ;;  %v5516_v45 = vld [vmem:[%s7325_s3] sm:$0xff]  }
 0x1d2   : > { %v1722_v48 = vpop.f32.mrf.mxu0  ;;  %v6490_v52 = vld [vmem:[#allocation2 + $0x78] sm:$0xff]  ;;  %5032 = vmatpush3.bf16.msra.mxu1 %v5515_v40 }
 0x1d3   : > { %1947 = vst.msk [vmem:[#allocation2 + $0x88] sm:$0xff] %vm1929_vm0, %v1890_v46  ;;  %v1723_v54 = vadd.f32 %v6374_v11, %v1722_v48  ;;  %v5214_v55 = vpack.i.bf16 %v6490_v52, %v2012_v51  ;;  %5033 = vmatprep.subr.bf16.mxu1 %v5516_v45 }
 0x1d4   : > { %v1724_v56 = vpop.f32.mrf.mxu0 }
 0x1d5   : > { %v1891_v58 = vmax.f32 %v1723_v54, 0.0  ;;  %5215 = vrot.lane.b32.xlu1 %v5214_v55, %s5704_s23 }
 0x1d6   : > { %v1725_v59 = vpop.f32.mrf.mxu0  ;;  %v6499_v61 = vld [vmem:[#allocation2 + $0x80] sm:$0xff]  ;;  %5034 = vmatpush3.bf16.msra.mxu1 %v5516_v45 }
 0x1d7   : > { %1948 = vst.msk [vmem:[#allocation2 + $0x90] sm:$0xff] %vm1929_vm0, %v1891_v58  ;;  %v1726_v62 = vadd.f32 %v6374_v11, %v1725_v59  ;;  %v5284_v0 = vpack.i.bf16 %v6499_v61, %v6490_v52 }
 0x1d8   : > { %v1727_v2 = vpop.f32.mrf.mxu0 }
 0x1d9   : > { %v1892_v4 = vmax.f32 %v1726_v62, 0.0  ;;  %v5234_v62 = vpack.i.bf16 %v6410_v12, %v6398_v57 }
 0x1da   : > { %v1730_v5 = vpop.f32.mrf.mxu0  ;;  %v6508_v6 = vld [vmem:[#allocation2 + $0x88] sm:$0xff] }
 0x1db   : > { %1949 = vst.msk [vmem:[#allocation2 + $0x98] sm:$0xff] %vm1929_vm0, %v1892_v4  ;;  %v1731_v8 = vadd.f32 %v6374_v11, %v1730_v5  ;;  %v5219_v14 = vpack.i.bf16 %v6508_v6, %v6499_v61 }
 0x1dc   : > { %v1732_v17 = vpop.f32.mrf.mxu0 }
 0x1dd   : > { %v1893_v18 = vmax.f32 %v1731_v8, 0.0  ;;  %5220 = vrot.lane.b32.xlu1 %v5219_v14, %s5704_s23  ;;  %v5249_v14 = vpack.i.bf16 %v6465_v25, %v6444_v63 }
 0x1de   : > { %v1733_v19 = vpop.f32.mrf.mxu0  ;;  %v6521_v20 = vld [vmem:[#allocation2 + $0x90] sm:$0xff] }
 0x1df   : > { %1950 = vst.msk [vmem:[#allocation2 + $0xa0] sm:$0xff] %vm1929_vm0, %v1893_v18  ;;  %v1734_v21 = vadd.f32 %v6374_v11, %v1733_v19  ;;  %v5294_v22 = vpack.i.bf16 %v6521_v20, %v6508_v6  ;;  %v6566_v18 = vld [vmem:[#allocation2 + $0x178] sm:$0xff] }
 0x1e0   : > { %v1735_v23 = vpop.f32.mrf.mxu0 }
 0x1e1   : > { %v1894_v27 = vmax.f32 %v1734_v21, 0.0 }
 0x1e2   : > { %v1738_v30 = vpop.f32.mrf.mxu0  ;;  %v6527_v31 = vld [vmem:[#allocation2 + $0x98] sm:$0xff] }
 0x1e3   : > { %1951 = vst.msk [vmem:[#allocation2 + $0xa8] sm:$0xff] %vm1929_vm0, %v1894_v27  ;;  %v1739_v32 = vadd.f32 %v6374_v11, %v1738_v30  ;;  %v5224_v34 = vpack.i.bf16 %v6527_v31, %v6521_v20  ;;  %v5244_v30 = vpack.i.bf16 %v6566_v18, %v6412_v13  ;;  %v2492_v20 = vld [vmem:[#allocation2 + $0x180] sm:$0xff] }
 0x1e4   : > { %v1740_v36 = vpop.f32.mrf.mxu0 }
 0x1e5   : > { %v1895_v37 = vmax.f32 %v1739_v32, 0.0  ;;  %5225 = vrot.lane.b32.xlu0 %v5224_v34, %s5704_s23  ;;  %v6579_v32 = vld [vmem:[%s7325_s3 + $0x78] sm:$0xff]   ;;  %v6583_v36 = vld [vmem:[#allocation2 + $0x1b0] sm:$0xff] }
 0x1e6   : > { %v1741_v38 = vpop.f32.mrf.mxu0  ;;  %5047 = vmatprep.subr.bf16.mxu1 %v6579_v32  ;;  %v5364_v12 = vpack.i.bf16 %v2505_v50, %v6583_v36  ;;  %v5522_v50 = vld [vmem:[%s7325_s3 + $0x50] sm:$0xff]  }
 0x1e7   : > { %1952 = vst.msk [vmem:[#allocation2 + $0xb0] sm:$0xff] %vm1929_vm0, %v1895_v37  ;;  %v1742_v39 = vadd.f32 %v6374_v11, %v1741_v38  ;;  %v5259_v38 = vpack.i.bf16 %v6452_v9, %v6432_v49 }
 0x1e8   : > { %v1743_v41 = vpop.f32.mrf.mxu0 }
 0x1e9   : > { %v1896_v42 = vmax.f32 %v1742_v39, 0.0 }
 0x1ea   : > { %v1746_v43 = vpop.f32.mrf.mxu0  ;;  %v2025_v53 = vld [vmem:[#allocation2 + $0xa8] sm:$0xff] }
 0x1eb   : > { %1953 = vst.msk [vmem:[#allocation2 + $0xb8] sm:$0xff] %vm1929_vm0, %v1896_v42  ;;  %v1747_v44 = vadd.f32 %v6374_v11, %v1746_v43  ;;  %v5254_v42 = vpack.i.bf16 %v6583_v36, %v6467_v26 }
 0x1ec   : > { %v1748_v46 = vpop.f32.mrf.mxu0 }
 0x1ed   : > { %v1897_v48 = vmax.f32 %v1747_v44, 0.0 }
 0x1ee   : > { %v1749_v51 = vpop.f32.mrf.mxu0  ;;  %v6547_v54 = vld [vmem:[#allocation2 + $0xb0] sm:$0xff] }
 0x1ef   : > { %1954 = vst.msk [vmem:[#allocation2 + $0xc0] sm:$0xff] %vm1929_vm0, %v1897_v48  ;;  %v1750_v55 = vadd.f32 %v6374_v11, %v1749_v51  ;;  %v5229_v56 = vpack.i.bf16 %v6547_v54, %v2025_v53 }
 0x1f0   : > { %v1751_v58 = vpop.f32.mrf.mxu0 }
 0x1f1   : > { %v1898_v59 = vmax.f32 %v1750_v55, 0.0  ;;  %5230 = vrot.lane.b32.xlu0 %v5229_v56, %s5706_s8 }
 0x1f2   : > { %v1754_v1 = vpop.f32.mrf.mxu0  ;;  %v6555_v2 = vld [vmem:[#allocation2 + $0xb8] sm:$0xff] }
 0x1f3   : > { %1955 = vst.msk [vmem:[#allocation2 + $0xc8] sm:$0xff] %vm1929_vm0, %v1898_v59  ;;  %v1755_v4 = vadd.f32 %v6374_v11, %v1754_v1  ;;  %v5299_v5 = vpack.i.bf16 %v6555_v2, %v6547_v54 }
 0x1f4   : > { %v1756_v7 = vpop.f32.mrf.mxu0 }
 0x1f5   : > { %v1899_v8 = vmax.f32 %v1755_v4, 0.0  ;;  %5235 = vrot.lane.b32.xlu0 %v5234_v62, %s5704_s23 }
 0x1f6   : > { %v1757_v15 = vpop.f32.mrf.mxu0  ;;  %v6564_v17 = vld [vmem:[#allocation2 + $0xc0] sm:$0xff] }
 0x1f7   : > { %1956 = vst.msk [vmem:[#allocation2 + $0xd0] sm:$0xff] %vm1929_vm0, %v1899_v8  ;;  %v1758_v19 = vadd.f32 %v6374_v11, %v1757_v15  ;;  %v5239_v21 = vpack.i.bf16 %v6564_v17, %v6555_v2 }
 0x1f8   : > { %v1759_v23 = vpop.f32.mrf.mxu0 }
 0x1f9   : > { %v1900_v27 = vmax.f32 %v1758_v19, 0.0  ;;  %5240 = vrot.lane.b32.xlu1 %v5239_v21, %s5706_s8  ;;  %5250 = vrot.lane.b32.xlu0 %v5249_v14, %s5706_s8 }
 0x1fa   : > { %v1762_v34 = vpop.f32.mrf.mxu0  ;;  %v6581_v35 = vld [vmem:[#allocation2 + $0xc8] sm:$0xff] }
 0x1fb   : > { %1957 = vst.msk [vmem:[#allocation2 + $0xd8] sm:$0xff] %vm1929_vm0, %v1900_v27  ;;  %v1763_v37 = vadd.f32 %v6374_v11, %v1762_v34  ;;  %v5304_v39 = vpack.i.bf16 %v6581_v35, %v6564_v17  ;;  %v6685_v17 = vld [vmem:[#allocation2 + $0x8] sm:$0xff] }
 0x1fc   : > { %v1764_v40 = vpop.f32.mrf.mxu0 }
 0x1fd   : > { %v1901_v41 = vmax.f32 %v1763_v37, 0.0  ;;  %5260 = vrot.lane.b32.xlu0 %v5259_v38, %s5705_s30  ;;  %5245 = vrot.lane.b32.xlu1 %v5244_v30, %s5704_s23 }
 0x1fe   : > { %v1765_v43 = vpop.f32.mrf.mxu0  ;;  %v6596_v44 = vld [vmem:[#allocation2 + $0xd0] sm:$0xff] }
 0x1ff   : > { %1958 = vst.msk [vmem:[#allocation2 + $0xe0] sm:$0xff] %vm1929_vm0, %v1901_v41  ;;  %v1766_v49 = vadd.f32 %v6374_v11, %v1765_v43  ;;  %v5264_v9 = vpack.i.bf16 %v6596_v44, %v6581_v35 }
 0x200   : > { %v1767_v45 = vpop.f32.mrf.mxu0 }
 0x201   : > { %v1902_v46 = vmax.f32 %v1766_v49, 0.0  ;;  %5265 = vrot.lane.b32.xlu0 %v5264_v9, %s5706_s8  ;;  %5255 = vrot.lane.b32.xlu1 %v5254_v42, %s5706_s8 }
 0x202   : > { %v1770_v48 = vpop.f32.mrf.mxu0  ;;  %v2499_v61 = vld [vmem:[#allocation2 + $0xd8] sm:$0xff] }
 0x203   : > { %1959 = vst.msk [vmem:[#allocation2 + $0xe8] sm:$0xff] %vm1929_vm0, %v1902_v46  ;;  %v1771_v51 = vadd.f32 %v6374_v11, %v1770_v48 }
 0x204   : > { %v1772_v53 = vpop.f32.mrf.mxu0 }
 0x205   : > { %v1903_v55 = vmax.f32 %v1771_v51, 0.0 }
 0x206   : > { %v1773_v56 = vpop.f32.mrf.mxu0 }
 0x207   : > { %1960 = vst.msk [vmem:[#allocation2 + $0xf0] sm:$0xff] %vm1929_vm0, %v1903_v55  ;;  %v1774_v58 = vadd.f32 %v6374_v11, %v1773_v56 }
 0x208   : > { %v1775_v59 = vpop.f32.mrf.mxu0 }
 0x209   : > { %v1904_v62 = vmax.f32 %v1774_v58, 0.0 }
 0x20a   : > { %v1778_v1 = vpop.f32.mrf.mxu0 }
 0x20b   : > { %1961 = vst.msk [vmem:[#allocation2 + $0xf8] sm:$0xff] %vm1929_vm0, %v1904_v62  ;;  %v1779_v4 = vadd.f32 %v6374_v11, %v1778_v1 }
 0x20c   : > { %v1780_v7 = vpop.f32.mrf.mxu0 }
 0x20d   : > { %v1905_v8 = vmax.f32 %v1779_v4, 0.0 }
 0x20e   : > { %v1781_v14 = vpop.f32.mrf.mxu0 }
 0x20f   : > { %1962 = vst.msk [vmem:[#allocation2 + $0x100] sm:$0xff] %vm1929_vm0, %v1905_v8  ;;  %v1782_v15 = vadd.f32 %v6374_v11, %v1781_v14  ;;  %v6678_v47 = vpop.permute.xlu1 %5190 }
 0x210   : > { %v1783_v19 = vpop.f32.mrf.mxu0 }
 0x211   : > { %v1906_v21 = vmax.f32 %v1782_v15, 0.0 }
 0x212   : > { %v1786_v23 = vpop.f32.mrf.mxu0 }
 0x213   : > { %1963 = vst.msk [vmem:[#allocation2 + $0x108] sm:$0xff] %vm1929_vm0, %v1906_v21  ;;  %v1787_v27 = vadd.f32 %v6374_v11, %v1786_v23 }
 0x214   : > { %v1788_v30 = vpop.f32.mrf.mxu0 }
 0x215   : > { %v1907_v34 = vmax.f32 %v1787_v27, 0.0 }
 0x216   : > { %v1789_v37 = vpop.f32.mrf.mxu0 }
 0x217   : > { %1964 = vst.msk [vmem:[#allocation2 + $0x110] sm:$0xff] %vm1929_vm0, %v1907_v34  ;;  %v1790_v38 = vadd.f32 %v6374_v11, %v1789_v37 }
 0x218   : > { %v1791_v40 = vpop.f32.mrf.mxu0 }
 0x219   : > { %v1908_v41 = vmax.f32 %v1790_v38, 0.0 }
 0x21a   : > { %v1794_v42 = vpop.f32.mrf.mxu0 }
 0x21b   : > { %1965 = vst.msk [vmem:[#allocation2 + $0x118] sm:$0xff] %vm1929_vm0, %v1908_v41  ;;  %v1795_v43 = vadd.f32 %v6374_v11, %v1794_v42  ;;  %v2473_v42 = vld [vmem:[#allocation2 + $0x68] sm:$0xff] }
 0x21c   : > { %v1796_v49 = vpop.f32.mrf.mxu0 }
 0x21d   : > { %v1909_v9 = vmax.f32 %v1795_v43, 0.0  ;;  %v2486_v43 = vld [vmem:[#allocation2 + $0xa0] sm:$0xff] }
 0x21e   : > { %v1797_v45 = vpop.f32.mrf.mxu0  ;;  %v5319_v52 = vpack.i.bf16 %v2486_v43, %v6527_v31  ;;  %v5519_v43 = vld [vmem:[%s7325_s3 + $0x68] sm:$0xff]  }
 0x21f   : > { %1966 = vst.msk [vmem:[#allocation2 + $0x120] sm:$0xff] %vm1929_vm0, %v1909_v9  ;;  %v1798_v46 = vadd.f32 %v6374_v11, %v1797_v45 }
 0x220   : > { %v1799_v48 = vpop.f32.mrf.mxu0 }
 0x221   : > { %v1910_v51 = vmax.f32 %v1798_v46, 0.0 }
 0x222   : > { %v1802_v53 = vpop.f32.mrf.mxu0  ;;  %v2005_v62 = vld [vmem:[#allocation2 + $0x118] sm:$0xff] }
 0x223   : > { %1967 = vst.msk [vmem:[#allocation2 + $0x128] sm:$0xff] %vm1929_vm0, %v1910_v51  ;;  %v1803_v55 = vadd.f32 %v6374_v11, %v1802_v53 }
 0x224   : > { %v1804_v56 = vpop.f32.mrf.mxu0 }
 0x225   : > { %v1911_v58 = vmax.f32 %v1803_v55, 0.0 }
 0x226   : > { %v1805_v59 = vpop.f32.mrf.mxu0  ;;  %v2006_v1 = vld [vmem:[#allocation2 + $0x120] sm:$0xff] }
 0x227   : > { %1968 = vst.msk [vmem:[#allocation2 + $0x130] sm:$0xff] %vm1929_vm0, %v1911_v58  ;;  %v1806_v4 = vadd.f32 %v6374_v11, %v1805_v59  ;;  %v5269_v7 = vpack.i.bf16 %v2006_v1, %v2005_v62  ;;  %v6696_v62 = vld [vmem:[#allocation2 + $0x10] sm:$0xff] }
 0x228   : > { %v1807_v8 = vpop.f32.mrf.mxu0 }
 0x229   : > { %v1912_v14 = vmax.f32 %v1806_v4, 0.0  ;;  %5270 = vrot.lane.b32.xlu1 %v5269_v7, %s5705_s30 }
 0x22a   : > { %v1810_v15 = vpop.f32.mrf.mxu0  ;;  %v2007_v30 = vld [vmem:[#allocation2 + $0x128] sm:$0xff] }
 0x22b   : > { %1969 = vst.msk [vmem:[#allocation2 + $0x138] sm:$0xff] %vm1929_vm0, %v1912_v14  ;;  %v1811_v19 = vadd.f32 %v6374_v11, %v1810_v15  ;;  %v5196_v57 = vpop.permute.xlu0 %5195  ;;  %v6682_v13 = vpop.permute.xlu1 %5200 }
 0x22c   : > { %v1812_v21 = vpop.f32.mrf.mxu0  ;;  %v5198_v2 = vunpack.i.h.bf16 %v5196_v57  ;;  %v5197_v25 = vunpack.i.l.bf16 %v5196_v57  ;;  %v5520_v57 = vld [vmem:[%s7325_s3 + $0x60] sm:$0xff]  }
 0x22d   : > { %v1913_v23 = vmax.f32 %v1811_v19, 0.0  ;;  %5275 = vrot.lane.b32.xlu1 %v5274_v28, %s5705_s30 }
 0x22e   : > { %v1813_v27 = vpop.f32.mrf.mxu0  ;;  %v2008_v34 = vld [vmem:[#allocation2 + $0x130] sm:$0xff]  ;;  %v2182_v36 = vsel %vm1929_vm0, %v6685_v17, %v5198_v2 }
 0x22f   : > { %1970 = vst.msk [vmem:[#allocation2 + $0x140] sm:$0xff] %vm1929_vm0, %v1913_v23  ;;  %v1814_v37 = vadd.f32 %v6374_v11, %v1813_v27  ;;  %v5279_v38 = vpack.i.bf16 %v2008_v34, %v2007_v30  ;;  %v5309_v11 = vpack.i.bf16 %v2473_v42, %v6476_v33  ;;  %v5329_v33 = vpack.i.bf16 %v2499_v61, %v6596_v44  ;;  %v6718_v42 = vld [vmem:[#allocation2 + $0x28] sm:$0xff] }
 0x230   : > { %v1815_v40 = vpop.f32.mrf.mxu0 }
 0x231   : > { %v1914_v41 = vmax.f32 %v1814_v37, 0.0  ;;  %5280 = vrot.lane.b32.xlu0 %v5279_v38, %s5705_s30  ;;  %v5518_v38 = vld [vmem:[%s7325_s3 + $0x70] sm:$0xff]  }
 0x232   : > { %v2009_v10 = vld [vmem:[#allocation2 + $0x138] sm:$0xff] }
 0x233   : > { %1971 = vst.msk [vmem:[#allocation2 + $0x148] sm:$0xff] %vm1929_vm0, %v1914_v41  ;;  %v5339_v6 = vpack.i.bf16 %v2009_v10, %v2008_v34  ;;  %v5206_v63 = vpop.permute.xlu0 %5205 }
 0x234   : > { %v5208_v55 = vunpack.i.h.bf16 %v5206_v63  ;;  %v5207_v56 = vunpack.i.l.bf16 %v5206_v63  ;;  %v5523_v63 = vld [vmem:[%s7325_s3 + $0x48] sm:$0xff]  }
 0x235   : > { %5285 = vrot.lane.b32.xlu0 %v5284_v0, %s5704_s23  ;;  %v5314_v0 = vpack.i.bf16 %v2007_v30, %v2006_v1  ;;  %v6698_v1 = vld [vmem:[#allocation2 + $0x18] sm:$0xff] }
 0x236   : > { %v2010_v24 = vld [vmem:[#allocation2 + $0x140] sm:$0xff]  ;;  %v2183_v8 = vsel %vm1929_vm0, %v6696_v62, %v5207_v56  ;;  %v2184_v14 = vsel %vm1929_vm0, %v6698_v1, %v5208_v55 }
 0x237   : > { %v5289_v28 = vpack.i.bf16 %v2010_v24, %v2009_v10 }
 0x239   : > { %5290 = vrot.lane.b32.xlu1 %v5289_v28, %s5705_s30  ;;  %5300 = vrot.lane.b32.xlu0 %v5299_v5, %s5706_s8  ;;  %v1986_v5 = vld [vmem:[#allocation2] sm:$0xff] }
 0x23a   : > { %v2479_v31 = vld [vmem:[#allocation2 + $0x148] sm:$0xff]  ;;  %v2181_v35 = vsel %vm1929_vm0, %v1986_v5, %v5197_v25  ;;  %v6716_v28 = vld [vmem:[#allocation2 + $0x20] sm:$0xff] }
 0x23b   : > { %v1992_v5 = vld [vmem:[#allocation2 + $0xe0] sm:$0xff] }
 0x23d   : > { %5295 = vrot.lane.b32.xlu1 %v5294_v22, %s5704_s23  ;;  %5310 = vrot.lane.b32.xlu0 %v5309_v11, %s5705_s30  ;;  %v5349_v22 = vpack.i.bf16 %v2492_v20, %v6566_v18 }
 0x241   : > { %5305 = vrot.lane.b32.xlu1 %v5304_v39, %s5706_s8  ;;  %5320 = vrot.lane.b32.xlu0 %v5319_v52, %s5704_s23 }
 0x245   : > { %5315 = vrot.lane.b32.xlu1 %v5314_v0, %s5705_s30  ;;  %5330 = vrot.lane.b32.xlu0 %v5329_v33, %s5706_s8 }
 0x249   : > { %5325 = vrot.lane.b32.xlu1 %v5324_v60, %s5704_s23  ;;  %5340 = vrot.lane.b32.xlu0 %v5339_v6, %s5705_s30  ;;  %v5359_v60 = vpack.i.bf16 %v2479_v31, %v2010_v24 }
 0x24d   : > { %5335 = vrot.lane.b32.xlu1 %v5334_v3, %s5706_s8  ;;  %5345 = vrot.lane.b32.xlu0 %v5344_v16, %s5704_s23  ;;  %v5211_v16 = vpop.permute.xlu0 %5210  ;;  %v5216_v3 = vpop.permute.xlu1 %5215 }
 0x24e   : > { %v5218_v26 = vunpack.i.h.bf16 %v5216_v3  ;;  %v5213_v40 = vunpack.i.h.bf16 %v5211_v16  ;;  %v5212_v41 = vunpack.i.l.bf16 %v5211_v16 }
 0x250   : > { %v2195_v9 = vsel %vm2193_vm1, %v2182_v36, %v5218_v26  ;;  %v2185_v52 = vsel %vm1929_vm0, %v6716_v28, %v5212_v41  ;;  %v2186_v61 = vsel %vm1929_vm0, %v6718_v42, %v5213_v40  ;;  %v5193_v26 = vunpack.i.h.bf16 %v6678_v47 }
 0x251   : > { %5350 = vrot.lane.b32.xlu1 %v5349_v22, %s5704_s23  ;;  %5355 = vrot.lane.b32.xlu0 %v5354_v29, %s5706_s8  ;;  %v5217_v29 = vunpack.i.l.bf16 %v5216_v3  ;;  %v5221_v45 = vpop.permute.xlu1 %5220  ;;  %v5202_v36 = vunpack.i.l.bf16 %v6682_v13 }
 0x252   : > { %v5223_v58 = vunpack.i.h.bf16 %v5221_v45  ;;  %v5222_v59 = vunpack.i.l.bf16 %v5221_v45 }
 0x253   : > { %v2194_v49 = vsel %vm2193_vm1, %v2181_v35, %v5217_v29  ;;  %v5192_v29 = vunpack.i.l.bf16 %v6678_v47  ;;  %v5203_v35 = vunpack.i.h.bf16 %v6682_v13 }
 0x254   : > { %v2196_v21 = vsel %vm2193_vm1, %v2183_v8, %v5222_v59  ;;  %v2197_v23 = vsel %vm2193_vm1, %v2184_v14, %v5223_v58  ;;  %v6765_v58 = vld [vmem:[#allocation2 + $0xf0] sm:$0xff]  ;;  %v6767_v59 = vld [vmem:[#allocation2 + $0xf8] sm:$0xff] }
 0x255   : > { %5360 = vrot.lane.b32.xlu1 %v5359_v60, %s5705_s30  ;;  %v5521_v60 = vld [vmem:[%s7325_s3 + $0x58] sm:$0xff]  }
 0x257   : > { %v5226_v54 = vpop.permute.xlu0 %5225 }
 0x258   : > { %v5228_v10 = vunpack.i.h.bf16 %v5226_v54  ;;  %v5227_v24 = vunpack.i.l.bf16 %v5226_v54 }
 0x259   : > { %5365 = vrot.lane.b32.xlu1 %v5364_v12, %s5706_s8  ;;  %v5524_v12 = vld [vmem:[%s7325_s3 + $0x40] sm:$0xff]  }
 0x25a   : > { %v2199_v6 = vsel %vm2193_vm1, %v2186_v61, %v5228_v10 }
 0x263   : > { %v5231_v18 = vpop.permute.xlu0 %5230 }
 0x264   : > { %v5233_v39 = vunpack.i.h.bf16 %v5231_v18  ;;  %v5232_v44 = vunpack.i.l.bf16 %v5231_v18  ;;  %v6752_v18 = vld [vmem:[#allocation2 + $0xe8] sm:$0xff] }
 0x266   : > { %v2207_v46 = vsel %vm2206_vm2, %v2194_v49, %v5232_v44  ;;  %v2208_v48 = vsel %vm2206_vm2, %v2195_v9, %v5233_v39 }
 0x267   : > { %v6694_v51 = vpop.permute.xlu0 %5235  ;;  %v2235_v53 = vpack.c.bf16 %v2208_v48, %v2207_v46 }
 0x268   : > { %v5238_v13 = vunpack.i.h.bf16 %v6694_v51  ;;  %v5237_v56 = vunpack.i.l.bf16 %v6694_v51 }
 0x269   : > { %5035 = vmatprep.mubr.bf16.mxu1 %v2235_v53 }
 0x26b   : > { %v5241_v4 = vpop.permute.xlu1 %5240  ;;  %v6700_v7 = vpop.permute.xlu0 %5250 }
 0x26c   : > { %v5243_v15 = vunpack.i.h.bf16 %v5241_v4  ;;  %v5242_v19 = vunpack.i.l.bf16 %v5241_v4  ;;  %v5253_v4 = vunpack.i.h.bf16 %v6700_v7  ;;  %v5252_v8 = vunpack.i.l.bf16 %v6700_v7 }
 0x26e   : > { %v2209_v27 = vsel %vm2206_vm2, %v2196_v21, %v5242_v19  ;;  %v2210_v30 = vsel %vm2206_vm2, %v2197_v23, %v5243_v15 }
 0x26f   : > { %v2236_v34 = vpack.c.bf16 %v2210_v30, %v2209_v27  ;;  %v6710_v37 = vpop.permute.xlu0 %5260  ;;  %v6746_v16 = vpop.permute.xlu1 %5245 }
 0x270   : > { %v5262_v7 = vunpack.i.l.bf16 %v6710_v37  ;;  %v5247_v61 = vunpack.i.l.bf16 %v6746_v16 }
 0x271   : > { %5036 = vmatmul.mubr.bf16.vlgmr.msra.gmra.mxu1 %v2236_v34 }
 0x272   : > { %5048 = vmatpush3.bf16.msra.mxu1 %v6579_v32  ;;  %v2198_v32 = vsel %vm2193_vm1, %v2185_v52, %v5227_v24  ;;  %v5248_v52 = vunpack.i.h.bf16 %v6746_v16 }
 0x273   : > { %v5266_v11 = vpop.permute.xlu0 %5265  ;;  %5049 = vmatprep.subr.bf16.mxu1 %v5518_v38  ;;  %v6748_v3 = vpop.permute.xlu1 %5255 }
 0x274   : > { %v5268_v0 = vunpack.i.h.bf16 %v5266_v11  ;;  %v5267_v33 = vunpack.i.l.bf16 %v5266_v11 }
 0x276   : > { %v2211_v20 = vsel %vm2206_vm2, %v2198_v32, %v5267_v33  ;;  %v2212_v22 = vsel %vm2206_vm2, %v2199_v6, %v5268_v0  ;;  %5050 = vmatpush3.bf16.msra.mxu1 %v5518_v38  ;;  %v5263_v38 = vunpack.i.h.bf16 %v6710_v37  ;;  %v6783_v0 = vld [vmem:[#allocation2 + $0x100] sm:$0xff]  ;;  %v6785_v33 = vld [vmem:[#allocation2 + $0x108] sm:$0xff]  ;;  %v2650_v37 = vsel %vm1929_vm0, %v6685_v17, %v5262_v7 }
 0x277   : > { %v2237_v31 = vpack.c.bf16 %v2212_v22, %v2211_v20  ;;  %5051 = vmatprep.subr.bf16.mxu1 %v5519_v43 }
 0x278   : > { %v2651_v20 = vsel %vm1929_vm0, %v6696_v62, %v5263_v38 }
 0x279   : > { %5039 = vmatprep.mubr.bf16.mxu1 %v2237_v31 }
 0x27a   : > { %5052 = vmatpush3.bf16.msra.mxu1 %v5519_v43 }
 0x27b   : > { %5053 = vmatprep.subr.bf16.mxu1 %v5520_v57 }
 0x27e   : > { %5054 = vmatpush3.bf16.msra.mxu1 %v5520_v57  ;;  %v5258_v57 = vunpack.i.h.bf16 %v6748_v3 }
 0x27f   : > { %5055 = vmatprep.subr.bf16.mxu1 %v5521_v60 }
 0x282   : > { %5056 = vmatpush3.bf16.msra.mxu1 %v5521_v60  ;;  %v5257_v60 = vunpack.i.l.bf16 %v6748_v3 }
 0x283   : > { %5057 = vmatprep.subr.bf16.mxu1 %v5522_v50 }
 0x286   : > { %5058 = vmatpush3.bf16.msra.mxu1 %v5522_v50 }
 0x287   : > { %5059 = vmatprep.subr.bf16.mxu1 %v5523_v63 }
 0x28a   : > { %5060 = vmatpush3.bf16.msra.mxu1 %v5523_v63 }
 0x28b   : > { %5061 = vmatprep.subr.bf16.mxu1 %v5524_v12 }
 0x28e   : > { %5062 = vmatpush3.bf16.msra.mxu1 %v5524_v12 }
 0x29b   : > { %v5271_v54 = vpop.permute.xlu1 %5270 }
 0x29c   : > { %v5273_v2 = vunpack.i.h.bf16 %v5271_v54  ;;  %v5272_v25 = vunpack.i.l.bf16 %v5271_v54 }
 0x29e   : > { %v2188_v39 = vsel %vm1929_vm0, %v6752_v18, %v5273_v2  ;;  %v2187_v44 = vsel %vm1929_vm0, %v1992_v5, %v5272_v25 }
 0x29f   : > { %v2200_v49 = vsel %vm2193_vm1, %v2187_v44, %v5192_v29  ;;  %v2201_v9 = vsel %vm2193_vm1, %v2188_v39, %v5193_v26  ;;  %v5276_v19 = vpop.permute.xlu1 %5275 }
 0x2a0   : > { %v2213_v45 = vsel %vm2206_vm2, %v2200_v49, %v5202_v36  ;;  %v2214_v47 = vsel %vm2206_vm2, %v2201_v9, %v5203_v35  ;;  %v5278_v29 = vunpack.i.h.bf16 %v5276_v19  ;;  %v5277_v3 = vunpack.i.l.bf16 %v5276_v19 }
 0x2a1   : > { %v2238_v46 = vpack.c.bf16 %v2214_v47, %v2213_v45 }
 0x2a3   : > { %v5281_v48 = vpop.permute.xlu0 %5280  ;;  %5040 = vmatmul.mubr.bf16.gmra.mxu1 %v2238_v46 }
 0x2a4   : > { %v5283_v53 = vunpack.i.h.bf16 %v5281_v48  ;;  %v5282_v55 = vunpack.i.l.bf16 %v5281_v48 }
 0x2a6   : > { %v2190_v14 = vsel %vm1929_vm0, %v6767_v59, %v5283_v53  ;;  %v2189_v15 = vsel %vm1929_vm0, %v6765_v58, %v5282_v55  ;;  %v2652_v55 = vsel %vm1929_vm0, %v6698_v1, %v5277_v3 }
 0x2a7   : > { %v5286_v21 = vpop.permute.xlu0 %5285  ;;  %v2202_v23 = vsel %vm2193_vm1, %v2189_v15, %v5237_v56  ;;  %v2203_v51 = vsel %vm2193_vm1, %v2190_v14, %v5238_v13  ;;  %v2653_v13 = vsel %vm1929_vm0, %v6716_v28, %v5278_v29  ;;  %v2460_v56 = vld [vmem:[#allocation2 + $0x30] sm:$0xff] }
 0x2a8   : > { %v2215_v27 = vsel %vm2206_vm2, %v2202_v23, %v5252_v8  ;;  %v2216_v30 = vsel %vm2206_vm2, %v2203_v51, %v5253_v4  ;;  %v5288_v10 = vunpack.i.h.bf16 %v5286_v21  ;;  %v5287_v24 = vunpack.i.l.bf16 %v5286_v21 }
 0x2a9   : > { %v2239_v34 = vpack.c.bf16 %v2216_v30, %v2215_v27 }
 0x2aa   : > { %v2662_v17 = vsel %vm2193_vm1, %v2650_v37, %v5287_v24  ;;  %v2663_v62 = vsel %vm2193_vm1, %v2651_v20, %v5288_v10 }
 0x2ab   : > { %v5291_v40 = vpop.permute.xlu1 %5290  ;;  %v5301_v41 = vpop.permute.xlu0 %5300  ;;  %5043 = vmatprep.mubr.bf16.mxu1 %v2239_v34 }
 0x2ac   : > { %v5293_v11 = vunpack.i.h.bf16 %v5291_v40  ;;  %v5292_v43 = vunpack.i.l.bf16 %v5291_v40  ;;  %v5303_v32 = vunpack.i.h.bf16 %v5301_v41  ;;  %v5302_v6 = vunpack.i.l.bf16 %v5301_v41 }
 0x2ae   : > { %v2192_v22 = vsel %vm1929_vm0, %v6785_v33, %v5293_v11  ;;  %v2191_v31 = vsel %vm1929_vm0, %v6783_v0, %v5292_v43  ;;  %v2674_v25 = vsel %vm2206_vm2, %v2662_v17, %v5302_v6  ;;  %v2675_v26 = vsel %vm2206_vm2, %v2663_v62, %v5303_v32 }
 0x2af   : > { %v5296_v50 = vpop.permute.xlu1 %5295  ;;  %v5311_v63 = vpop.permute.xlu0 %5310  ;;  %v2204_v12 = vsel %vm2193_vm1, %v2191_v31, %v5247_v61  ;;  %v2205_v16 = vsel %vm2193_vm1, %v2192_v22, %v5248_v52  ;;  %v2703_v46 = vpack.c.bf16 %v2675_v26, %v2674_v25 }
 0x2b0   : > { %v2217_v54 = vsel %vm2206_vm2, %v2204_v12, %v5257_v60  ;;  %v2218_v2 = vsel %vm2206_vm2, %v2205_v16, %v5258_v57  ;;  %v5298_v5 = vunpack.i.h.bf16 %v5296_v50  ;;  %v5297_v35 = vunpack.i.l.bf16 %v5296_v50 }
 0x2b1   : > { %v5313_v36 = vunpack.i.h.bf16 %v5311_v63  ;;  %v5312_v39 = vunpack.i.l.bf16 %v5311_v63  ;;  %v2240_v9 = vpack.c.bf16 %v2218_v2, %v2217_v54 }
 0x2b2   : > { %v2664_v4 = vsel %vm2193_vm1, %v2652_v55, %v5297_v35  ;;  %v2665_v8 = vsel %vm2193_vm1, %v2653_v13, %v5298_v5 }
 0x2b3   : > { %v5306_v44 = vpop.permute.xlu1 %5305  ;;  %v5321_v49 = vpop.permute.xlu0 %5320  ;;  %5044 = vmatmul.mubr.bf16.gmra.mxu1 %v2240_v9  ;;  %v2654_v14 = vsel %vm1929_vm0, %v6718_v42, %v5312_v39  ;;  %v2655_v15 = vsel %vm1929_vm0, %v2460_v56, %v5313_v36 }
 0x2b4   : > { %v5308_v45 = vunpack.i.h.bf16 %v5306_v44  ;;  %v5307_v47 = vunpack.i.l.bf16 %v5306_v44  ;;  %v5323_v48 = vunpack.i.h.bf16 %v5321_v49  ;;  %v5322_v53 = vunpack.i.l.bf16 %v5321_v49  ;;  %5063 = vmatprep.mubr.bf16.mxu1 %v2703_v46  ;;  %v2466_v49 = vld [vmem:[#allocation2 + $0x110] sm:$0xff] }
 0x2b6   : > { %v2676_v23 = vsel %vm2206_vm2, %v2664_v4, %v5307_v47  ;;  %v2677_v1 = vsel %vm2206_vm2, %v2665_v8, %v5308_v45  ;;  %v2666_v28 = vsel %vm2193_vm1, %v2654_v14, %v5322_v53  ;;  %v2667_v30 = vsel %vm2193_vm1, %v2655_v15, %v5323_v48 }
 0x2b7   : > { %v5316_v19 = vpop.permute.xlu1 %5315  ;;  %v5331_v21 = vpop.permute.xlu0 %5330  ;;  %v2704_v7 = vpack.c.bf16 %v2677_v1, %v2676_v23 }
 0x2b8   : > { %v5333_v51 = vunpack.i.h.bf16 %v5331_v21  ;;  %v5332_v27 = vunpack.i.l.bf16 %v5331_v21  ;;  %v5318_v42 = vunpack.i.h.bf16 %v5316_v19  ;;  %v5317_v40 = vunpack.i.l.bf16 %v5316_v19 }
 0x2ba   : > { %v2678_v34 = vsel %vm2206_vm2, %v2666_v28, %v5332_v27  ;;  %v2679_v38 = vsel %vm2206_vm2, %v2667_v30, %v5333_v51  ;;  %v2657_v52 = vsel %vm1929_vm0, %v6765_v58, %v5318_v42  ;;  %v2656_v61 = vsel %vm1929_vm0, %v6752_v18, %v5317_v40 }
 0x2bb   : > { %v5326_v41 = vpop.permute.xlu1 %5325  ;;  %v5341_v10 = vpop.permute.xlu0 %5340  ;;  %v2705_v24 = vpack.c.bf16 %v2679_v38, %v2678_v34  ;;  %5064 = vmatmul.mubr.bf16.vlgmr.msra.gmra.mxu1 %v2704_v7  ;;  %v5707_v38 = vmov 0.0  }
 0x2bc   : > { %v5328_v11 = vunpack.i.h.bf16 %v5326_v41  ;;  %v5327_v43 = vunpack.i.l.bf16 %v5326_v41  ;;  %v5343_v37 = vunpack.i.h.bf16 %v5341_v10  ;;  %v5342_v20 = vunpack.i.l.bf16 %v5341_v10  ;;  %2968 = vst.msk [vmem:[#allocation3 + $0xe] sm:$0x3] %vm2966_vm3, %v5707_v38  ;;  %2969 = vst.msk [vmem:[#allocation3 + $0x16] sm:$0x3] %vm2966_vm3, %v5707_v38 }
 0x2bd   : > { %5067 = vmatprep.mubr.bf16.mxu1 %v2705_v24  ;;  %2967 = vst.msk [vmem:[#allocation3 + $0x6] sm:$0x3] %vm2966_vm3, %v5707_v38  ;;  %2970 = vst.msk [vmem:[#allocation3 + $0x1e] sm:$0x3] %vm2966_vm3, %v5707_v38 }
 0x2be   : > { %v2668_v57 = vsel %vm2193_vm1, %v2656_v61, %v5327_v43  ;;  %v2669_v60 = vsel %vm2193_vm1, %v2657_v52, %v5328_v11  ;;  %v2659_v18 = vsel %vm1929_vm0, %v6783_v0, %v5343_v37  ;;  %v2658_v54 = vsel %vm1929_vm0, %v6767_v59, %v5342_v20  ;;  %2971 = vst.msk [vmem:[#allocation3 + $0x26] sm:$0x3] %vm2966_vm3, %v5707_v38 }
 0x2bf   : > { %v5336_v32 = vpop.permute.xlu1 %5335  ;;  %v5346_v6 = vpop.permute.xlu0 %5345  ;;  %2972 = vst.msk [vmem:[#allocation3 + $0x2e] sm:$0x3] %vm2966_vm3, %v5707_v38  ;;  %2973 = vst.msk [vmem:[#allocation3 + $0x36] sm:$0x3] %vm2966_vm3, %v5707_v38 }
 0x2c0   : > { %v5338_v22 = vunpack.i.h.bf16 %v5336_v32  ;;  %v5337_v31 = vunpack.i.l.bf16 %v5336_v32  ;;  %v5348_v50 = vunpack.i.h.bf16 %v5346_v6  ;;  %v5347_v63 = vunpack.i.l.bf16 %v5346_v6  ;;  %2974 = vst.msk [vmem:[#allocation3 + $0x3e] sm:$0x3] %vm2966_vm3, %v5707_v38  ;;  %2975 = vst.msk [vmem:[#allocation3 + $0x46] sm:$0x3] %vm2966_vm3, %v5707_v38 }
 0x2c1   : > { %2976 = vst.msk [vmem:[#allocation3 + $0x4e] sm:$0x3] %vm2966_vm3, %v5707_v38  ;;  %2977 = vst.msk [vmem:[#allocation3 + $0x56] sm:$0x3] %vm2966_vm3, %v5707_v38 }
 0x2c2   : > { %v2680_v12 = vsel %vm2206_vm2, %v2668_v57, %v5337_v31  ;;  %v2681_v16 = vsel %vm2206_vm2, %v2669_v60, %v5338_v22  ;;  %v2670_v26 = vsel %vm2193_vm1, %v2658_v54, %v5347_v63  ;;  %v2671_v29 = vsel %vm2193_vm1, %v2659_v18, %v5348_v50  ;;  %2978 = vst.msk [vmem:[#allocation3 + $0x5e] sm:$0x3] %vm2966_vm3, %v5707_v38 }
 0x2c3   : > { %v5351_v58 = vpop.permute.xlu1 %5350  ;;  %v5356_v17 = vpop.permute.xlu0 %5355  ;;  %v2706_v62 = vpack.c.bf16 %v2681_v16, %v2680_v12  ;;  %3602 = vst.msk [vmem:[#allocation6] sm:$0x3] %vm3601_vm4, %v5707_v38  ;;  %v5552_v38 = vld [vmem:[%s7327_s5 + $0xa0] ss:$8 sps:$4 sm:$0xff]  }
 0x2c4   : > { %v5358_v2 = vunpack.i.h.bf16 %v5356_v17  ;;  %v5357_v25 = vunpack.i.l.bf16 %v5356_v17  ;;  %v5353_v9 = vunpack.i.h.bf16 %v5351_v58  ;;  %v5352_v45 = vunpack.i.l.bf16 %v5351_v58 }
 0x2c5   : > { %5068 = vmatmul.mubr.bf16.gmra.mxu1 %v2706_v62 }
 0x2c6   : > { %v2682_v3 = vsel %vm2206_vm2, %v2670_v26, %v5357_v25  ;;  %v2683_v5 = vsel %vm2206_vm2, %v2671_v29, %v5358_v2 }
 0x2c7   : > { %v5361_v35 = vpop.permute.xlu1 %5360  ;;  %v2707_v36 = vpack.c.bf16 %v2683_v5, %v2682_v3  ;;  %v5525_v3 = vld [vmem:[%s7327_s5 + $0x70] ss:$8 sps:$4 sm:$0xff]   ;;  %v5527_v5 = vld [vmem:[%s7327_s5 + $0x74] ss:$8 sps:$4 sm:$0xff]  }
 0x2c8   : > { %v5363_v39 = vunpack.i.h.bf16 %v5361_v35  ;;  %v5362_v44 = vunpack.i.l.bf16 %v5361_v35  ;;  %3209 = vmatprep.subr.bf16.mxu1 %v5527_v5 }
 0x2c9   : > { %5071 = vmatprep.mubr.bf16.mxu1 %v2707_v36  ;;  %v5530_v36 = vld [vmem:[%s7327_s5 + $0x64] ss:$8 sps:$4 sm:$0xff]   ;;  %3210 = vmatpush1.bf16.msra.mxu1 %v5525_v3 }
 0x2ca   : > { %v2661_v0 = vsel %vm1929_vm0, %v2466_v49, %v5363_v39  ;;  %v2660_v59 = vsel %vm1929_vm0, %v6785_v33, %v5362_v44  ;;  %v5528_v39 = vld [vmem:[%s7327_s5 + $0x60] ss:$8 sps:$4 sm:$0xff]   ;;  %3211 = vmatprep.subr.bf16.mxu1 %v5530_v36  ;;  %v5533_v44 = vld [vmem:[%s7327_s5 + $0x54] ss:$8 sps:$4 sm:$0xff]   ;;  %v5560_v3 = vld [vmem:[%s7327_s5 + $0x84] ss:$8 sps:$4 sm:$0xff]  }
 0x2cb   : > { %v5366_v47 = vpop.permute.xlu1 %5365  ;;  %v2672_v53 = vsel %vm2193_vm1, %v2660_v59, %v5352_v45  ;;  %v2673_v55 = vsel %vm2193_vm1, %v2661_v0, %v5353_v9  ;;  %v5531_v0 = vld [vmem:[%s7327_s5 + $0x50] ss:$8 sps:$4 sm:$0xff]   ;;  %v5536_v59 = vld [vmem:[%s7327_s5 + $0x44] ss:$8 sps:$4 sm:$0xff]   ;;  %v5534_v9 = vld [vmem:[%s7327_s5 + $0x40] ss:$8 sps:$4 sm:$0xff]  }
 0x2cc   : > { %v5368_v46 = vunpack.i.h.bf16 %v5366_v47  ;;  %v5367_v48 = vunpack.i.l.bf16 %v5366_v47  ;;  %v5539_v45 = vld [vmem:[%s7327_s5 + $0x34] ss:$8 sps:$4 sm:$0xff]   ;;  %v5537_v47 = vld [vmem:[%s7327_s5 + $0x30] ss:$8 sps:$4 sm:$0xff]  }
 0x2cd   : > { %3212 = vmatpush1.bf16.msra.mxu1 %v5528_v39 }
 0x2ce   : > { %v2684_v13 = vsel %vm2206_vm2, %v2672_v53, %v5367_v48  ;;  %v2685_v56 = vsel %vm2206_vm2, %v2673_v55, %v5368_v46  ;;  %3213 = vmatprep.subr.bf16.mxu1 %v5533_v44  ;;  %v5542_v46 = vld [vmem:[%s7327_s5 + $0x24] ss:$8 sps:$4 sm:$0xff]   ;;  %v5540_v48 = vld [vmem:[%s7327_s5 + $0x20] ss:$8 sps:$4 sm:$0xff]   ;;  %v5545_v53 = vld [vmem:[%s7327_s5 + $0x14] ss:$8 sps:$4 sm:$0xff]  }
 0x2cf   : > { %v2708_v4 = vpack.c.bf16 %v2685_v56, %v2684_v13  ;;  %v5543_v55 = vld [vmem:[%s7327_s5 + $0x10] ss:$8 sps:$4 sm:$0xff]   ;;  %v5548_v13 = vld [vmem:[%s7327_s5 + $0x4] ss:$8 sps:$4 sm:$0xff]   ;;  %v5546_v56 = vld [vmem:[%s7327_s5] ss:$8 sps:$4 sm:$0xff]  }
 0x2d1   : > { %5072 = vmatmul.mubr.bf16.gmra.mxu1 %v2708_v4  ;;  %v5551_v4 = vld [vmem:[%s7327_s5 + $0xb4] ss:$8 sps:$4 sm:$0xff]  }
 0x2d2   : > { %3214 = vmatpush1.bf16.msra.mxu1 %v5531_v0 }
 0x2d3   : > { %3215 = vmatprep.subr.bf16.mxu1 %v5536_v59 }
 0x2d6   : > { %3216 = vmatpush1.bf16.msra.mxu1 %v5534_v9 }
 0x2d7   : > { %3217 = vmatprep.subr.bf16.mxu1 %v5539_v45 }
 0x2da   : > { %3218 = vmatpush1.bf16.msra.mxu1 %v5537_v47 }
 0x2db   : > { %3219 = vmatprep.subr.bf16.mxu1 %v5542_v46 }
 0x2de   : > { %3220 = vmatpush1.bf16.msra.mxu1 %v5540_v48 }
 0x2df   : > { %3221 = vmatprep.subr.bf16.mxu1 %v5545_v53 }
 0x2e2   : > { %3222 = vmatpush1.bf16.msra.mxu1 %v5543_v55 }
 0x2e3   : > { %3223 = vmatprep.subr.bf16.mxu1 %v5548_v13 }
 0x2e6   : > { %3224 = vmatpush1.bf16.msra.mxu1 %v5546_v56 }
 0x2e7   : > { %3233 = vmatprep.subr.bf16.mxu1 %v5551_v4 }
 0x331   : > { %v6843_v8 = vpop.f32.mrf.mxu1 }
 0x332   : > { %v2396_v14 = vrot.slane %v6843_v8, 1 }
 0x333   : > { %v6846_v33 = vpop.f32.mrf.mxu1 }
 0x334   : > { %2410 = vrot.lane.b32.xlu1 %v2396_v14, %s5704_s23  ;;  %v2394_v2 = vrot.slane %v6846_v33, 1  ;;  %v5549_v14 = vld [vmem:[%s7327_s5 + $0xb0] ss:$8 sps:$4 sm:$0xff]  }
 0x335   : > { %v6849_v15 = vpop.f32.mrf.mxu1  ;;  %3234 = vmatpush2.bf16.msra.mxu1 %v5549_v14 }
 0x336   : > { %v2397_v32 = vrot.slane %v6849_v15, 1 }
 0x337   : > { %v6851_v19 = vpop.f32.mrf.mxu1 }
 0x338   : > { %v2395_v21 = vrot.slane %v6851_v19, 1 }
 0x33a   : > { %2408 = vrot.lane.b32.xlu0 %v2395_v21, %s5704_s23  ;;  %v5554_v21 = vld [vmem:[%s7327_s5 + $0xa4] ss:$8 sps:$4 sm:$0xff]  }
 0x33b   : > { %3235 = vmatprep.subr.bf16.mxu1 %v5554_v21 }
 0x33c   : > { %3236 = vmatpush2.bf16.msra.mxu1 %v5552_v38 }
 0x363   : > { %v6855_v23 = vpop.f32.mrf.mxu1 }
 0x364   : > { %v2400_v35 = vrot.slane %v6855_v23, 1 }
 0x365   : > { %v6857_v1 = vpop.f32.mrf.mxu1 }
 0x366   : > { %v2398_v24 = vrot.slane %v6857_v1, 1 }
 0x367   : > { %v6859_v51 = vpop.f32.mrf.mxu1 }
 0x368   : > { %v2401_v57 = vrot.slane %v6859_v51, 1 }
 0x369   : > { %v6861_v27 = vpop.f32.mrf.mxu1 }
 0x36a   : > { %v2399_v26 = vrot.slane %v6861_v27, 1 }
 0x373   : > { %v6863_v28 = vpop.f32.mrf.mxu1 }
 0x374   : > { %v2404_v58 = vrot.slane %v6863_v28, 1 }
 0x375   : > { %v6865_v30 = vpop.f32.mrf.mxu1 }
 0x376   : > { %v2402_v20 = vrot.slane %v6865_v30, 1 }
 0x377   : > { %v6867_v34 = vpop.f32.mrf.mxu1 }
 0x379   : > { %v6869_v7 = vpop.f32.mrf.mxu1 }
 0x37a   : > { %v2403_v17 = vrot.slane %v6869_v7, 1 }
 0x37b   : > { %v6871_v42 = vpop.f32.mrf.mxu1 }
 0x37c   : > { %v2864_v40 = vrot.slane %v6871_v42, 1 }
 0x37d   : > { %v6874_v41 = vpop.f32.mrf.mxu1 }
 0x37e   : > { %2878 = vrot.lane.b32.xlu1 %v2864_v40, %s5704_s23  ;;  %v2862_v25 = vrot.slane %v6874_v41, 1  ;;  %v5557_v40 = vld [vmem:[%s7327_s5 + $0x94] ss:$8 sps:$4 sm:$0xff]  }
 0x37f   : > { %v6877_v10 = vpop.f32.mrf.mxu1  ;;  %3237 = vmatprep.subr.bf16.mxu1 %v5557_v40 }
 0x380   : > { %v2865_v22 = vrot.slane %v6877_v10, 1 }
 0x381   : > { %v6880_v11 = vpop.f32.mrf.mxu1 }
 0x382   : > { %v2863_v43 = vrot.slane %v6880_v11, 1  ;;  %2414 = vrot.lane.b32.xlu1 %v2398_v24, %s5704_s23  ;;  %v5555_v24 = vld [vmem:[%s7327_s5 + $0x90] ss:$8 sps:$4 sm:$0xff]  }
 0x383   : > { %3238 = vmatpush2.bf16.msra.mxu1 %v5555_v24 }
 0x384   : > { %2876 = vrot.lane.b32.xlu0 %v2863_v43, %s5704_s23  ;;  %3239 = vmatprep.subr.bf16.mxu1 %v5560_v3 }
 0x385   : > { %v6884_v52 = vpop.f32.mrf.mxu1 }
 0x386   : > { %v2868_v49 = vrot.slane %v6884_v52, 1 }
 0x387   : > { %v6887_v61 = vpop.f32.mrf.mxu1 }
 0x388   : > { %v2866_v6 = vrot.slane %v6887_v61, 1  ;;  %2412 = vrot.lane.b32.xlu0 %v2397_v32, %s5704_s23 }
 0x389   : > { %v6893_v37 = vpop.f32.mrf.mxu1 }
 0x38a   : > { %2882 = vrot.lane.b32.xlu1 %v2866_v6, %s5704_s23  ;;  %v2869_v63 = vrot.slane %v6893_v37, 1 }
 0x38b   : > { %v6899_v31 = vpop.f32.mrf.mxu1 }
 0x38c   : > { %2880 = vrot.lane.b32.xlu0 %v2865_v22, %s5704_s23  ;;  %v2867_v29 = vrot.slane %v6899_v31, 1  ;;  %v7006_v22 = vld [vmem:[%s7326_s4] ss:$0 sm:$0xff] }
 0x38e   : > { %2422 = vrot.lane.b32.xlu1 %v2402_v20, %s5704_s23 }
 0x390   : > { %2420 = vrot.lane.b32.xlu0 %v2401_v57, %s5704_s23 }
 0x391   : > { %v6902_v60 = vpop.f32.mrf.mxu1 }
 0x392   : > { %v2872_v18 = vrot.slane %v6902_v60, 1 }
 0x393   : > { %v6905_v50 = vpop.f32.mrf.mxu1 }
 0x394   : > { %v2870_v12 = vrot.slane %v6905_v50, 1  ;;  %2888 = vrot.lane.b32.xlu0 %v2869_v63, %s5704_s23 }
 0x395   : > { %v6909_v16 = vpop.f32.mrf.mxu1 }
 0x396   : > { %2890 = vrot.lane.b32.xlu1 %v2870_v12, %s5704_s23 }
 0x397   : > { %v6915_v62 = vpop.f32.mrf.mxu1 }
 0x398   : > { %2424 = vrot.lane.b32.xlu0 %v2403_v17, %s5704_s23  ;;  %v2871_v54 = vrot.slane %v6915_v62, 1 }
 0x39a   : > { %2426 = vrot.lane.b32.xlu1 %v2404_v58, %s5704_s23 }
 0x39c   : > { %2892 = vrot.lane.b32.xlu0 %v2871_v54, %s5704_s23 }
 0x39e   : > { %2894 = vrot.lane.b32.xlu1 %v2872_v18, %s5704_s23 }
 0x3a0   : > { %2406 = vrot.lane.b32.xlu0 %v2394_v2, %s5704_s23 }
 0x3a2   : > { %2874 = vrot.lane.b32.xlu1 %v2862_v25, %s5704_s23 }
 0x3a4   : > { %2416 = vrot.lane.b32.xlu0 %v2399_v26, %s5704_s23 }
 0x3a6   : > { %2884 = vrot.lane.b32.xlu1 %v2867_v29, %s5704_s23  ;;  %v2411_v43 = vpop.permute.xlu1 %2410 }
 0x3a7   : > { %v2444_v32 = vadd.f32 %v6843_v8, %v2411_v43 }
 0x3a8   : > { %2418 = vrot.lane.b32.xlu0 %v2400_v35, %s5704_s23 }
 0x3a9   : > { %v2840_v20 = vadd.f32 %v6871_v42, %v2444_v32  ;;  %v2873_v32 = vrot.slane %v6909_v16, 1 }
 0x3ac   : > { %2886 = vrot.lane.b32.xlu0 %v2868_v49, %s5704_s23  ;;  %v2409_v6 = vpop.permute.xlu0 %2408 }
 0x3ad   : > { %v2443_v63 = vadd.f32 %v2409_v6, %v6851_v19 }
 0x3af   : > { %v2839_v8 = vadd.f32 %v6880_v11, %v2443_v63  ;;  %v5558_v11 = vld [vmem:[%s7327_s5 + $0x80] ss:$8 sps:$4 sm:$0xff]  }
 0x3b0   : > { %3240 = vmatpush2.bf16.msra.mxu1 %v5558_v11 }
 0x3f0   : > { %v2879_v57 = vpop.permute.xlu1 %2878 }
 0x3f1   : > { %v2912_v12 = vadd.f32 %v2879_v57, %v2840_v20 }
 0x3f3   : > { %v2931_v58 = vadd.f32 %v7006_v22, %v2912_v12 }
 0x3f4   : > { %v2415_v17 = vpop.permute.xlu1 %2414 }
 0x3f5   : > { %v2943_v18 = vmax.f32 %v2931_v58, 0.0  ;;  %v2446_v54 = vadd.f32 %v2415_v17, %v6857_v1 }
 0x3f6   : > { %v2877_v2 = vpop.permute.xlu0 %2876 }
 0x3f7   : > { %2956 = vst.msk [vmem:[#allocation3 + $0x10] sm:$0x3f] %vm2953_vm5, %v2943_v18  ;;  %v2911_v42 = vadd.f32 %v2877_v2, %v2839_v8  ;;  %v2842_v26 = vadd.f32 %v6887_v61, %v2446_v54 }
 0x3f9   : > { %v2930_v25 = vadd.f32 %v7006_v22, %v2911_v42 }
 0x3fa   : > { %v2413_v29 = vpop.permute.xlu0 %2412 }
 0x3fb   : > { %v2942_v5 = vmax.f32 %v2930_v25, 0.0  ;;  %v2445_v35 = vadd.f32 %v6849_v15, %v2413_v29 }
 0x3fc   : > { %v2883_v19 = vpop.permute.xlu1 %2882 }
 0x3fd   : > { %v2914_v1 = vadd.f32 %v2883_v19, %v2842_v26  ;;  %2955 = vst.msk [vmem:[#allocation3 + $0x8] sm:$0x3f] %vm2953_vm5, %v2942_v5  ;;  %v2841_v61 = vadd.f32 %v6877_v10, %v2445_v35 }
 0x3fe   : > { %v2881_v39 = vpop.permute.xlu0 %2880  ;;  %v7031_v48 = vld [vmem:[#allocation3 + $0x10] sm:$0xff] }
 0x3ff   : > { %v2933_v36 = vadd.f32 %v7006_v22, %v2914_v1  ;;  %v2913_v0 = vadd.f32 %v2881_v39, %v2841_v61 }
 0x400   : > { %v2423_v44 = vpop.permute.xlu1 %2422 }
 0x401   : > { %v2945_v49 = vmax.f32 %v2933_v36, 0.0  ;;  %v2932_v15 = vadd.f32 %v7006_v22, %v2913_v0  ;;  %v2450_v59 = vadd.f32 %v2423_v44, %v6865_v30 }
 0x402   : > { %v2421_v9 = vpop.permute.xlu0 %2420 }
 0x403   : > { %2958 = vst.msk [vmem:[#allocation3 + $0x20] sm:$0x3f] %vm2953_vm5, %v2945_v49  ;;  %v2944_v45 = vmax.f32 %v2932_v15, 0.0  ;;  %v2449_v47 = vadd.f32 %v6859_v51, %v2421_v9  ;;  %v2846_v55 = vadd.f32 %v6905_v50, %v2450_v59  ;;  %v2405_v51 = vrot.slane %v6867_v34, 1 }
 0x404   : > { %v7029_v46 = vld [vmem:[#allocation3 + $0x8] sm:$0xff] }
 0x405   : > { %2957 = vst.msk [vmem:[#allocation3 + $0x18] sm:$0x3f] %vm2953_vm5, %v2944_v45  ;;  %v2845_v10 = vadd.f32 %v6893_v37, %v2449_v47  ;;  %v5369_v53 = vpack.i.bf16 %v7031_v48, %v7029_v46 }
 0x406   : > { %v2889_v13 = vpop.permute.xlu0 %2888 }
 0x407   : > { %v2917_v30 = vadd.f32 %v2889_v13, %v2845_v10  ;;  %5370 = vrot.lane.b32.xlu1 %v5369_v53, %s5704_s23 }
 0x408   : > { %v2891_v56 = vpop.permute.xlu1 %2890 }
 0x409   : > { %v2918_v4 = vadd.f32 %v2891_v56, %v2846_v55  ;;  %v2936_v14 = vadd.f32 %v7006_v22, %v2917_v30 }
 0x40a   : > { %v2425_v38 = vpop.permute.xlu0 %2424  ;;  %v7048_v20 = vld [vmem:[#allocation3 + $0x20] sm:$0xff] }
 0x40b   : > { %v2937_v21 = vadd.f32 %v7006_v22, %v2918_v4  ;;  %v2948_v37 = vmax.f32 %v2936_v14, 0.0  ;;  %v2451_v43 = vadd.f32 %v2425_v38, %v6869_v7  ;;  %2428 = vrot.lane.b32.xlu1 %v2405_v51, %s5704_s23 }
 0x40c   : > { %v2427_v40 = vpop.permute.xlu1 %2426  ;;  %v7046_v6 = vld [vmem:[#allocation3 + $0x18] sm:$0xff] }
 0x40d   : > { %v2949_v24 = vmax.f32 %v2937_v21, 0.0  ;;  %v2452_v50 = vadd.f32 %v6863_v28, %v2427_v40  ;;  %2961 = vst.msk [vmem:[#allocation3 + $0x38] sm:$0x3f] %vm2953_vm5, %v2948_v37  ;;  %v2847_v57 = vadd.f32 %v6915_v62, %v2451_v43  ;;  %v3070_v63 = vpack.c.bf16 %v7046_v6, %v7031_v48 }
 0x40e   : > { %v5374_v7 = vpack.i.bf16 %v7048_v20, %v7046_v6  ;;  %v2893_v12 = vpop.permute.xlu0 %2892 }
 0x40f   : > { %2962 = vst.msk [vmem:[#allocation3 + $0x40] sm:$0x3f] %vm2953_vm5, %v2949_v24  ;;  %v2848_v28 = vadd.f32 %v6902_v60, %v2452_v50  ;;  %v2919_v17 = vadd.f32 %v2893_v12, %v2847_v57  ;;  %4802 = vmatprep.mubr.msk.bf16.mxu1 %vm2193_vm1, %v3070_v63  ;;  %2896 = vrot.lane.b32.xlu1 %v2873_v32, %s5704_s23 }
 0x410   : > { %v2895_v58 = vpop.permute.xlu1 %2894  ;;  %5375 = vrot.lane.b32.xlu0 %v5374_v7, %s5704_s23 }
 0x411   : > { %v2920_v18 = vadd.f32 %v2895_v58, %v2848_v28  ;;  %v2938_v62 = vadd.f32 %v7006_v22, %v2919_v17 }
 0x412   : > { %v2407_v8 = vpop.permute.xlu0 %2406 }
 0x413   : > { %v2939_v54 = vadd.f32 %v7006_v22, %v2920_v18  ;;  %v2950_v2 = vmax.f32 %v2938_v62, 0.0  ;;  %v2442_v25 = vadd.f32 %v2407_v8, %v6846_v33 }
 0x414   : > { %v2875_v60 = vpop.permute.xlu1 %2874  ;;  %v7064_v26 = vld [vmem:[#allocation3 + $0x38] sm:$0xff] }
 0x415   : > { %v2951_v42 = vmax.f32 %v2939_v54, 0.0  ;;  %2963 = vst.msk [vmem:[#allocation3 + $0x48] sm:$0x3f] %vm2953_vm5, %v2950_v2  ;;  %v2838_v19 = vadd.f32 %v6874_v41, %v2442_v25 }
 0x416   : > { %v7066_v29 = vld [vmem:[#allocation3 + $0x40] sm:$0xff]  ;;  %v2417_v5 = vpop.permute.xlu0 %2416 }
 0x417   : > { %2964 = vst.msk [vmem:[#allocation3 + $0x50] sm:$0x3f] %vm2953_vm5, %v2951_v42  ;;  %v5379_v3 = vpack.i.bf16 %v7066_v29, %v7064_v26  ;;  %v2910_v35 = vadd.f32 %v2875_v60, %v2838_v19  ;;  %v2447_v1 = vadd.f32 %v2417_v5, %v6861_v27 }
 0x418   : > { %v2885_v36 = vpop.permute.xlu1 %2884 }
 0x419   : > { %5380 = vrot.lane.b32.xlu0 %v5379_v3, %s5704_s23  ;;  %v2929_v33 = vadd.f32 %v7006_v22, %v2910_v35  ;;  %v2843_v11 = vadd.f32 %v6899_v31, %v2447_v1 }
 0x41a   : > { %v2419_v61 = vpop.permute.xlu0 %2418 }
 0x41b   : > { %v2941_v39 = vmax.f32 %v2929_v33, 0.0  ;;  %v2915_v44 = vadd.f32 %v2885_v36, %v2843_v11  ;;  %v2448_v49 = vadd.f32 %v6855_v23, %v2419_v61 }
 0x41c   : > { %v2994_v41 = vld [vmem:[#allocation3 + $0x48] sm:$0xff] }
 0x41d   : > { %2954 = vst.msk [vmem:[#allocation3] sm:$0x3f] %vm2953_vm5, %v2941_v39  ;;  %v2934_v15 = vadd.f32 %v7006_v22, %v2915_v44  ;;  %v2844_v27 = vadd.f32 %v6884_v52, %v2448_v49  ;;  %v3074_v63 = vpack.c.bf16 %v2994_v41, %v7066_v29 }
 0x41e   : > { %v2995_v0 = vld [vmem:[#allocation3 + $0x50] sm:$0xff]  ;;  %v2887_v9 = vpop.permute.xlu0 %2886 }
 0x41f   : > { %v5384_v59 = vpack.i.bf16 %v2995_v0, %v2994_v41  ;;  %v2946_v45 = vmax.f32 %v2934_v15, 0.0  ;;  %v2916_v47 = vadd.f32 %v2887_v9, %v2844_v27 }
 0x421   : > { %5385 = vrot.lane.b32.xlu1 %v5384_v59, %s5704_s23  ;;  %2959 = vst.msk [vmem:[#allocation3 + $0x28] sm:$0x3f] %vm2953_vm5, %v2946_v45  ;;  %v2935_v31 = vadd.f32 %v7006_v22, %v2916_v47 }
 0x423   : > { %v2947_v10 = vmax.f32 %v2935_v31, 0.0 }
 0x424   : > { %v2979_v13 = vld [vmem:[#allocation3] sm:$0xff] }
 0x425   : > { %2960 = vst.msk [vmem:[#allocation3 + $0x30] sm:$0x3f] %vm2953_vm5, %v2947_v10 }
 0x428   : > { %v3000_v56 = vld [vmem:[#allocation3 + $0x28] sm:$0xff] }
 0x429   : > { %v3072_v21 = vpack.c.bf16 %v3000_v56, %v7048_v20 }
 0x42c   : > { %v2983_v12 = vld [vmem:[#allocation3 + $0x30] sm:$0xff] }
 0x479   : > { %v5371_v23 = vpop.permute.xlu1 %5370 }
 0x47a   : > { %v5373_v53 = vunpack.i.h.bf16 %v5371_v23  ;;  %v5372_v55 = vunpack.i.l.bf16 %v5371_v23  ;;  %v7128_v23 = vld [vmem:[%s7328_s6] ss:$0 sm:$0xff] }
 0x47c   : > { %v3038_v52 = vsel %vm2193_vm1, %v7029_v46, %v5373_v53  ;;  %v3037_v30 = vsel %vm2193_vm1, %v2979_v13, %v5372_v55 }
 0x47d   : > { %v3069_v4 = vpack.c.bf16 %v3038_v52, %v3037_v30  ;;  %v2429_v51 = vpop.permute.xlu1 %2428 }
 0x47e   : > { %v2453_v14 = vadd.f32 %v6867_v34, %v2429_v51 }
 0x47f   : > { %3242 = vmatmul.mubr.bf16.vlgmr.msra.gmra.mxu1 %v3069_v4 }
 0x480   : > { %4803 = vmatprep.mubr.msk.bf16.mxu1 %vm2193_vm1, %v3072_v21  ;;  %v2849_v38 = vadd.f32 %v6909_v16, %v2453_v14 }
 0x481   : > { %v2897_v40 = vpop.permute.xlu1 %2896 }
 0x482   : > { %v2921_v37 = vadd.f32 %v2897_v40, %v2849_v38  ;;  %v5376_v24 = vpop.permute.xlu0 %5375 }
 0x483   : > { %v5378_v43 = vunpack.i.h.bf16 %v5376_v24  ;;  %v5377_v50 = vunpack.i.l.bf16 %v5376_v24 }
 0x484   : > { %v2940_v46 = vadd.f32 %v7006_v22, %v2921_v37 }
 0x485   : > { %v3039_v32 = vsel %vm2193_vm1, %v7031_v48, %v5377_v50  ;;  %v3040_v34 = vsel %vm2193_vm1, %v7046_v6, %v5378_v43 }
 0x486   : > { %v2952_v57 = vmax.f32 %v2940_v46, 0.0  ;;  %v3071_v20 = vpack.c.bf16 %v3040_v34, %v3039_v32 }
 0x488   : > { %2965 = vst.msk [vmem:[#allocation3 + $0x58] sm:$0x3f] %vm2953_vm5, %v2952_v57  ;;  %3252 = vmatmul.mubr.bf16.gmra.mxu1 %v3071_v20 }
 0x489   : > { %4804 = vmatprep.mubr.msk.bf16.mxu1 %vm2193_vm1, %v3074_v63 }
 0x48b   : > { %v5381_v16 = vpop.permute.xlu0 %5380 }
 0x48c   : > { %v5383_v7 = vunpack.i.h.bf16 %v5381_v16  ;;  %v5382_v28 = vunpack.i.l.bf16 %v5381_v16 }
 0x48e   : > { %v3041_v22 = vsel %vm2193_vm1, %v2983_v12, %v5382_v28  ;;  %v3042_v48 = vsel %vm2193_vm1, %v7064_v26, %v5383_v7 }
 0x48f   : > { %v3073_v58 = vpack.c.bf16 %v3042_v48, %v3041_v22  ;;  %v3004_v6 = vld [vmem:[#allocation3 + $0x58] sm:$0xff] }
 0x490   : > { %v3076_v17 = vpack.c.bf16 %v3004_v6, %v2995_v0 }
 0x491   : > { %3262 = vmatmul.mubr.bf16.gmra.mxu1 %v3073_v58 }
 0x492   : > { %4805 = vmatprep.mubr.msk.bf16.mxu1 %vm2193_vm1, %v3076_v17 }
 0x493   : > { %v5386_v18 = vpop.permute.xlu1 %5385 }
 0x494   : > { %v5388_v62 = vunpack.i.h.bf16 %v5386_v18  ;;  %v5387_v54 = vunpack.i.l.bf16 %v5386_v18 }
 0x496   : > { %v3043_v8 = vsel %vm2193_vm1, %v7066_v29, %v5387_v54  ;;  %v3044_v2 = vsel %vm2193_vm1, %v2994_v41, %v5388_v62 }
 0x497   : > { %v3075_v42 = vpack.c.bf16 %v3044_v2, %v3043_v8 }
 0x499   : > { %3272 = vmatmul.mubr.bf16.gmra.mxu1 %v3075_v42 }
 0x53f   : > { %v3243_v25 = vpop.f32.mrf.mxu1 }
 0x540   : > { %v3290_v60 = vrot.slane %v3243_v25, 1 }
 0x541   : > { %v3245_v19 = vpop.f32.mrf.mxu1 }
 0x542   : > { %3298 = vrot.lane.b32.xlu0 %v3290_v60, %s5704_s23  ;;  %v3338_v31 = vrot.slane %v3245_v19, 2 }
 0x543   : > { %v3247_v26 = vpop.f32.mrf.mxu1 }
 0x544   : > { %v3291_v3 = vrot.slane %v3247_v26, 1 }
 0x545   : > { %v3249_v5 = vpop.f32.mrf.mxu1 }
 0x546   : > { %3300 = vrot.lane.b32.xlu1 %v3291_v3, %s5704_s23  ;;  %v3339_v13 = vrot.slane %v3249_v5, 2 }
 0x548   : > { %v7109_v35 = vpop.f32.mrf.mxu1 }
 0x549   : > { %v3292_v59 = vrot.slane %v7109_v35, 1 }
 0x54a   : > { %v7111_v1 = vpop.f32.mrf.mxu1 }
 0x54b   : > { %v3340_v22 = vrot.slane %v7111_v1, 2 }
 0x54c   : > { %v7113_v33 = vpop.f32.mrf.mxu1 }
 0x54d   : > { %v3293_v45 = vrot.slane %v7113_v33, 1 }
 0x54e   : > { %v7115_v29 = vpop.f32.mrf.mxu1 }
 0x54f   : > { %v3341_v42 = vrot.slane %v7115_v29, 2 }
 0x551   : > { %v3263_v11 = vpop.f32.mrf.mxu1 }
 0x552   : > { %v3294_v36 = vrot.slane %v3263_v11, 1 }
 0x553   : > { %v3265_v61 = vpop.f32.mrf.mxu1 }
 0x554   : > { %3306 = vrot.lane.b32.xlu0 %v3294_v36, %s5704_s23  ;;  %v3342_v38 = vrot.slane %v3265_v61, 2 }
 0x555   : > { %v3267_v39 = vpop.f32.mrf.mxu1 }
 0x556   : > { %v3295_v44 = vrot.slane %v3267_v39, 1 }
 0x557   : > { %v3269_v49 = vpop.f32.mrf.mxu1 }
 0x558   : > { %3308 = vrot.lane.b32.xlu1 %v3295_v44, %s5704_s23  ;;  %v3343_v43 = vrot.slane %v3269_v49, 2 }
 0x559   : > { %v3273_v41 = vpop.f32.mrf.mxu1 }
 0x55a   : > { %v3296_v0 = vrot.slane %v3273_v41, 1 }
 0x55b   : > { %v3275_v15 = vpop.f32.mrf.mxu1 }
 0x55c   : > { %3310 = vrot.lane.b32.xlu0 %v3296_v0, %s5704_s23  ;;  %v3344_v20 = vrot.slane %v3275_v15, 2 }
 0x55d   : > { %v3277_v27 = vpop.f32.mrf.mxu1 }
 0x55e   : > { %v3297_v9 = vrot.slane %v3277_v27, 1 }
 0x55f   : > { %v3279_v7 = vpop.f32.mrf.mxu1 }
 0x560   : > { %3302 = vrot.lane.b32.xlu0 %v3292_v59, %s5704_s23  ;;  %3312 = vrot.lane.b32.xlu1 %v3297_v9, %s5704_s23  ;;  %v3345_v6 = vrot.slane %v3279_v7, 2 }
 0x564   : > { %3304 = vrot.lane.b32.xlu1 %v3293_v45, %s5704_s23 }
 0x5b4   : > { %v3299_v47 = vpop.permute.xlu0 %3298 }
 0x5b5   : > { %v3322_v10 = vadd.f32 %v3299_v47, %v3243_v25 }
 0x5b7   : > { %v3354_v53 = vadd.f32 %v3338_v31, %v3322_v10 }
 0x5b8   : > { %v3301_v55 = vpop.permute.xlu1 %3300 }
 0x5b9   : > { %v3369_v56 = vadd.f32 %v7128_v23, %v3354_v53  ;;  %v3323_v52 = vadd.f32 %v3301_v55, %v3247_v26 }
 0x5bb   : > { %v3377_v30 = vmax.f32 %v3369_v56, 0.0  ;;  %v3355_v4 = vadd.f32 %v3339_v13, %v3323_v52 }
 0x5bd   : > { %3386 = vst.msk [vmem:[#allocation4] sm:$0xf] %vm3385_vm6, %v3377_v30  ;;  %v3370_v51 = vadd.f32 %v7128_v23, %v3355_v4 }
 0x5bf   : > { %v3378_v14 = vmax.f32 %v3370_v51, 0.0 }
 0x5c1   : > { %3387 = vst.msk [vmem:[#allocation4 + $0x4] sm:$0xf] %vm3385_vm6, %v3378_v14 }
 0x5c4   : > { %v3400_v44 = vld [vmem:[#allocation4 + $0x3] sm:$0x1] }
 0x5c6   : > { %v3307_v21 = vpop.permute.xlu0 %3306 }
 0x5c7   : > { %v3326_v40 = vadd.f32 %v3307_v21, %v3263_v11 }
 0x5c8   : > { %v3405_v9 = vld [vmem:[#allocation4 + $0x5] sm:$0x1]  ;;  %v3409_v45 = vld [vmem:[#allocation4 + $0x7] sm:$0x1] }
 0x5c9   : > { %v3358_v37 = vadd.f32 %v3342_v38, %v3326_v40 }
 0x5ca   : > { %v3309_v24 = vpop.permute.xlu1 %3308 }
 0x5cb   : > { %v3373_v50 = vadd.f32 %v7128_v23, %v3358_v37  ;;  %v3327_v46 = vadd.f32 %v3309_v24, %v3267_v39 }
 0x5cd   : > { %v3381_v32 = vmax.f32 %v3373_v50, 0.0  ;;  %v3359_v34 = vadd.f32 %v3343_v43, %v3327_v46 }
 0x5ce   : > { %v3311_v57 = vpop.permute.xlu0 %3310 }
 0x5cf   : > { %3390 = vst.msk [vmem:[#allocation4 + $0x10] sm:$0xf] %vm3385_vm6, %v3381_v32  ;;  %v3374_v63 = vadd.f32 %v7128_v23, %v3359_v34  ;;  %v3328_v16 = vadd.f32 %v3311_v57, %v3273_v41 }
 0x5d1   : > { %v3382_v28 = vmax.f32 %v3374_v63, 0.0  ;;  %v3360_v12 = vadd.f32 %v3344_v20, %v3328_v16  ;;  %v3557_v16 = vlaneseq }
 0x5d2   : > { %v3303_v48 = vpop.permute.xlu0 %3302  ;;  %v3313_v58 = vpop.permute.xlu1 %3312 }
 0x5d3   : > { %3391 = vst.msk [vmem:[#allocation4 + $0x14] sm:$0xf] %vm3385_vm6, %v3382_v28  ;;  %v3375_v17 = vadd.f32 %v7128_v23, %v3360_v12  ;;  %v3324_v18 = vadd.f32 %v3303_v48, %v7109_v35  ;;  %v3329_v62 = vadd.f32 %v3313_v58, %v3277_v27  ;;  %v3396_v35 = vld [vmem:[#allocation4 + $0x1] sm:$0x1]  ;;  %v5708_v48 = vmov 1966171168  }
 0x5d4   : > { %v3555_v58 = vunpack.c.l.s4 %v5708_v48 }
 0x5d5   : > { %v3383_v54 = vmax.f32 %v3375_v17, 0.0  ;;  %v3356_v8 = vadd.f32 %v3340_v22, %v3324_v18  ;;  %v3361_v2 = vadd.f32 %v3345_v6, %v3329_v62 }
 0x5d6   : > { %v3305_v25 = vpop.permute.xlu1 %3304  ;;  %v3397_v60 = vld [vmem:[#allocation4 + $0x11] sm:$0x1]  ;;  %v3401_v19 = vld [vmem:[#allocation4 + $0x13] sm:$0x1]  ;;  %v3395_v20 = vld [vmem:[#allocation4 + $0x10] sm:$0x1] }
 0x5d7   : > { %3392 = vst.msk [vmem:[#allocation4 + $0x18] sm:$0xf] %vm3385_vm6, %v3383_v54  ;;  %v3371_v26 = vadd.f32 %v7128_v23, %v3356_v8  ;;  %v3376_v3 = vadd.f32 %v7128_v23, %v3361_v2  ;;  %v3325_v5 = vadd.f32 %v3305_v25, %v7113_v33  ;;  %v3437_v1 = vrot.slane %v3397_v60, 7  ;;  %v3399_v63 = vld [vmem:[#allocation4 + $0x12] sm:$0x1] }
 0x5d8   : > { %v3449_v11 = vrot.slane %v3401_v19, 7  ;;  %v3431_v18 = vrot.slane %v3395_v20, 7  ;;  %v3444_v62 = vrot.slane %v3399_v63, 7  ;;  %v3403_v54 = vld [vmem:[#allocation4 + $0x4] sm:$0x1] }
 0x5d9   : > { %v3379_v36 = vmax.f32 %v3371_v26, 0.0  ;;  %v3384_v61 = vmax.f32 %v3376_v3, 0.0  ;;  %v3357_v39 = vadd.f32 %v3341_v42, %v3325_v5  ;;  %v3438_v29 = vsel %vm3432_vm7, %v3437_v1, %v3396_v35  ;;  %v3407_v42 = vld [vmem:[#allocation4 + $0x6] sm:$0x1]  ;;  %v3394_v19 = vld [vmem:[#allocation4] sm:$0x1] }
 0x5da   : > { %v3450_v49 = vsel %vm3432_vm7, %v3449_v11, %v3400_v44  ;;  %v3406_v41 = vld [vmem:[#allocation4 + $0x15] sm:$0x1]  ;;  %v3410_v0 = vld [vmem:[#allocation4 + $0x17] sm:$0x1]  ;;  %v3404_v34 = vld [vmem:[#allocation4 + $0x14] sm:$0x1]  ;;  %v3556_v35 = vunpack.c.0.s8 %v3555_v58  ;;  %v3433_v44 = vsel %vm3432_vm7, %v3431_v18, %v3394_v19 }
 0x5db   : > { %3388 = vst.msk [vmem:[#allocation4 + $0x8] sm:$0xf] %vm3385_vm6, %v3379_v36  ;;  %3393 = vst.msk [vmem:[#allocation4 + $0x1c] sm:$0xf] %vm3385_vm6, %v3384_v61  ;;  %v3372_v15 = vadd.f32 %v7128_v23, %v3357_v39  ;;  %v5389_v33 = vpack.i.bf16 %v3450_v49, %v3438_v29  ;;  %v3461_v27 = vrot.slane %v3406_v41, 7  ;;  %v3473_v59 = vrot.slane %v3410_v0, 7 }
 0x5dc   : > { %v3408_v57 = vld [vmem:[#allocation4 + $0x16] sm:$0x1]  ;;  %v3456_v28 = vrot.slane %v3404_v34, 7  ;;  %v3558_v26 = vshrl.u32 %v3557_v16, 7  ;;  %v3398_v1 = vld [vmem:[#allocation4 + $0x2] sm:$0x1] }
 0x5dd   : > { %v3380_v47 = vmax.f32 %v3372_v15, 0.0  ;;  %5390 = vrot.lane.b32.xlu0 %v5389_v33, %s5704_s23  ;;  %v3462_v31 = vsel %vm3432_vm7, %v3461_v27, %v3405_v9  ;;  %v3474_v10 = vsel %vm3432_vm7, %v3473_v59, %v3409_v45  ;;  %v3468_v12 = vrot.slane %v3408_v57, 7 }
 0x5de   : > { %v5394_v53 = vpack.i.bf16 %v3474_v10, %v3462_v31  ;;  %v3415_v55 = vld [vmem:[#allocation4 + $0x19] sm:$0x1]  ;;  %v3419_v13 = vld [vmem:[#allocation4 + $0x1b] sm:$0x1]  ;;  %v3417_v25 = vld [vmem:[#allocation4 + $0x1a] sm:$0x1]  ;;  %v3457_v3 = vsel %vm3432_vm7, %v3456_v28, %v3403_v54  ;;  %v3445_v29 = vsel %vm3432_vm7, %v3444_v62, %v3398_v1 }
 0x5df   : > { %3389 = vst.msk [vmem:[#allocation4 + $0xc] sm:$0xf] %vm3385_vm6, %v3380_v47  ;;  %v3485_v23 = vrot.slane %v3415_v55, 7  ;;  %v3497_v56 = vrot.slane %v3419_v13, 7  ;;  %v3413_v60 = vld [vmem:[#allocation4 + $0x18] sm:$0x1]  ;;  %v3469_v5 = vsel %vm3432_vm7, %v3468_v12, %v3407_v42 }
 0x5e0   : > { %5395 = vrot.lane.b32.xlu1 %v5394_v53, %s5704_s23  ;;  %v3492_v49 = vrot.slane %v3417_v25, 7  ;;  %v3480_v0 = vrot.slane %v3413_v60, 7 }
 0x5e2   : > { %v3414_v52 = vld [vmem:[#allocation4 + $0x9] sm:$0x1]  ;;  %v3418_v30 = vld [vmem:[#allocation4 + $0xb] sm:$0x1]  ;;  %v3424_v4 = vld [vmem:[#allocation4 + $0x1d] sm:$0x1] }
 0x5e3   : > { %v3486_v51 = vsel %vm3432_vm7, %v3485_v23, %v3414_v52  ;;  %v3498_v14 = vsel %vm3432_vm7, %v3497_v56, %v3418_v30  ;;  %v3428_v21 = vld [vmem:[#allocation4 + $0x1f] sm:$0x1]  ;;  %v3509_v40 = vrot.slane %v3424_v4, 7  ;;  %v3412_v61 = vld [vmem:[#allocation4 + $0x8] sm:$0x1]  ;;  %v3559_v56 = vsub.s32 %v3556_v35, %v3558_v26 }
 0x5e4   : > { %v5399_v38 = vpack.i.bf16 %v3498_v14, %v3486_v51  ;;  %v3521_v37 = vrot.slane %v3428_v21, 7  ;;  %v3416_v39 = vld [vmem:[#allocation4 + $0xa] sm:$0x1]  ;;  %v3426_v9 = vld [vmem:[#allocation4 + $0x1e] sm:$0x1]  ;;  %v3481_v10 = vsel %vm3432_vm7, %v3480_v0, %v3412_v61 }
 0x5e5   : > { %v3422_v45 = vld [vmem:[#allocation4 + $0x1c] sm:$0x1]  ;;  %v3493_v31 = vsel %vm3432_vm7, %v3492_v49, %v3416_v39  ;;  %v3516_v30 = vrot.slane %v3426_v9, 7 }
 0x5e6   : > { %5400 = vrot.lane.b32.xlu0 %v5399_v38, %s5704_s23  ;;  %v3423_v24 = vld [vmem:[#allocation4 + $0xd] sm:$0x1]  ;;  %v3427_v43 = vld [vmem:[#allocation4 + $0xf] sm:$0x1]  ;;  %v3421_v13 = vld [vmem:[#allocation4 + $0xc] sm:$0x1] }
 0x5e7   : > { %v3510_v50 = vsel %vm3432_vm7, %v3509_v40, %v3423_v24  ;;  %v3522_v46 = vsel %vm3432_vm7, %v3521_v37, %v3427_v43  ;;  %v3425_v23 = vld [vmem:[#allocation4 + $0xe] sm:$0x1]  ;;  %v3504_v51 = vrot.slane %v3422_v45, 7 }
 0x5e8   : > { %v5404_v32 = vpack.i.bf16 %v3522_v46, %v3510_v50  ;;  %v3517_v37 = vsel %vm3432_vm7, %v3516_v30, %v3425_v23 }
 0x5e9   : > { %v3505_v24 = vsel %vm3432_vm7, %v3504_v51, %v3421_v13 }
 0x5ea   : > { %5405 = vrot.lane.b32.xlu1 %v5404_v32, %s5704_s23 }
 0x64f   : > { %v5391_v7 = vpop.permute.xlu0 %5390 }
 0x650   : > { %v5393_v8 = vunpack.i.h.bf16 %v5391_v7  ;;  %v5392_v2 = vunpack.i.l.bf16 %v5391_v7 }
 0x652   : > { %v5396_v22 = vpop.permute.xlu1 %5395  ;;  %v3527_v15 = vsel %vm2193_vm1, %v3445_v29, %v5393_v8  ;;  %v3526_v33 = vsel %vm2193_vm1, %v3433_v44, %v5392_v2 }
 0x653   : > { %v5398_v6 = vunpack.i.h.bf16 %v5396_v22  ;;  %v5397_v17 = vunpack.i.l.bf16 %v5396_v22  ;;  %v4807_v52 = vpack.c.bf16 %v3527_v15, %v3526_v33 }
 0x655   : > { %v3529_v11 = vsel %vm2193_vm1, %v3469_v5, %v5398_v6  ;;  %v3528_v36 = vsel %vm2193_vm1, %v3457_v3, %v5397_v17  ;;  %v3560_v46 = vrot.slane %v4807_v52, %v3559_v56 }
 0x656   : > { %v4808_v47 = vpack.c.bf16 %v3529_v11, %v3528_v36 }
 0x658   : > { %v5401_v41 = vpop.permute.xlu0 %5400  ;;  %v3567_v38 = vrot.slane %v4808_v47, %v3559_v56 }
 0x659   : > { %v5403_v27 = vunpack.i.h.bf16 %v5401_v41  ;;  %v5402_v59 = vunpack.i.l.bf16 %v5401_v41 }
 0x65a   : > { %v3582_v34 = vcombine.low %v3560_v46, %v3567_v38 }
 0x65b   : > { %v3531_v53 = vsel %vm2193_vm1, %v3493_v31, %v5403_v27  ;;  %v3530_v55 = vsel %vm2193_vm1, %v3481_v10, %v5402_v59 }
 0x65c   : > { %v5406_v4 = vpop.permute.xlu1 %5405  ;;  %v4809_v40 = vpack.c.bf16 %v3531_v53, %v3530_v55  ;;  %v3590_v16 = vrot.slane %v3582_v34, %v3559_v56 }
 0x65d   : > { %v5408_v14 = vunpack.i.h.bf16 %v5406_v4  ;;  %v5407_v21 = vunpack.i.l.bf16 %v5406_v4 }
 0x65e   : > { %v3574_v57 = vrot.slane %v4809_v40, %v3559_v56 }
 0x65f   : > { %v3533_v43 = vsel %vm2193_vm1, %v3517_v37, %v5408_v14  ;;  %v3532_v50 = vsel %vm2193_vm1, %v3505_v24, %v5407_v21 }
 0x660   : > { %v4810_v32 = vpack.c.bf16 %v3533_v43, %v3532_v50 }
 0x662   : > { %v3581_v20 = vrot.slane %v4810_v32, %v3559_v56 }
 0x664   : > { %v3583_v63 = vcombine.low %v3574_v57, %v3581_v20 }
 0x666   : > { %v3597_v7 = vrot.slane %v3583_v63, %v3559_v56 }
 0x668   : > { %v3598_v28 = vcombine.low %v3590_v16, %v3597_v7 }
 0x66a   : > { %3600 = vst [vmem:[#allocation5] sm:$0xff] %v3598_v28 }
 0x66b PF: > { %v5561_v12 = vld [vmem:[%s6119_s9 + $0x78] sm:$0xff]   ;;  %v5709_v22 = vmov 0.0   ;;  %s7345_s23 = scalar_lea.vmem [#allocation8], %s6104_s16  ;;  %vm3745_vm8 = vcmask 1044480   ;;  %v3732_v17 = vld [vmem:[%s7329_s7] sm:$0x3]  ;;  %v3794_v59 = vlaneseq }
 0x66c   : > { %5075 = vmatprep.subr.bf16.mxu0 %v5709_v22  ;;  %v5562_v48 = vld [vmem:[%s7345_s23] sm:$0x1f]   ;;  %4922 = vmatprep.subr.bf16.mxu1 %v5561_v12  ;;  %v5563_v58 = vld [vmem:[%s6119_s9 + $0x38] sm:$0xff]   ;;  %vm3741_vm9 = vcmask 80896   ;;  %v5564_v18 = vld [vmem:[%s6119_s9 + $0x70] sm:$0xff]   ;;  %v3735_v62 = vpack.c.bf16 %v3732_v17, %v3732_v17  ;;  %vm5710_vm10 = vmmov 0  }
 0x66d   : > { %v3747_v6 = vsel %vm3745_vm8, %v5562_v48, 0  ;;  %4923 = vmatpush3.bf16.msra.mxu1 %v5563_v58  ;;  %5077 = vmatprep.mubr.msk.bf16.mxu0 %vm5710_vm10, %v5709_v22  ;;  %v5565_v54 = vld [vmem:[%s6119_s9 + $0xf8] sm:$0xff]   ;;  %v5566_v8 = vld [vmem:[%s6119_s9 + $0x30] sm:$0xff]   ;;  %v5568_v42 = vld [vmem:[%s6119_s9 + $0x68] sm:$0xff]   ;;  %v5711_v10 = vmov 1966171168  }
 0x66e   : > { %5076 = vmatpush3.bf16.msra.mxu0 %v3747_v6  ;;  %4924 = vmatprep.subr.bf16.mxu1 %v5564_v18  ;;  %v5567_v2 = vld [vmem:[%s6119_s9 + $0xb8] sm:$0xff]   ;;  %v5569_v25 = vld [vmem:[%s6119_s9 + $0xf0] sm:$0xff]   ;;  %v5570_v60 = vld [vmem:[%s6119_s9 + $0x28] sm:$0xff]   ;;  %v3792_v53 = vunpack.c.l.s4 %v5711_v10  ;;  %v3795_v55 = vshrl.u32 %v3794_v59, 7  ;;  %vm4507_vm11 = vcmask 41984   ;;  %p4886_p12 = scmp.ne.s32.totalorder %s5693_s27, 3 }
 0x66f   : > { %4944 = vmatprep.subr.bf16.mxu0 %v5565_v54  ;;  %v5571_v19 = vld [vmem:[%s6119_s9 + $0xb0] sm:$0xff]   ;;  %v5572_v26 = vld [vmem:[%s6119_s9 + $0x60] sm:$0xff]   ;;  %v5573_v3 = vld [vmem:[%s6119_s9 + $0xe8] sm:$0xff]  }
 0x670   : > { %v5574_v5 = vld [vmem:[%s6119_s9 + $0x20] sm:$0xff]   ;;  %v5575_v1 = vld [vmem:[%s6119_s9 + $0xa8] sm:$0xff]   ;;  %v5576_v35 = vld [vmem:[%s6119_s9 + $0x58] sm:$0xff]   ;;  %v3793_v52 = vunpack.c.0.s8 %v3792_v53 }
 0x671   : > { %5078 = vmatmul.mubr.msk.bf16.vlgmr.msra.gmra.mxu0 %vm3741_vm9, %v3735_v62  ;;  %4925 = vmatpush3.bf16.msra.mxu1 %v5566_v8  ;;  %v5577_v11 = vld [vmem:[%s6119_s9 + $0xe0] sm:$0xff]   ;;  %v5578_v36 = vld [vmem:[%s6119_s9 + $0x18] sm:$0xff]   ;;  %v5580_v39 = vld [vmem:[%s6119_s9 + $0x50] sm:$0xff]  }
 0x672   : > { %4945 = vmatpush3.bf16.msra.mxu0 %v5567_v2  ;;  %4926 = vmatprep.subr.bf16.mxu1 %v5568_v42  ;;  %v5579_v61 = vld [vmem:[%s6119_s9 + $0xa0] sm:$0xff]   ;;  %v5581_v44 = vld [vmem:[%s6119_s9 + $0xd8] sm:$0xff]   ;;  %v5582_v29 = vld [vmem:[%s6119_s9 + $0x10] sm:$0xff]   ;;  %v7219_v4 = vsub.s32 %v3793_v52, %v3795_v55 }
 0x673   : > { %4946 = vmatprep.subr.bf16.mxu0 %v5569_v25  ;;  %v5583_v49 = vld [vmem:[%s6119_s9 + $0x98] sm:$0xff]   ;;  %v5584_v41 = vld [vmem:[%s6119_s9 + $0x48] sm:$0xff]   ;;  %v5585_v0 = vld [vmem:[%s6119_s9 + $0xd0] sm:$0xff]  }
 0x674   : > { %v5586_v15 = vld [vmem:[%s6119_s9 + $0x8] sm:$0xff]   ;;  %v5587_v33 = vld [vmem:[%s6119_s9 + $0x90] sm:$0xff]   ;;  %v5588_v27 = vld [vmem:[%s6119_s9 + $0x40] sm:$0xff]  }
 0x675   : > { %4927 = vmatpush3.bf16.msra.mxu1 %v5570_v60  ;;  %v5589_v9 = vld [vmem:[%s6119_s9 + $0xc8] sm:$0xff]   ;;  %v5590_v45 = vld [vmem:[%s6119_s9] sm:$0xff]   ;;  %v3603_v31 = vld [vmem:[#allocation5] sm:$0xff] }
 0x676   : > { %4947 = vmatpush3.bf16.msra.mxu0 %v5571_v19  ;;  %4928 = vmatprep.subr.bf16.mxu1 %v5572_v26  ;;  %v5591_v47 = vld [vmem:[%s6119_s9 + $0x88] sm:$0xff]   ;;  %v5593_v13 = vld [vmem:[%s6119_s9 + $0xc0] sm:$0xff]   ;;  %v5594_v23 = vld [vmem:[%s6119_s9 + $0x178] sm:$0xff]   ;;  %v3790_v56 = vcombine.high %v3603_v31, %v3603_v31  ;;  %v3797_v14 = vrot.slane %v3603_v31, %v7219_v4 }
 0x677   : > { %4948 = vmatprep.subr.bf16.mxu0 %v5573_v3  ;;  %v5595_v30 = vld [vmem:[%s6119_s9 + $0x80] sm:$0xff]   ;;  %v5598_v51 = vld [vmem:[%s6119_s9 + $0x1f8] sm:$0xff]   ;;  %v5597_v46 = vld [vmem:[%s6119_s9 + $0x170] sm:$0xff]  }
 0x678   : > { %v7224_v21 = vrot.slane %v3790_v56, %v7219_v4  ;;  %v3805_v38 = vcombine.high %v3797_v14, %v3797_v14  ;;  %v3813_v37 = vrot.slane %v3797_v14, %v7219_v4  ;;  %v5596_v43 = vld [vmem:[%s6119_s9 + $0x138] sm:$0xff]   ;;  %v5602_v20 = vld [vmem:[%s6119_s9 + $0x1f0] sm:$0xff]   ;;  %v5601_v7 = vld [vmem:[%s6119_s9 + $0x168] sm:$0xff]  }
 0x679   : > { %4929 = vmatpush3.bf16.msra.mxu1 %v5574_v5  ;;  %v5600_v57 = vld [vmem:[%s6119_s9 + $0x1b8] sm:$0xff]   ;;  %v5599_v16 = vld [vmem:[%s6119_s9 + $0x130] sm:$0xff]   ;;  %v5606_v12 = vld [vmem:[%s6119_s9 + $0x1e8] sm:$0xff]  }
 0x67a   : > { %4949 = vmatpush3.bf16.msra.mxu0 %v5575_v1  ;;  %4930 = vmatprep.subr.bf16.mxu1 %v5576_v35  ;;  %v3806_v40 = vcombine.high %v7224_v21, %v7224_v21  ;;  %v3827_v24 = vrot.slane %v3805_v38, %v7219_v4  ;;  %v3835_v50 = vcombine.high %v3813_v37, %v3813_v37  ;;  %v5604_v28 = vld [vmem:[%s6119_s9 + $0x1b0] sm:$0xff]   ;;  %v5603_v48 = vld [vmem:[%s6119_s9 + $0x128] sm:$0xff]   ;;  %v5605_v58 = vld [vmem:[%s6119_s9 + $0x160] sm:$0xff]  }
 0x67b   : > { %4950 = vmatprep.subr.bf16.mxu0 %v5577_v11  ;;  %v5608_v6 = vld [vmem:[%s6119_s9 + $0x1a8] sm:$0xff]   ;;  %v5610_v17 = vld [vmem:[%s6119_s9 + $0x1e0] sm:$0xff]   ;;  %v5609_v62 = vld [vmem:[%s6119_s9 + $0x158] sm:$0xff]  }
 0x67c   : > { %v3834_v32 = vrot.slane %v3806_v40, %v7219_v4  ;;  %v3837_v34 = vcombine.high %v3827_v24, %v3827_v24  ;;  %4263 = vmatprep.mubr.bf16.mxu1 %v3827_v24  ;;  %v5607_v18 = vld [vmem:[%s6119_s9 + $0x120] sm:$0xff]   ;;  %v5614_v8 = vld [vmem:[%s6119_s9 + $0x1d8] sm:$0xff]   ;;  %v5613_v42 = vld [vmem:[%s6119_s9 + $0x150] sm:$0xff]  }
 0x67d   : > { %4931 = vmatpush3.bf16.msra.mxu1 %v5578_v36  ;;  %v5612_v54 = vld [vmem:[%s6119_s9 + $0x1a0] sm:$0xff]   ;;  %v5611_v2 = vld [vmem:[%s6119_s9 + $0x118] sm:$0xff]   ;;  %v5618_v60 = vld [vmem:[%s6119_s9 + $0x1d0] sm:$0xff]  }
 0x67e   : > { %4951 = vmatpush3.bf16.msra.mxu0 %v5579_v61  ;;  %4932 = vmatprep.subr.bf16.mxu1 %v5580_v39  ;;  %v3838_v63 = vcombine.high %v3834_v32, %v3834_v32  ;;  %v5616_v25 = vld [vmem:[%s6119_s9 + $0x198] sm:$0xff]   ;;  %v5615_v19 = vld [vmem:[%s6119_s9 + $0x110] sm:$0xff]   ;;  %v5617_v26 = vld [vmem:[%s6119_s9 + $0x148] sm:$0xff]  }
 0x67f   : > { %4952 = vmatprep.subr.bf16.mxu0 %v5581_v44  ;;  %4303 = vmatprep.mubr.bf16.mxu0 %v3837_v34  ;;  %v5619_v3 = vld [vmem:[%s6119_s9 + $0x108] sm:$0xff]   ;;  %v5620_v5 = vld [vmem:[%s6119_s9 + $0x190] sm:$0xff]   ;;  %v5621_v1 = vld [vmem:[%s6119_s9 + $0x140] sm:$0xff]   ;;  %v3820_v44 = vrot.slane %v7224_v21, %v7219_v4 }
 0x680   : > { %v5622_v35 = vld [vmem:[%s6119_s9 + $0x1c8] sm:$0xff]   ;;  %v5625_v36 = vld [vmem:[%s6119_s9 + $0x1c0] sm:$0xff]  }
 0x681   : > { %4933 = vmatpush3.bf16.msra.mxu1 %v5582_v29  ;;  %v5624_v11 = vld [vmem:[%s6119_s9 + $0x188] sm:$0xff]   ;;  %v5623_v61 = vld [vmem:[%s6119_s9 + $0x100] sm:$0xff]   ;;  %v3836_v29 = vcombine.high %v3820_v44, %v3820_v44 }
 0x682   : > { %4953 = vmatpush3.bf16.msra.mxu0 %v5583_v49  ;;  %4934 = vmatprep.subr.bf16.mxu1 %v5584_v41  ;;  %v5626_v39 = vld [vmem:[%s6119_s9 + $0x180] sm:$0xff]   ;;  %v5627_v49 = vld [vmem:[%s6117_s25 + $0x38] sm:$0xff]  }
 0x683   : > { %4954 = vmatprep.subr.bf16.mxu0 %v5585_v0  ;;  %v5628_v41 = vld [vmem:[%s6117_s25 + $0x30] sm:$0xff]   ;;  %v5629_v0 = vld [vmem:[%s6117_s25 + $0x28] sm:$0xff]  }
 0x684   : > { %v5633_v59 = vld [vmem:[%s6117_s25 + $0x8] sm:$0xff]  }
 0x685   : > { %4935 = vmatpush3.bf16.msra.mxu1 %v5586_v15  ;;  %v5630_v15 = vld [vmem:[%s6117_s25 + $0x20] sm:$0xff]  }
 0x686   : > { %4955 = vmatpush3.bf16.msra.mxu0 %v5587_v33  ;;  %4936 = vmatprep.subr.bf16.mxu1 %v5588_v27  ;;  %v5631_v33 = vld [vmem:[%s6117_s25 + $0x18] sm:$0xff]   ;;  %v5632_v27 = vld [vmem:[%s6117_s25 + $0x10] sm:$0xff]  }
 0x687   : > { %4956 = vmatprep.subr.bf16.mxu0 %v5589_v9  ;;  %v5634_v9 = vld [vmem:[%s6117_s25] sm:$0xff]   ;;  %s7346_s25 = scalar_lea.vmem %s7332_s10, %s6107_s17 }
 0x689   : > { %4937 = vmatpush3.bf16.msra.mxu1 %v5590_v45 }
 0x68a   : > { %4957 = vmatpush3.bf16.msra.mxu0 %v5591_v47  ;;  %4966 = vmatprep.subr.bf16.mxu1 %v5594_v23 }
 0x68b   : > { %4958 = vmatprep.subr.bf16.mxu0 %v5593_v13 }
 0x68c   : > { %4264 = vmatmul.mubr.bf16.vlgmr.msra.gmra.mxu1 %v3813_v37 }
 0x68d   : > { %4967 = vmatpush3.bf16.msra.mxu1 %v5596_v43  ;;  %4343 = vmatprep.mubr.bf16.mxu1 %v3834_v32 }
 0x68e   : > { %4959 = vmatpush3.bf16.msra.mxu0 %v5595_v30  ;;  %4968 = vmatprep.subr.bf16.mxu1 %v5597_v46 }
 0x68f   : > { %4988 = vmatprep.subr.bf16.mxu0 %v5598_v51 }
 0x691   : > { %4304 = vmatmul.mubr.bf16.vlgmr.msra.gmra.mxu0 %v3835_v50  ;;  %4969 = vmatpush3.bf16.msra.mxu1 %v5599_v16 }
 0x692   : > { %4989 = vmatpush3.bf16.msra.mxu0 %v5600_v57  ;;  %4383 = vmatprep.mubr.bf16.mxu0 %v3838_v63  ;;  %v4877_v57 = vld [vmem:[%s7346_s25] ss:$0 sm:$0xff] }
 0x693   : > { %4990 = vmatprep.subr.bf16.mxu0 %v5602_v20  ;;  %4970 = vmatprep.subr.bf16.mxu1 %v5601_v7 }
 0x695   : > { %4971 = vmatpush3.bf16.msra.mxu1 %v5603_v48  ;;  %v4400_v48 = vld [vmem:[#allocation6] sm:$0x3] }
 0x696   : > { %4991 = vmatpush3.bf16.msra.mxu0 %v5604_v28  ;;  %4972 = vmatprep.subr.bf16.mxu1 %v5605_v58 }
 0x697   : > { %4992 = vmatprep.subr.bf16.mxu0 %v5606_v12 }
 0x699   : > { %4973 = vmatpush3.bf16.msra.mxu1 %v5607_v18 }
 0x69a   : > { %4993 = vmatpush3.bf16.msra.mxu0 %v5608_v6  ;;  %4974 = vmatprep.subr.bf16.mxu1 %v5609_v62 }
 0x69b   : > { %4994 = vmatprep.subr.bf16.mxu0 %v5610_v17 }
 0x69d   : > { %4975 = vmatpush3.bf16.msra.mxu1 %v5611_v2 }
 0x69e   : > { %4995 = vmatpush3.bf16.msra.mxu0 %v5612_v54  ;;  %4976 = vmatprep.subr.bf16.mxu1 %v5613_v42 }
 0x69f   : > { %4996 = vmatprep.subr.bf16.mxu0 %v5614_v8 }
 0x6a1   : > { %4977 = vmatpush3.bf16.msra.mxu1 %v5615_v19 }
 0x6a2   : > { %4997 = vmatpush3.bf16.msra.mxu0 %v5616_v25  ;;  %4978 = vmatprep.subr.bf16.mxu1 %v5617_v26 }
 0x6a3   : > { %4998 = vmatprep.subr.bf16.mxu0 %v5618_v60 }
 0x6a5   : > { %4979 = vmatpush3.bf16.msra.mxu1 %v5619_v3 }
 0x6a6   : > { %4999 = vmatpush3.bf16.msra.mxu0 %v5620_v5  ;;  %4980 = vmatprep.subr.bf16.mxu1 %v5621_v1 }
 0x6a7   : > { %5000 = vmatprep.subr.bf16.mxu0 %v5622_v35 }
 0x6a9   : > { %4981 = vmatpush3.bf16.msra.mxu1 %v5623_v61 }
 0x6aa   : > { %5001 = vmatpush3.bf16.msra.mxu0 %v5624_v11  ;;  %5081 = vmatprep.subr.bf16.mxu1 %v5709_v22 }
 0x6ab   : > { %5002 = vmatprep.subr.bf16.mxu0 %v5625_v36 }
 0x6ac   : > { %4344 = vmatmul.mubr.bf16.vlgmr.msra.gmra.mxu1 %v3820_v44 }
 0x6ad   : > { %5097 = vmatprep.mubr.msk.bf16.mxu1 %vm5710_vm10, %v5709_v22  ;;  %5082 = vmatpush3.bf16.msra.mxu1 %v5627_v49 }
 0x6ae   : > { %5003 = vmatpush3.bf16.msra.mxu0 %v5626_v39  ;;  %5083 = vmatprep.subr.bf16.mxu1 %v5709_v22 }
 0x6b1   : > { %4384 = vmatmul.mubr.bf16.vlgmr.msra.gmra.mxu0 %v3836_v29  ;;  %5084 = vmatpush3.bf16.msra.mxu1 %v5628_v41 }
 0x6b2   : > { %5085 = vmatprep.subr.bf16.mxu1 %v5709_v22 }
 0x6b5   : > { %5086 = vmatpush3.bf16.msra.mxu1 %v5629_v0 }
 0x6b6   : > { %5087 = vmatprep.subr.bf16.mxu1 %v5709_v22 }
 0x6b9   : > { %5088 = vmatpush3.bf16.msra.mxu1 %v5630_v15 }
 0x6ba   : > { %5089 = vmatprep.subr.bf16.mxu1 %v5709_v22 }
 0x6bd   : > { %5090 = vmatpush3.bf16.msra.mxu1 %v5631_v33 }
 0x6be   : > { %5091 = vmatprep.subr.bf16.mxu1 %v5709_v22 }
 0x6c1   : > { %5092 = vmatpush3.bf16.msra.mxu1 %v5632_v27 }
 0x6c2   : > { %5093 = vmatprep.subr.bf16.mxu1 %v5709_v22 }
 0x6c5   : > { %5094 = vmatpush3.bf16.msra.mxu1 %v5633_v59 }
 0x6c6   : > { %5095 = vmatprep.subr.bf16.mxu1 %v5709_v22 }
 0x6c9   : > { %5096 = vmatpush3.bf16.msra.mxu1 %v5634_v9 }
 0x731   : > { %v3783_v45 = vpop.f32.mrf.mxu0 }
 0x733   : > { %v5079_v47 = vpop.f32.mrf.mxu0 }
 0x735   : > { %v3786_v31 = vpop.f32.mrf.mxu0 }
 0x737   : > { %v5080_v10 = vpop.f32.mrf.mxu0 }
 0x74c   : > { %v4938_v53 = vpop.f32.mrf.mxu1 }
 0x74e   : > { %v4939_v55 = vpop.f32.mrf.mxu1 }
 0x74f   : > { %v4940_v51 = vadd.f32 %v4939_v55, %v4938_v53 }
 0x750   : > { %v4941_v23 = vpop.f32.mrf.mxu1 }
 0x751   : > { %v4960_v13 = vpop.f32.mrf.mxu0  ;;  %v4266_v38 = vadd.f32 %v4940_v51, %v3783_v45 }
 0x752   : > { %v4942_v52 = vpop.f32.mrf.mxu1 }
 0x753   : > { %v4961_v56 = vpop.f32.mrf.mxu0 }
 0x754   : > { %v4962_v14 = vadd.f32 %v4961_v56, %v4960_v13 }
 0x755   : > { %v4963_v30 = vpop.f32.mrf.mxu0 }
 0x756   : > { %v4306_v37 = vadd.f32 %v4962_v14, %v4266_v38 }
 0x757   : > { %v4964_v4 = vpop.f32.mrf.mxu0 }
 0x76c   : > { %v4982_v21 = vpop.f32.mrf.mxu1 }
 0x76e   : > { %v4983_v22 = vpop.f32.mrf.mxu1 }
 0x76f   : > { %v4984_v24 = vadd.f32 %v4983_v22, %v4982_v21 }
 0x770   : > { %v4985_v43 = vpop.f32.mrf.mxu1 }
 0x771   : > { %v5004_v40 = vpop.f32.mrf.mxu0  ;;  %v4346_v46 = vadd.f32 %v4984_v24, %v4306_v37 }
 0x772   : > { %v4986_v34 = vpop.f32.mrf.mxu1 }
 0x773   : > { %v5005_v50 = vpop.f32.mrf.mxu0 }
 0x774   : > { %v5006_v32 = vadd.f32 %v5005_v50, %v5004_v40 }
 0x775   : > { %v5007_v20 = vpop.f32.mrf.mxu0 }
 0x776   : > { %v4386_v63 = vadd.f32 %v5006_v32, %v4346_v46 }
 0x777   : > { %v5008_v16 = vpop.f32.mrf.mxu0 }
 0x778   : > { %v4398_v7 = vadd.f32 %v4877_v57, %v4386_v63 }
 0x77a   : > { %v4399_v28 = vmax.f32 %v4398_v7, 0.0 }
 0x77c   : > { %v4417_v12 = vpack.c.bf16 %v4399_v28, %v4399_v28 }
 0x77e   : > { %5098 = vmatmul.mubr.bf16.vlgmr.msra.gmra.mxu1 %v4417_v12 }
 0x83e   : > { %v4500_v58 = vpop.f32.mrf.mxu1 }
 0x83f   : > { %v4506_v6 = vadd.f32 %v4500_v58, %v4400_v48 }
 0x840   : > { %v5099_v17 = vpop.f32.mrf.mxu1  ;;  %4512 = sbr.rel (%p4886_p12) target bundleno = 2124 (0x84c), region = 162 }
 0x841   : > { %4508 = vst.msk [vmem:[#allocation6] sm:$0x3] %vm4507_vm11, %v4506_v6 }
 0x842   : > { %v4503_v18 = vpop.f32.mrf.mxu1 }
 0x844   : > { %v5100_v62 = vpop.f32.mrf.mxu1 }
 0x845   : > { %v4887_v8 = vld [vmem:[%s7334_s12] ss:$0 sm:$0xff] }
 0x848   : > { %v4513_v54 = vld [vmem:[#allocation6] sm:$0x3] }
 0x849   : > { %v4521_v2 = vadd.f32 %v4887_v8, %v4513_v54 }
 0x84b   : > { %4522 = vst.msk [vmem:[#allocation9] sm:$0x3] %vm4507_vm11, %v4521_v2 }
 0x84c PF: > { %s7347_s14 = sadd.s32 4294967295, %s5701_s29   ;;  %s5712_s22 = smov [#allocation9]  }
 0x84d   : > { %p7292_p13 = scmp.eq.s32.totalorder %s7347_s14, 3  ;;  %s4532_s15 = sshll.u32 %s5712_s22, 4  ;;  %s4533_s15 = int_to_ptr.vmem [resolvable:$true] %s4532_s15 }
 0x84e   : > { %s5635_s27 = scalar_lea.vmem %s4533_s15, 32  ;;  %p5642_p3 = scmp.lt.s32.totalorder %s4533_s15, %s4533_s15 }
 0x84f   : > { %p5636_p0 = scmp.ne.s32.totalorder %s4533_s15, %s5635_s27  ;;  %p5643_p4 = scmp.lt.s32.totalorder %s5635_s27, %s5635_s27 }
 0x851   : > { %p5637_p1 = pnand %p5636_p0, %p7292_p13  ;;  %p5644_p5 = por %p5643_p4, %p5642_p3 }
 0x853   : > { %p5638_p2 = pneg %p5637_p1 }
 0x855   : > { %p5645_p6 = pnand %p5644_p5, %p5638_p2 }
 0x857   : > { %5648 = shalt.err (!%p5645_p6)
}
 0x858   : > { %5134 = dma.vmem_to_hbm [thread:$0]  (%p7292_p13), %s4533_s15, 32, %s7335_s13, [#allocation10]  }
 0x859   : > { %5680 = dma.done.wait (%p7292_p13), [#allocation10], 32  }
 0x85a   : > { %5682 = vsyncadd (%p7292_p13), [#allocation10], 4294967264 }
 0x85b PF: > { %s24_s29 = sadd.s32 1, %s5701_s29   ;;  %s7349_s27 = sld [smem:[#allocation12_spill]] }
 0x85c   : > { %p21_p7 = scmp.ge.s32.totalorder %s24_s29, 6   ;;  %s7350_s28 = sld [smem:[#allocation13_spill]] }
 0x85d   : > { %s7351_s25 = smov %s5689_s26  ;;  %s7352_s26 = smov %s5823_s18 }
 0x85e   :  { %23 = sbr.rel (!%p21_p7) target bundleno = 6 (0x6), region = 228 }
 0x863   :  { %4545 = vsyncpa [#allocation10], 1 }
 0x864   :  { %4547 = vsyncpa [#allocation10 + $0x1], 1 }

</bundles_post_ra>
